<compile_context>
chip_gen: v7x
topology: tpu7x:2x2x1
jax: 0.10.0
libtpu: 0.0.40
codegen_flags: <defaults>
</compile_context>

<pallas_src>
import functools
import numpy as np
import jax
import jax.numpy as jnp
from jax import lax
from jax.experimental import pallas as pl
from jax.experimental.pallas import tpu as pltpu

F32 = jnp.float32
BF16 = jnp.bfloat16

M_CAP, N_CAP, K_CAP = 512, 512, 2048       # matmul tile caps
VMEM_LIMIT = 48 * 1024 * 1024              # fits v7x (64 MiB phys) with headroom


def _ru(x, m):
    return (x + m - 1) // m * m


def _tiles(dim, align, cap):
    """Pick (tile, padded_dim) with tile % align == 0, tile <= cap, minimal pad."""
    d = _ru(max(int(dim), 1), align)
    n = -(-d // cap)
    t = _ru(-(-d // n), align)
    return t, t * n


def _divisor_tile(n, cap):
    """Largest divisor of n that is <= cap (>=1)."""
    for d in range(min(cap, n), 0, -1):
        if n % d == 0:
            return d
    return 1


# --------------------------------------------------------------------------
# Generic tiled matmul kernel (im2col convs, 1x1 convs, linear head)
# --------------------------------------------------------------------------
def _mm_kernel(*refs, relu, has_res):
    x_ref, w_ref, b_ref = refs[0], refs[1], refs[2]
    res_ref = refs[3] if has_res else None
    o_ref, acc_ref = refs[-2], refs[-1]
    k = pl.program_id(2)

    @pl.when(k == 0)
    def _():
        acc_ref[...] = jnp.zeros_like(acc_ref)

    acc_ref[...] += jnp.dot(x_ref[...], w_ref[...],
                            preferred_element_type=jnp.float32)

    @pl.when(k == pl.num_programs(2) - 1)
    def _():
        r = acc_ref[...] + b_ref[...]
        if has_res:
            r = r + res_ref[...].astype(jnp.float32)
        if relu:
            r = jnp.maximum(r, 0.0)
        o_ref[...] = r.astype(o_ref.dtype)


def matmul_bias_act(x, w, b, relu=False, res=None, out_dtype=BF16):
    """(M,K) @ (K,N) + b[N] (+ res[M,N]), optional ReLU. bf16 MXU, f32 scratch."""
    M, K = x.shape
    K2, N = w.shape
    assert K == K2
    TM, Mp = _tiles(M, 16, M_CAP)
    TN, Np = _tiles(N, 128, N_CAP)
    TK, Kp = _tiles(K, 128, K_CAP)
    # v7x has 2 TensorCores: keep >=2 blocks on the parallel axes when possible.
    if Mp // TM == 1 and Np // TN == 1 and Mp % 32 == 0:
        TM = Mp // 2

    xp = jnp.pad(x.astype(BF16), ((0, Mp - M), (0, Kp - K)))
    wp = jnp.pad(w.astype(BF16), ((0, Kp - K), (0, Np - N)))
    bp = jnp.pad(b.astype(F32), (0, Np - N)).reshape(1, Np)

    ins = [xp, wp, bp]
    in_specs = [
        pl.BlockSpec((TM, TK), lambda i, j, k: (i, k)),
        pl.BlockSpec((TK, TN), lambda i, j, k: (k, j)),
        pl.BlockSpec((1, TN), lambda i, j, k: (0, j)),
    ]
    has_res = res is not None
    if has_res:
        rp = jnp.pad(res.astype(BF16), ((0, Mp - M), (0, Np - N)))
        ins.append(rp)
        in_specs.append(pl.BlockSpec((TM, TN), lambda i, j, k: (i, j)))

    out_bytes = Mp * Np * jnp.dtype(out_dtype).itemsize
    bytes_acc = int(sum(a.size * a.dtype.itemsize for a in ins) + out_bytes)

    out = pl.pallas_call(
        functools.partial(_mm_kernel, relu=relu, has_res=has_res),
        out_shape=jax.ShapeDtypeStruct((Mp, Np), out_dtype),
        grid=(Mp // TM, Np // TN, Kp // TK),
        in_specs=in_specs,
        out_specs=pl.BlockSpec((TM, TN), lambda i, j, k: (i, j)),
        scratch_shapes=[pltpu.VMEM((TM, TN), F32)],
        compiler_params=pltpu.CompilerParams(
            dimension_semantics=("parallel", "parallel", "arbitrary"),
            vmem_limit_bytes=VMEM_LIMIT),
        cost_estimate=pl.CostEstimate(flops=2 * Mp * Np * Kp, transcendentals=0,
                                      bytes_accessed=bytes_acc),
    )(*ins)
    return out[:M, :N]


# --------------------------------------------------------------------------
# Fused stride-1 3x3 convolution (multi-slab, bias + residual + ReLU epilogue)
# --------------------------------------------------------------------------
def _conv3x3_kernel(*refs, nslabs, th, wo, relu, has_res):
    b_ref = refs[3 * nslabs]
    res_ref = refs[3 * nslabs + 1] if has_res else None
    o_ref = refs[-1]
    cout = o_ref.shape[-1]

    accs = [jnp.zeros((wo, cout), jnp.float32) for _ in range(th)]
    for s in range(nslabs):
        xa, xb, wr = refs[3 * s], refs[3 * s + 1], refs[3 * s + 2]
        w_taps = [wr[q] for q in range(9)]                 # (cin, cout) bf16 each
        rows = []
        for r in range(th + 2):                            # halo'd input rows
            if r < th:
                rows.append(xa[0, r])                      # (Wp, cin)
            else:
                rows.append(xb[0, r - th])
        for t in range(th):
            for i in range(3):
                row = rows[t + i]
                for j in range(3):
                    accs[t] = accs[t] + jnp.dot(
                        row[j:j + wo, :], w_taps[3 * i + j],
                        preferred_element_type=jnp.float32)

    bias = b_ref[...].astype(jnp.float32)                  # (1, cout)
    for t in range(th):
        r = accs[t] + bias
        if has_res:
            r = r + res_ref[0, t].astype(jnp.float32)
        if relu:
            r = jnp.maximum(r, 0.0)
        o_ref[0, t] = r.astype(o_ref.dtype)


def conv3x3_s1(slabs, w_parts, b, *, relu, res=None, out_dtype=BF16):
    """Fused 3x3 / stride-1 / pad-1 conv over channel-concatenated `slabs`."""
    N, H, W, _ = slabs[0].shape
    assert all(s.shape[:3] == (N, H, W) for s in slabs)
    assert all(w.shape[0] == 3 and w.shape[1] == 3 for w in w_parts)
    Ho, Wo = H, W
    cout = w_parts[0].shape[3]

    TH = _divisor_tile(Ho, 8)
    assert TH >= 2, "spatial size too small for the fused conv path"
    RB = Ho // TH
    Hp = (RB + 1) * TH                      # padded rows incl. halo block
    Wp = W + 2

    inputs, in_specs, cins = [], [], []
    for x, w in zip(slabs, w_parts):
        cin = x.shape[3]
        cins.append(cin)
        xp = jnp.pad(x.astype(BF16), ((0, 0), (1, Hp - H - 1), (1, 1), (0, 0)))
        wp = w.reshape(9, cin, cout).astype(BF16)
        inputs += [xp, xp, wp]
        in_specs += [
            pl.BlockSpec((1, TH, Wp, cin), lambda n, rb: (n, rb, 0, 0)),
            pl.BlockSpec((1, TH, Wp, cin), lambda n, rb: (n, rb + 1, 0, 0)),
            pl.BlockSpec((9, cin, cout), lambda n, rb: (0, 0, 0)),
        ]

    inputs.append(b.astype(F32).reshape(1, cout))
    in_specs.append(pl.BlockSpec((1, cout), lambda n, rb: (0, 0)))

    has_res = res is not None
    if has_res:
        inputs.append(res.astype(BF16))
        in_specs.append(pl.BlockSpec((1, TH, Wo, cout), lambda n, rb: (n, rb, 0, 0)))

    flops = 2 * N * Ho * Wo * cout * 9 * sum(cins)
    bytes_acc = int(sum(a.size * a.dtype.itemsize for a in inputs)
                    + N * Ho * Wo * cout * jnp.dtype(out_dtype).itemsize)

    return pl.pallas_call(
        functools.partial(_conv3x3_kernel, nslabs=len(slabs), th=TH, wo=Wo,
                          relu=relu, has_res=has_res),
        out_shape=jax.ShapeDtypeStruct((N, Ho, Wo, cout), out_dtype),
        grid=(N, RB),
        in_specs=in_specs,
        out_specs=pl.BlockSpec((1, TH, Wo, cout), lambda n, rb: (n, rb, 0, 0)),
        compiler_params=pltpu.CompilerParams(
            dimension_semantics=("parallel", "parallel"),
            vmem_limit_bytes=VMEM_LIMIT),
        cost_estimate=pl.CostEstimate(flops=flops, transcendentals=0,
                                      bytes_accessed=bytes_acc),
    )(*inputs)


# --------------------------------------------------------------------------
# Max pool 3x3 / stride 2 / pad 1
# --------------------------------------------------------------------------
def _max9_kernel(*refs):
    o_ref = refs[-1]
    m = refs[0][...]
    for r in refs[1:-1]:
        m = jnp.maximum(m, r[...])
    o_ref[...] = m


def maxpool3x3_s2_p1(x):
    N, H, W, C = x.shape
    Ho = (H - 1) // 2 + 1
    Wo = (W - 1) // 2 + 1
    xp = jnp.pad(x, ((0, 0), (1, 1), (1, 1), (0, 0)), constant_values=-jnp.inf)
    M = N * Ho * Wo
    TEc, Mp = _tiles(M, 16, M_CAP)
    views = []
    for i in range(3):
        for j in range(3):
            v = lax.slice(xp, (0, i, j, 0),
                          (N, i + (Ho - 1) * 2 + 1, j + (Wo - 1) * 2 + 1, C),
                          (1, 2, 2, 1)).reshape(M, C)
            views.append(jnp.pad(v, ((0, Mp - M), (0, 0))))
    out = pl.pallas_call(
        _max9_kernel,
        out_shape=jax.ShapeDtypeStruct((Mp, C), x.dtype),
        grid=(Mp // TEc,),
        in_specs=[pl.BlockSpec((TEc, C), lambda i: (i, 0))] * 9,
        out_specs=pl.BlockSpec((TEc, C), lambda i: (i, 0)),
        compiler_params=pltpu.CompilerParams(
            dimension_semantics=("parallel",), vmem_limit_bytes=VMEM_LIMIT),
    )(*views)
    return out[:M].reshape(N, Ho, Wo, C)


# --------------------------------------------------------------------------
# Bilinear x2 upsample (align_corners=True), row-blocked
# --------------------------------------------------------------------------
def _interp_1d(n_in, n_out):
    if n_in == 1:
        z = np.zeros(n_out, np.int32)
        return z, z.copy(), np.zeros(n_out, np.float32)
    src = np.arange(n_out) * (n_in - 1) / (n_out - 1)
    i0 = np.minimum(np.floor(src).astype(np.int32), n_in - 1)
    i1 = np.minimum(i0 + 1, n_in - 1)
    f = (src - i0).astype(np.float32)
    return i0, i1, f


def _interp_matrix(n_in, n_out):
    i0, i1, f = _interp_1d(n_in, n_out)
    A = np.zeros((n_out, n_in), np.float32)
    A[np.arange(n_out), i0] += 1.0 - f
    A[np.arange(n_out), i1] += f
    return A


def _upsample_kernel(i0_ref, i1_ref, f_ref, aw_ref, x_ref, o_ref, *, tho):
    aw = aw_ref[...]                                    # (Wo, W) f32
    base = pl.program_id(1) * tho
    for t in range(tho):
        g = base + t
        r0 = x_ref[0, pl.ds(i0_ref[g], 1)][0].astype(jnp.float32)   # (W, C)
        r1 = x_ref[0, pl.ds(i1_ref[g], 1)][0].astype(jnp.float32)
        f = f_ref[g]
        row = (1.0 - f) * r0 + f * r1
        o_ref[0, t] = jnp.dot(aw, row,
                              preferred_element_type=jnp.float32).astype(o_ref.dtype)


def upsample_bilinear_x2(x):
    N, H, W, C = x.shape
    Ho, Wo = 2 * H, 2 * W
    i0, i1, fh = _interp_1d(H, Ho)
    aw = jnp.asarray(_interp_matrix(W, Wo))
    tho = _divisor_tile(Ho, 16)
    return pl.pallas_call(
        functools.partial(_upsample_kernel, tho=tho),
        out_shape=jax.ShapeDtypeStruct((N, Ho, Wo, C), BF16),
        grid=(N, Ho // tho),
        in_specs=[
            pl.BlockSpec(memory_space=pltpu.MemorySpace.SMEM),
            pl.BlockSpec(memory_space=pltpu.MemorySpace.SMEM),
            pl.BlockSpec(memory_space=pltpu.MemorySpace.SMEM),
            pl.BlockSpec((Wo, W), lambda n, r: (0, 0)),
            pl.BlockSpec((1, H, W, C), lambda n, r: (n, 0, 0, 0)),
        ],
        out_specs=pl.BlockSpec((1, tho, Wo, C), lambda n, r: (n, r, 0, 0)),
        compiler_params=pltpu.CompilerParams(
            dimension_semantics=("parallel", "parallel"),
            vmem_limit_bytes=VMEM_LIMIT),
    )(jnp.asarray(i0, jnp.int32), jnp.asarray(i1, jnp.int32),
      jnp.asarray(fh, F32), aw, x.astype(BF16))


# --------------------------------------------------------------------------
# Conv wrappers
# --------------------------------------------------------------------------
def _im2col(x, kh, kw, stride, pad):
    x = x.astype(BF16)
    N, H, W, C = x.shape
    Ho = (H + 2 * pad - kh) // stride + 1
    Wo = (W + 2 * pad - kw) // stride + 1
    xp = jnp.pad(x, ((0, 0), (pad, pad), (pad, pad), (0, 0)))
    cols = []
    for i in range(kh):
        for j in range(kw):
            cols.append(lax.slice(
                xp, (0, i, j, 0),
                (N, i + (Ho - 1) * stride + 1, j + (Wo - 1) * stride + 1, C),
                (1, stride, stride, 1)))
    patches = jnp.stack(cols, axis=3).reshape(N * Ho * Wo, kh * kw * C)
    return patches, (N, Ho, Wo)


def conv2d(x, w, b, stride=1, pad=0, relu=False, res=None, out_dtype=BF16):
    """Conv2d (NHWC, weight HWIO) + bias (+ residual) + optional ReLU."""
    kh, kw, cin, cout = w.shape
    if (kh == 3 and kw == 3 and stride == 1 and pad == 1
            and x.shape[1] >= 2 and x.shape[2] >= 2):
        return conv3x3_s1([x], [w], b, relu=relu, res=res, out_dtype=out_dtype)
    if kh == 1 and kw == 1 and stride == 1 and pad == 0:
        N, H, W, _ = x.shape
        res_flat = None if res is None else res.reshape(N * H * W, cout)
        out = matmul_bias_act(x.reshape(N * H * W, cin), w.reshape(cin, cout),
                              b, relu=relu, res=res_flat, out_dtype=out_dtype)
        return out.reshape(N, H, W, cout)
    # strided convs keep the im2col path (small share of total traffic)
    patches, (N, Ho, Wo) = _im2col(x, kh, kw, stride, pad)
    res_flat = None if res is None else res.reshape(N * Ho * Wo, cout)
    out = matmul_bias_act(patches, w.reshape(kh * kw * cin, cout), b,
                          relu=relu, res=res_flat, out_dtype=out_dtype)
    return out.reshape(N, Ho, Wo, cout)


def conv_cat_relu(xs, w, b):
    """ReLU(conv(concat(xs, channel), w) + b) fused in one pallas_call."""
    off, parts = 0, []
    for xi in xs:
        ci = xi.shape[-1]
        parts.append(w[:, :, off:off + ci, :])
        off += ci
    return conv3x3_s1(xs, parts, b, relu=True)


# --------------------------------------------------------------------------
# Parameters (deterministic synthetic init; BN folded into convs; bf16 weights)
# --------------------------------------------------------------------------
class ParamGen:
    def __init__(self, key):
        self._key = key
        self._i = 0

    def _next(self):
        self._i += 1
        return jax.random.fold_in(self._key, self._i)

    def conv(self, kh, kw, cin, cout):
        fan_in = kh * kw * cin
        w = jax.random.normal(self._next(), (kh, kw, cin, cout), F32) * np.sqrt(2.0 / fan_in)
        b = 0.05 * jax.random.normal(self._next(), (cout,), F32)
        return w.astype(BF16), b

    def conv_bn(self, kh, kw, cin, cout):
        fan_in = kh * kw * cin
        w = jax.random.normal(self._next(), (kh, kw, cin, cout), F32) * np.sqrt(2.0 / fan_in)
        gamma = 1.0 + 0.1 * jax.random.normal(self._next(), (cout,), F32)
        beta = 0.1 * jax.random.normal(self._next(), (cout,), F32)
        scale = gamma / jnp.sqrt(1.0 + 1e-5)
        return (w * scale).astype(BF16), beta

    def linear(self, din, dout):
        w = jax.random.normal(self._next(), (din, dout), F32) / np.sqrt(din)
        b = 0.05 * jax.random.normal(self._next(), (dout,), F32)
        return w.astype(BF16), b


def make_basic_block(pg, cin, cout, stride):
    p = {"stride": stride}
    p["w1"], p["b1"] = pg.conv_bn(3, 3, cin, cout)
    p["w2"], p["b2"] = pg.conv_bn(3, 3, cout, cout)
    if stride != 1 or cin != cout:
        p["wd"], p["bd"] = pg.conv_bn(1, 1, cin, cout)
    return p


def basic_block(x, p):
    s = p["stride"]
    if "wd" in p:
        identity = conv2d(x, p["wd"], p["bd"], stride=s, pad=0, relu=False)
    else:
        identity = x
    out = conv2d(x, p["w1"], p["b1"], stride=s, pad=1, relu=True)
    # residual add + final ReLU fused into the second conv's epilogue
    return conv2d(out, p["w2"], p["b2"], stride=1, pad=1, relu=True, res=identity)


def init_params(key, n_class, feat_hw):
    pg = ParamGen(key)
    p = {}
    p["conv1"] = pg.conv_bn(7, 7, 3, 64)
    p["l1"] = [make_basic_block(pg, 64, 64, 1), make_basic_block(pg, 64, 64, 1)]
    p["l2"] = [make_basic_block(pg, 64, 128, 2), make_basic_block(pg, 128, 128, 1)]
    p["l3"] = [make_basic_block(pg, 128, 256, 2), make_basic_block(pg, 256, 256, 1)]
    p["l4"] = [make_basic_block(pg, 256, 512, 2), make_basic_block(pg, 512, 512, 1)]
    p["layer0_1x1"] = pg.conv(1, 1, 64, 64)
    p["layer1_1x1"] = pg.conv(1, 1, 64, 64)
    p["layer2_1x1"] = pg.conv(1, 1, 128, 128)
    p["layer3_1x1"] = pg.conv(1, 1, 256, 256)
    p["layer4_1x1"] = pg.conv(1, 1, 512, 512)
    p["conv_up3"] = pg.conv(3, 3, 512 + 256, 512)
    p["conv_up2"] = pg.conv(3, 3, 512 + 128, 256)
    p["conv_up1"] = pg.conv(3, 3, 256 + 64, 256)
    p["conv_up0"] = pg.conv(3, 3, 256 + 64, 128)
    p["conv_os0"] = pg.conv(3, 3, 3, 64)
    p["conv_os1"] = pg.conv(3, 3, 64, 64)
    p["conv_os2"] = pg.conv(3, 3, 128 + 64, 64)
    p["conv_last"] = pg.conv(1, 1, 64, n_class)
    p["L0"] = pg.linear(512 * feat_hw * feat_hw, 400)
    p["L1"] = pg.linear(400, 1)
    return p


# --------------------------------------------------------------------------
# UNet forward (matches the PyTorch module's forward)
# --------------------------------------------------------------------------
def unet_forward(p, x_nchw):
    x = jnp.transpose(x_nchw, (0, 2, 3, 1)).astype(BF16)          # NCHW -> NHWC

    x_original = conv2d(x, *p["conv_os0"], stride=1, pad=1, relu=True)
    x_original = conv2d(x_original, *p["conv_os1"], stride=1, pad=1, relu=True)

    layer0 = conv2d(x, *p["conv1"], stride=2, pad=3, relu=True)    # 1/2
    h = maxpool3x3_s2_p1(layer0)                                   # 1/4
    for blk in p["l1"]:
        h = basic_block(h, blk)
    layer1 = h                                                     # 1/4,  64
    for blk in p["l2"]:
        h = basic_block(h, blk)
    layer2 = h                                                     # 1/8,  128
    for blk in p["l3"]:
        h = basic_block(h, blk)
    layer3 = h                                                     # 1/16, 256
    for blk in p["l4"]:
        h = basic_block(h, blk)
    layer4 = h                                                     # 1/32, 512

    layer4 = conv2d(layer4, *p["layer4_1x1"], relu=True)
    bs = layer4.shape[0]
    xx = jnp.transpose(layer4, (0, 3, 1, 2)).reshape(bs, -1)       # NCHW flatten
    hid = matmul_bias_act(xx, *p["L0"], relu=True)
    nob = matmul_bias_act(hid, *p["L1"], relu=False, out_dtype=F32)

    u = upsample_bilinear_x2(layer4)
    l3s = conv2d(layer3, *p["layer3_1x1"], relu=True)
    u = conv_cat_relu([u, l3s], *p["conv_up3"])

    u = upsample_bilinear_x2(u)
    l2s = conv2d(layer2, *p["layer2_1x1"], relu=True)
    u = conv_cat_relu([u, l2s], *p["conv_up2"])

    u = upsample_bilinear_x2(u)
    l1s = conv2d(layer1, *p["layer1_1x1"], relu=True)
    u = conv_cat_relu([u, l1s], *p["conv_up1"])

    u = upsample_bilinear_x2(u)
    l0s = conv2d(layer0, *p["layer0_1x1"], relu=True)
    u = conv_cat_relu([u, l0s], *p["conv_up0"])

    u = upsample_bilinear_x2(u)
    u = conv_cat_relu([u, x_original], *p["conv_os2"])
    out = conv2d(u, *p["conv_last"], relu=False, out_dtype=F32)

    return jnp.transpose(out, (0, 3, 1, 2)), nob                   # NCHW, [bs,1]


# --------------------------------------------------------------------------
if __name__ == "__main__":
    key = jax.random.PRNGKey(0)
    n_class = 2
    H = W = 64                      # small test size (multiple of 64)
    params = init_params(jax.random.fold_in(key, 123), n_class, H // 32)
    x = jax.random.normal(jax.random.fold_in(key, 7), (1, 3, H, W), F32)

    out, nob = unet_forward(params, x)
    out = jax.block_until_ready(out)
    nob = jax.block_until_ready(nob)

    assert out.shape == (1, n_class, H, W), out.shape
    assert nob.shape == (1, 1), nob.shape
    assert bool(jnp.isfinite(out).all()) and bool(jnp.isfinite(nob).all())
    print("KERNEL_OK")
</pallas_src>

<mosaic_0001>
module attributes {stable_mosaic.version = 11 : i64} {
  func.func @_conv3x3_kernel(%arg0: i32, %arg1: i32, %arg2: memref<1x8x66x3xbf16, #tpu.memory_space<vmem>>, %arg3: memref<1x8x66x3xbf16, #tpu.memory_space<vmem>>, %arg4: memref<9x3x64xbf16, #tpu.memory_space<vmem>>, %arg5: memref<1x64xf32, #tpu.memory_space<vmem>>, %arg6: memref<1x8x64x64xbf16, #tpu.memory_space<vmem>>) attributes {dimension_semantics = [#tpu.dimension_semantics<parallel>, #tpu.dimension_semantics<parallel>], iteration_bounds = array<i64: 1, 8>, scalar_prefetch = 0 : i64, scratch_operands = 0 : i64, tpu.core_type = #tpu.core_type<tc>, window_params = [{transform_indices = @transform_0, window_bounds = array<i64: 1, 8, 66, 3>}, {transform_indices = @transform_1, window_bounds = array<i64: 1, 8, 66, 3>}, {pipeline_mode = #tpu.pipeline_mode<synchronous>, transform_indices = @transform_2, window_bounds = array<i64: 9, 3, 64>}, {pipeline_mode = #tpu.pipeline_mode<synchronous>, transform_indices = @transform_3, window_bounds = array<i64: 1, 64>}, {transform_indices = @transform_4, window_bounds = array<i64: 1, 8, 64, 64>}]} {
    %cst = arith.constant 0.000000e+00 : f32
    %0 = vector.broadcast %cst : f32 to vector<64x64xf32>
    %cst_0 = arith.constant 0.000000e+00 : f32
    %1 = vector.broadcast %cst_0 : f32 to vector<64x64xf32>
    %cst_1 = arith.constant 0.000000e+00 : f32
    %2 = vector.broadcast %cst_1 : f32 to vector<64x64xf32>
    %cst_2 = arith.constant 0.000000e+00 : f32
    %3 = vector.broadcast %cst_2 : f32 to vector<64x64xf32>
    %cst_3 = arith.constant 0.000000e+00 : f32
    %4 = vector.broadcast %cst_3 : f32 to vector<64x64xf32>
    %cst_4 = arith.constant 0.000000e+00 : f32
    %5 = vector.broadcast %cst_4 : f32 to vector<64x64xf32>
    %cst_5 = arith.constant 0.000000e+00 : f32
    %6 = vector.broadcast %cst_5 : f32 to vector<64x64xf32>
    %cst_6 = arith.constant 0.000000e+00 : f32
    %7 = vector.broadcast %cst_6 : f32 to vector<64x64xf32>
    %c0 = arith.constant 0 : index
    %c0_7 = arith.constant 0 : index
    %c0_8 = arith.constant 0 : index
    %8 = vector.load %arg4[%c0, %c0_7, %c0_8] : memref<9x3x64xbf16, #tpu.memory_space<vmem>>, vector<1x3x64xbf16>
    %9 = vector.shape_cast %8 : vector<1x3x64xbf16> to vector<3x64xbf16>
    %c1 = arith.constant 1 : index
    %c0_9 = arith.constant 0 : index
    %c0_10 = arith.constant 0 : index
    %10 = vector.load %arg4[%c1, %c0_9, %c0_10] : memref<9x3x64xbf16, #tpu.memory_space<vmem>>, vector<1x3x64xbf16>
    %11 = vector.shape_cast %10 : vector<1x3x64xbf16> to vector<3x64xbf16>
    %c2 = arith.constant 2 : index
    %c0_11 = arith.constant 0 : index
    %c0_12 = arith.constant 0 : index
    %12 = vector.load %arg4[%c2, %c0_11, %c0_12] : memref<9x3x64xbf16, #tpu.memory_space<vmem>>, vector<1x3x64xbf16>
    %13 = vector.shape_cast %12 : vector<1x3x64xbf16> to vector<3x64xbf16>
    %c3 = arith.constant 3 : index
    %c0_13 = arith.constant 0 : index
    %c0_14 = arith.constant 0 : index
    %14 = vector.load %arg4[%c3, %c0_13, %c0_14] : memref<9x3x64xbf16, #tpu.memory_space<vmem>>, vector<1x3x64xbf16>
    %15 = vector.shape_cast %14 : vector<1x3x64xbf16> to vector<3x64xbf16>
    %c4 = arith.constant 4 : index
    %c0_15 = arith.constant 0 : index
    %c0_16 = arith.constant 0 : index
    %16 = vector.load %arg4[%c4, %c0_15, %c0_16] : memref<9x3x64xbf16, #tpu.memory_space<vmem>>, vector<1x3x64xbf16>
    %17 = vector.shape_cast %16 : vector<1x3x64xbf16> to vector<3x64xbf16>
    %c5 = arith.constant 5 : index
    %c0_17 = arith.constant 0 : index
    %c0_18 = arith.constant 0 : index
    %18 = vector.load %arg4[%c5, %c0_17, %c0_18] : memref<9x3x64xbf16, #tpu.memory_space<vmem>>, vector<1x3x64xbf16>
    %19 = vector.shape_cast %18 : vector<1x3x64xbf16> to vector<3x64xbf16>
    %c6 = arith.constant 6 : index
    %c0_19 = arith.constant 0 : index
    %c0_20 = arith.constant 0 : index
    %20 = vector.load %arg4[%c6, %c0_19, %c0_20] : memref<9x3x64xbf16, #tpu.memory_space<vmem>>, vector<1x3x64xbf16>
    %21 = vector.shape_cast %20 : vector<1x3x64xbf16> to vector<3x64xbf16>
    %c7 = arith.constant 7 : index
    %c0_21 = arith.constant 0 : index
    %c0_22 = arith.constant 0 : index
    %22 = vector.load %arg4[%c7, %c0_21, %c0_22] : memref<9x3x64xbf16, #tpu.memory_space<vmem>>, vector<1x3x64xbf16>
    %23 = vector.shape_cast %22 : vector<1x3x64xbf16> to vector<3x64xbf16>
    %c8 = arith.constant 8 : index
    %c0_23 = arith.constant 0 : index
    %c0_24 = arith.constant 0 : index
    %24 = vector.load %arg4[%c8, %c0_23, %c0_24] : memref<9x3x64xbf16, #tpu.memory_space<vmem>>, vector<1x3x64xbf16>
    %25 = vector.shape_cast %24 : vector<1x3x64xbf16> to vector<3x64xbf16>
    %c0_25 = arith.constant 0 : index
    %c0_26 = arith.constant 0 : index
    %c0_27 = arith.constant 0 : index
    %c0_28 = arith.constant 0 : index
    %26 = vector.load %arg2[%c0_25, %c0_26, %c0_27, %c0_28] : memref<1x8x66x3xbf16, #tpu.memory_space<vmem>>, vector<1x1x66x3xbf16>
    %27 = vector.shape_cast %26 : vector<1x1x66x3xbf16> to vector<66x3xbf16>
    %c0_29 = arith.constant 0 : index
    %c1_30 = arith.constant 1 : index
    %c0_31 = arith.constant 0 : index
    %c0_32 = arith.constant 0 : index
    %28 = vector.load %arg2[%c0_29, %c1_30, %c0_31, %c0_32] : memref<1x8x66x3xbf16, #tpu.memory_space<vmem>>, vector<1x1x66x3xbf16>
    %29 = vector.shape_cast %28 : vector<1x1x66x3xbf16> to vector<66x3xbf16>
    %c0_33 = arith.constant 0 : index
    %c2_34 = arith.constant 2 : index
    %c0_35 = arith.constant 0 : index
    %c0_36 = arith.constant 0 : index
    %30 = vector.load %arg2[%c0_33, %c2_34, %c0_35, %c0_36] : memref<1x8x66x3xbf16, #tpu.memory_space<vmem>>, vector<1x1x66x3xbf16>
    %31 = vector.shape_cast %30 : vector<1x1x66x3xbf16> to vector<66x3xbf16>
    %c0_37 = arith.constant 0 : index
    %c3_38 = arith.constant 3 : index
    %c0_39 = arith.constant 0 : index
    %c0_40 = arith.constant 0 : index
    %32 = vector.load %arg2[%c0_37, %c3_38, %c0_39, %c0_40] : memref<1x8x66x3xbf16, #tpu.memory_space<vmem>>, vector<1x1x66x3xbf16>
    %33 = vector.shape_cast %32 : vector<1x1x66x3xbf16> to vector<66x3xbf16>
    %c0_41 = arith.constant 0 : index
    %c4_42 = arith.constant 4 : index
    %c0_43 = arith.constant 0 : index
    %c0_44 = arith.constant 0 : index
    %34 = vector.load %arg2[%c0_41, %c4_42, %c0_43, %c0_44] : memref<1x8x66x3xbf16, #tpu.memory_space<vmem>>, vector<1x1x66x3xbf16>
    %35 = vector.shape_cast %34 : vector<1x1x66x3xbf16> to vector<66x3xbf16>
    %c0_45 = arith.constant 0 : index
    %c5_46 = arith.constant 5 : index
    %c0_47 = arith.constant 0 : index
    %c0_48 = arith.constant 0 : index
    %36 = vector.load %arg2[%c0_45, %c5_46, %c0_47, %c0_48] : memref<1x8x66x3xbf16, #tpu.memory_space<vmem>>, vector<1x1x66x3xbf16>
    %37 = vector.shape_cast %36 : vector<1x1x66x3xbf16> to vector<66x3xbf16>
    %c0_49 = arith.constant 0 : index
    %c6_50 = arith.constant 6 : index
    %c0_51 = arith.constant 0 : index
    %c0_52 = arith.constant 0 : index
    %38 = vector.load %arg2[%c0_49, %c6_50, %c0_51, %c0_52] : memref<1x8x66x3xbf16, #tpu.memory_space<vmem>>, vector<1x1x66x3xbf16>
    %39 = vector.shape_cast %38 : vector<1x1x66x3xbf16> to vector<66x3xbf16>
    %c0_53 = arith.constant 0 : index
    %c7_54 = arith.constant 7 : index
    %c0_55 = arith.constant 0 : index
    %c0_56 = arith.constant 0 : index
    %40 = vector.load %arg2[%c0_53, %c7_54, %c0_55, %c0_56] : memref<1x8x66x3xbf16, #tpu.memory_space<vmem>>, vector<1x1x66x3xbf16>
    %41 = vector.shape_cast %40 : vector<1x1x66x3xbf16> to vector<66x3xbf16>
    %c0_57 = arith.constant 0 : index
    %c0_58 = arith.constant 0 : index
    %c0_59 = arith.constant 0 : index
    %c0_60 = arith.constant 0 : index
    %42 = vector.load %arg3[%c0_57, %c0_58, %c0_59, %c0_60] : memref<1x8x66x3xbf16, #tpu.memory_space<vmem>>, vector<1x1x66x3xbf16>
    %43 = vector.shape_cast %42 : vector<1x1x66x3xbf16> to vector<66x3xbf16>
    %c0_61 = arith.constant 0 : index
    %c1_62 = arith.constant 1 : index
    %c0_63 = arith.constant 0 : index
    %c0_64 = arith.constant 0 : index
    %44 = vector.load %arg3[%c0_61, %c1_62, %c0_63, %c0_64] : memref<1x8x66x3xbf16, #tpu.memory_space<vmem>>, vector<1x1x66x3xbf16>
    %45 = vector.shape_cast %44 : vector<1x1x66x3xbf16> to vector<66x3xbf16>
    %46 = vector.extract_strided_slice %27 {offsets = [0, 0], sizes = [64, 3], strides = [1, 1]} : vector<66x3xbf16> to vector<64x3xbf16>
    %cst_65 = arith.constant dense<0.000000e+00> : vector<64x64xf32>
    %47 = tpu.matmul %46, %9, %cst_65 {dimension_numbers = #tpu.dot_dimension_numbers<[1], [0], [0], [1], [0, 0, 1, 1], [], []>} : vector<64x3xbf16>, vector<3x64xbf16>, vector<64x64xf32> -> vector<64x64xf32>
    %48 = arith.addf %0, %47 : vector<64x64xf32>
    %49 = vector.extract_strided_slice %27 {offsets = [1, 0], sizes = [64, 3], strides = [1, 1]} : vector<66x3xbf16> to vector<64x3xbf16>
    %cst_66 = arith.constant dense<0.000000e+00> : vector<64x64xf32>
    %50 = tpu.matmul %49, %11, %cst_66 {dimension_numbers = #tpu.dot_dimension_numbers<[1], [0], [0], [1], [0, 0, 1, 1], [], []>} : vector<64x3xbf16>, vector<3x64xbf16>, vector<64x64xf32> -> vector<64x64xf32>
    %51 = arith.addf %48, %50 : vector<64x64xf32>
    %52 = vector.extract_strided_slice %27 {offsets = [2, 0], sizes = [64, 3], strides = [1, 1]} : vector<66x3xbf16> to vector<64x3xbf16>
    %cst_67 = arith.constant dense<0.000000e+00> : vector<64x64xf32>
    %53 = tpu.matmul %52, %13, %cst_67 {dimension_numbers = #tpu.dot_dimension_numbers<[1], [0], [0], [1], [0, 0, 1, 1], [], []>} : vector<64x3xbf16>, vector<3x64xbf16>, vector<64x64xf32> -> vector<64x64xf32>
    %54 = arith.addf %51, %53 : vector<64x64xf32>
    %55 = vector.extract_strided_slice %29 {offsets = [0, 0], sizes = [64, 3], strides = [1, 1]} : vector<66x3xbf16> to vector<64x3xbf16>
    %cst_68 = arith.constant dense<0.000000e+00> : vector<64x64xf32>
    %56 = tpu.matmul %55, %15, %cst_68 {dimension_numbers = #tpu.dot_dimension_numbers<[1], [0], [0], [1], [0, 0, 1, 1], [], []>} : vector<64x3xbf16>, vector<3x64xbf16>, vector<64x64xf32> -> vector<64x64xf32>
    %57 = arith.addf %54, %56 : vector<64x64xf32>
    %58 = vector.extract_strided_slice %29 {offsets = [1, 0], sizes = [64, 3], strides = [1, 1]} : vector<66x3xbf16> to vector<64x3xbf16>
    %cst_69 = arith.constant dense<0.000000e+00> : vector<64x64xf32>
    %59 = tpu.matmul %58, %17, %cst_69 {dimension_numbers = #tpu.dot_dimension_numbers<[1], [0], [0], [1], [0, 0, 1, 1], [], []>} : vector<64x3xbf16>, vector<3x64xbf16>, vector<64x64xf32> -> vector<64x64xf32>
    %60 = arith.addf %57, %59 : vector<64x64xf32>
    %61 = vector.extract_strided_slice %29 {offsets = [2, 0], sizes = [64, 3], strides = [1, 1]} : vector<66x3xbf16> to vector<64x3xbf16>
    %cst_70 = arith.constant dense<0.000000e+00> : vector<64x64xf32>
    %62 = tpu.matmul %61, %19, %cst_70 {dimension_numbers = #tpu.dot_dimension_numbers<[1], [0], [0], [1], [0, 0, 1, 1], [], []>} : vector<64x3xbf16>, vector<3x64xbf16>, vector<64x64xf32> -> vector<64x64xf32>
    %63 = arith.addf %60, %62 : vector<64x64xf32>
    %64 = vector.extract_strided_slice %31 {offsets = [0, 0], sizes = [64, 3], strides = [1, 1]} : vector<66x3xbf16> to vector<64x3xbf16>
    %cst_71 = arith.constant dense<0.000000e+00> : vector<64x64xf32>
    %65 = tpu.matmul %64, %21, %cst_71 {dimension_numbers = #tpu.dot_dimension_numbers<[1], [0], [0], [1], [0, 0, 1, 1], [], []>} : vector<64x3xbf16>, vector<3x64xbf16>, vector<64x64xf32> -> vector<64x64xf32>
    %66 = arith.addf %63, %65 : vector<64x64xf32>
    %67 = vector.extract_strided_slice %31 {offsets = [1, 0], sizes = [64, 3], strides = [1, 1]} : vector<66x3xbf16> to vector<64x3xbf16>
    %cst_72 = arith.constant dense<0.000000e+00> : vector<64x64xf32>
    %68 = tpu.matmul %67, %23, %cst_72 {dimension_numbers = #tpu.dot_dimension_numbers<[1], [0], [0], [1], [0, 0, 1, 1], [], []>} : vector<64x3xbf16>, vector<3x64xbf16>, vector<64x64xf32> -> vector<64x64xf32>
    %69 = arith.addf %66, %68 : vector<64x64xf32>
    %70 = vector.extract_strided_slice %31 {offsets = [2, 0], sizes = [64, 3], strides = [1, 1]} : vector<66x3xbf16> to vector<64x3xbf16>
    %cst_73 = arith.constant dense<0.000000e+00> : vector<64x64xf32>
    %71 = tpu.matmul %70, %25, %cst_73 {dimension_numbers = #tpu.dot_dimension_numbers<[1], [0], [0], [1], [0, 0, 1, 1], [], []>} : vector<64x3xbf16>, vector<3x64xbf16>, vector<64x64xf32> -> vector<64x64xf32>
    %72 = arith.addf %69, %71 : vector<64x64xf32>
    %73 = vector.extract_strided_slice %29 {offsets = [0, 0], sizes = [64, 3], strides = [1, 1]} : vector<66x3xbf16> to vector<64x3xbf16>
    %cst_74 = arith.constant dense<0.000000e+00> : vector<64x64xf32>
    %74 = tpu.matmul %73, %9, %cst_74 {dimension_numbers = #tpu.dot_dimension_numbers<[1], [0], [0], [1], [0, 0, 1, 1], [], []>} : vector<64x3xbf16>, vector<3x64xbf16>, vector<64x64xf32> -> vector<64x64xf32>
    %75 = arith.addf %1, %74 : vector<64x64xf32>
    %76 = vector.extract_strided_slice %29 {offsets = [1, 0], sizes = [64, 3], strides = [1, 1]} : vector<66x3xbf16> to vector<64x3xbf16>
    %cst_75 = arith.constant dense<0.000000e+00> : vector<64x64xf32>
    %77 = tpu.matmul %76, %11, %cst_75 {dimension_numbers = #tpu.dot_dimension_numbers<[1], [0], [0], [1], [0, 0, 1, 1], [], []>} : vector<64x3xbf16>, vector<3x64xbf16>, vector<64x64xf32> -> vector<64x64xf32>
    %78 = arith.addf %75, %77 : vector<64x64xf32>
    %79 = vector.extract_strided_slice %29 {offsets = [2, 0], sizes = [64, 3], strides = [1, 1]} : vector<66x3xbf16> to vector<64x3xbf16>
    %cst_76 = arith.constant dense<0.000000e+00> : vector<64x64xf32>
    %80 = tpu.matmul %79, %13, %cst_76 {dimension_numbers = #tpu.dot_dimension_numbers<[1], [0], [0], [1], [0, 0, 1, 1], [], []>} : vector<64x3xbf16>, vector<3x64xbf16>, vector<64x64xf32> -> vector<64x64xf32>
    %81 = arith.addf %78, %80 : vector<64x64xf32>
    %82 = vector.extract_strided_slice %31 {offsets = [0, 0], sizes = [64, 3], strides = [1, 1]} : vector<66x3xbf16> to vector<64x3xbf16>
    %cst_77 = arith.constant dense<0.000000e+00> : vector<64x64xf32>
    %83 = tpu.matmul %82, %15, %cst_77 {dimension_numbers = #tpu.dot_dimension_numbers<[1], [0], [0], [1], [0, 0, 1, 1], [], []>} : vector<64x3xbf16>, vector<3x64xbf16>, vector<64x64xf32> -> vector<64x64xf32>
    %84 = arith.addf %81, %83 : vector<64x64xf32>
    %85 = vector.extract_strided_slice %31 {offsets = [1, 0], sizes = [64, 3], strides = [1, 1]} : vector<66x3xbf16> to vector<64x3xbf16>
    %cst_78 = arith.constant dense<0.000000e+00> : vector<64x64xf32>
    %86 = tpu.matmul %85, %17, %cst_78 {dimension_numbers = #tpu.dot_dimension_numbers<[1], [0], [0], [1], [0, 0, 1, 1], [], []>} : vector<64x3xbf16>, vector<3x64xbf16>, vector<64x64xf32> -> vector<64x64xf32>
    %87 = arith.addf %84, %86 : vector<64x64xf32>
    %88 = vector.extract_strided_slice %31 {offsets = [2, 0], sizes = [64, 3], strides = [1, 1]} : vector<66x3xbf16> to vector<64x3xbf16>
    %cst_79 = arith.constant dense<0.000000e+00> : vector<64x64xf32>
    %89 = tpu.matmul %88, %19, %cst_79 {dimension_numbers = #tpu.dot_dimension_numbers<[1], [0], [0], [1], [0, 0, 1, 1], [], []>} : vector<64x3xbf16>, vector<3x64xbf16>, vector<64x64xf32> -> vector<64x64xf32>
    %90 = arith.addf %87, %89 : vector<64x64xf32>
    %91 = vector.extract_strided_slice %33 {offsets = [0, 0], sizes = [64, 3], strides = [1, 1]} : vector<66x3xbf16> to vector<64x3xbf16>
    %cst_80 = arith.constant dense<0.000000e+00> : vector<64x64xf32>
    %92 = tpu.matmul %91, %21, %cst_80 {dimension_numbers = #tpu.dot_dimension_numbers<[1], [0], [0], [1], [0, 0, 1, 1], [], []>} : vector<64x3xbf16>, vector<3x64xbf16>, vector<64x64xf32> -> vector<64x64xf32>
    %93 = arith.addf %90, %92 : vector<64x64xf32>
    %94 = vector.extract_strided_slice %33 {offsets = [1, 0], sizes = [64, 3], strides = [1, 1]} : vector<66x3xbf16> to vector<64x3xbf16>
    %cst_81 = arith.constant dense<0.000000e+00> : vector<64x64xf32>
    %95 = tpu.matmul %94, %23, %cst_81 {dimension_numbers = #tpu.dot_dimension_numbers<[1], [0], [0], [1], [0, 0, 1, 1], [], []>} : vector<64x3xbf16>, vector<3x64xbf16>, vector<64x64xf32> -> vector<64x64xf32>
    %96 = arith.addf %93, %95 : vector<64x64xf32>
    %97 = vector.extract_strided_slice %33 {offsets = [2, 0], sizes = [64, 3], strides = [1, 1]} : vector<66x3xbf16> to vector<64x3xbf16>
    %cst_82 = arith.constant dense<0.000000e+00> : vector<64x64xf32>
    %98 = tpu.matmul %97, %25, %cst_82 {dimension_numbers = #tpu.dot_dimension_numbers<[1], [0], [0], [1], [0, 0, 1, 1], [], []>} : vector<64x3xbf16>, vector<3x64xbf16>, vector<64x64xf32> -> vector<64x64xf32>
    %99 = arith.addf %96, %98 : vector<64x64xf32>
    %100 = vector.extract_strided_slice %31 {offsets = [0, 0], sizes = [64, 3], strides = [1, 1]} : vector<66x3xbf16> to vector<64x3xbf16>
    %cst_83 = arith.constant dense<0.000000e+00> : vector<64x64xf32>
    %101 = tpu.matmul %100, %9, %cst_83 {dimension_numbers = #tpu.dot_dimension_numbers<[1], [0], [0], [1], [0, 0, 1, 1], [], []>} : vector<64x3xbf16>, vector<3x64xbf16>, vector<64x64xf32> -> vector<64x64xf32>
    %102 = arith.addf %2, %101 : vector<64x64xf32>
    %103 = vector.extract_strided_slice %31 {offsets = [1, 0], sizes = [64, 3], strides = [1, 1]} : vector<66x3xbf16> to vector<64x3xbf16>
    %cst_84 = arith.constant dense<0.000000e+00> : vector<64x64xf32>
    %104 = tpu.matmul %103, %11, %cst_84 {dimension_numbers = #tpu.dot_dimension_numbers<[1], [0], [0], [1], [0, 0, 1, 1], [], []>} : vector<64x3xbf16>, vector<3x64xbf16>, vector<64x64xf32> -> vector<64x64xf32>
    %105 = arith.addf %102, %104 : vector<64x64xf32>
    %106 = vector.extract_strided_slice %31 {offsets = [2, 0], sizes = [64, 3], strides = [1, 1]} : vector<66x3xbf16> to vector<64x3xbf16>
    %cst_85 = arith.constant dense<0.000000e+00> : vector<64x64xf32>
    %107 = tpu.matmul %106, %13, %cst_85 {dimension_numbers = #tpu.dot_dimension_numbers<[1], [0], [0], [1], [0, 0, 1, 1], [], []>} : vector<64x3xbf16>, vector<3x64xbf16>, vector<64x64xf32> -> vector<64x64xf32>
    %108 = arith.addf %105, %107 : vector<64x64xf32>
    %109 = vector.extract_strided_slice %33 {offsets = [0, 0], sizes = [64, 3], strides = [1, 1]} : vector<66x3xbf16> to vector<64x3xbf16>
    %cst_86 = arith.constant dense<0.000000e+00> : vector<64x64xf32>
    %110 = tpu.matmul %109, %15, %cst_86 {dimension_numbers = #tpu.dot_dimension_numbers<[1], [0], [0], [1], [0, 0, 1, 1], [], []>} : vector<64x3xbf16>, vector<3x64xbf16>, vector<64x64xf32> -> vector<64x64xf32>
    %111 = arith.addf %108, %110 : vector<64x64xf32>
    %112 = vector.extract_strided_slice %33 {offsets = [1, 0], sizes = [64, 3], strides = [1, 1]} : vector<66x3xbf16> to vector<64x3xbf16>
    %cst_87 = arith.constant dense<0.000000e+00> : vector<64x64xf32>
    %113 = tpu.matmul %112, %17, %cst_87 {dimension_numbers = #tpu.dot_dimension_numbers<[1], [0], [0], [1], [0, 0, 1, 1], [], []>} : vector<64x3xbf16>, vector<3x64xbf16>, vector<64x64xf32> -> vector<64x64xf32>
    %114 = arith.addf %111, %113 : vector<64x64xf32>
    %115 = vector.extract_strided_slice %33 {offsets = [2, 0], sizes = [64, 3], strides = [1, 1]} : vector<66x3xbf16> to vector<64x3xbf16>
    %cst_88 = arith.constant dense<0.000000e+00> : vector<64x64xf32>
    %116 = tpu.matmul %115, %19, %cst_88 {dimension_numbers = #tpu.dot_dimension_numbers<[1], [0], [0], [1], [0, 0, 1, 1], [], []>} : vector<64x3xbf16>, vector<3x64xbf16>, vector<64x64xf32> -> vector<64x64xf32>
    %117 = arith.addf %114, %116 : vector<64x64xf32>
    %118 = vector.extract_strided_slice %35 {offsets = [0, 0], sizes = [64, 3], strides = [1, 1]} : vector<66x3xbf16> to vector<64x3xbf16>
    %cst_89 = arith.constant dense<0.000000e+00> : vector<64x64xf32>
    %119 = tpu.matmul %118, %21, %cst_89 {dimension_numbers = #tpu.dot_dimension_numbers<[1], [0], [0], [1], [0, 0, 1, 1], [], []>} : vector<64x3xbf16>, vector<3x64xbf16>, vector<64x64xf32> -> vector<64x64xf32>
    %120 = arith.addf %117, %119 : vector<64x64xf32>
    %121 = vector.extract_strided_slice %35 {offsets = [1, 0], sizes = [64, 3], strides = [1, 1]} : vector<66x3xbf16> to vector<64x3xbf16>
    %cst_90 = arith.constant dense<0.000000e+00> : vector<64x64xf32>
    %122 = tpu.matmul %121, %23, %cst_90 {dimension_numbers = #tpu.dot_dimension_numbers<[1], [0], [0], [1], [0, 0, 1, 1], [], []>} : vector<64x3xbf16>, vector<3x64xbf16>, vector<64x64xf32> -> vector<64x64xf32>
    %123 = arith.addf %120, %122 : vector<64x64xf32>
    %124 = vector.extract_strided_slice %35 {offsets = [2, 0], sizes = [64, 3], strides = [1, 1]} : vector<66x3xbf16> to vector<64x3xbf16>
    %cst_91 = arith.constant dense<0.000000e+00> : vector<64x64xf32>
    %125 = tpu.matmul %124, %25, %cst_91 {dimension_numbers = #tpu.dot_dimension_numbers<[1], [0], [0], [1], [0, 0, 1, 1], [], []>} : vector<64x3xbf16>, vector<3x64xbf16>, vector<64x64xf32> -> vector<64x64xf32>
    %126 = arith.addf %123, %125 : vector<64x64xf32>
    %127 = vector.extract_strided_slice %33 {offsets = [0, 0], sizes = [64, 3], strides = [1, 1]} : vector<66x3xbf16> to vector<64x3xbf16>
    %cst_92 = arith.constant dense<0.000000e+00> : vector<64x64xf32>
    %128 = tpu.matmul %127, %9, %cst_92 {dimension_numbers = #tpu.dot_dimension_numbers<[1], [0], [0], [1], [0, 0, 1, 1], [], []>} : vector<64x3xbf16>, vector<3x64xbf16>, vector<64x64xf32> -> vector<64x64xf32>
    %129 = arith.addf %3, %128 : vector<64x64xf32>
    %130 = vector.extract_strided_slice %33 {offsets = [1, 0], sizes = [64, 3], strides = [1, 1]} : vector<66x3xbf16> to vector<64x3xbf16>
    %cst_93 = arith.constant dense<0.000000e+00> : vector<64x64xf32>
    %131 = tpu.matmul %130, %11, %cst_93 {dimension_numbers = #tpu.dot_dimension_numbers<[1], [0], [0], [1], [0, 0, 1, 1], [], []>} : vector<64x3xbf16>, vector<3x64xbf16>, vector<64x64xf32> -> vector<64x64xf32>
    %132 = arith.addf %129, %131 : vector<64x64xf32>
    %133 = vector.extract_strided_slice %33 {offsets = [2, 0], sizes = [64, 3], strides = [1, 1]} : vector<66x3xbf16> to vector<64x3xbf16>
    %cst_94 = arith.constant dense<0.000000e+00> : vector<64x64xf32>
    %134 = tpu.matmul %133, %13, %cst_94 {dimension_numbers = #tpu.dot_dimension_numbers<[1], [0], [0], [1], [0, 0, 1, 1], [], []>} : vector<64x3xbf16>, vector<3x64xbf16>, vector<64x64xf32> -> vector<64x64xf32>
    %135 = arith.addf %132, %134 : vector<64x64xf32>
    %136 = vector.extract_strided_slice %35 {offsets = [0, 0], sizes = [64, 3], strides = [1, 1]} : vector<66x3xbf16> to vector<64x3xbf16>
    %cst_95 = arith.constant dense<0.000000e+00> : vector<64x64xf32>
    %137 = tpu.matmul %136, %15, %cst_95 {dimension_numbers = #tpu.dot_dimension_numbers<[1], [0], [0], [1], [0, 0, 1, 1], [], []>} : vector<64x3xbf16>, vector<3x64xbf16>, vector<64x64xf32> -> vector<64x64xf32>
    %138 = arith.addf %135, %137 : vector<64x64xf32>
    %139 = vector.extract_strided_slice %35 {offsets = [1, 0], sizes = [64, 3], strides = [1, 1]} : vector<66x3xbf16> to vector<64x3xbf16>
    %cst_96 = arith.constant dense<0.000000e+00> : vector<64x64xf32>
    %140 = tpu.matmul %139, %17, %cst_96 {dimension_numbers = #tpu.dot_dimension_numbers<[1], [0], [0], [1], [0, 0, 1, 1], [], []>} : vector<64x3xbf16>, vector<3x64xbf16>, vector<64x64xf32> -> vector<64x64xf32>
    %141 = arith.addf %138, %140 : vector<64x64xf32>
    %142 = vector.extract_strided_slice %35 {offsets = [2, 0], sizes = [64, 3], strides = [1, 1]} : vector<66x3xbf16> to vector<64x3xbf16>
    %cst_97 = arith.constant dense<0.000000e+00> : vector<64x64xf32>
    %143 = tpu.matmul %142, %19, %cst_97 {dimension_numbers = #tpu.dot_dimension_numbers<[1], [0], [0], [1], [0, 0, 1, 1], [], []>} : vector<64x3xbf16>, vector<3x64xbf16>, vector<64x64xf32> -> vector<64x64xf32>
    %144 = arith.addf %141, %143 : vector<64x64xf32>
    %145 = vector.extract_strided_slice %37 {offsets = [0, 0], sizes = [64, 3], strides = [1, 1]} : vector<66x3xbf16> to vector<64x3xbf16>
    %cst_98 = arith.constant dense<0.000000e+00> : vector<64x64xf32>
    %146 = tpu.matmul %145, %21, %cst_98 {dimension_numbers = #tpu.dot_dimension_numbers<[1], [0], [0], [1], [0, 0, 1, 1], [], []>} : vector<64x3xbf16>, vector<3x64xbf16>, vector<64x64xf32> -> vector<64x64xf32>
    %147 = arith.addf %144, %146 : vector<64x64xf32>
    %148 = vector.extract_strided_slice %37 {offsets = [1, 0], sizes = [64, 3], strides = [1, 1]} : vector<66x3xbf16> to vector<64x3xbf16>
    %cst_99 = arith.constant dense<0.000000e+00> : vector<64x64xf32>
    %149 = tpu.matmul %148, %23, %cst_99 {dimension_numbers = #tpu.dot_dimension_numbers<[1], [0], [0], [1], [0, 0, 1, 1], [], []>} : vector<64x3xbf16>, vector<3x64xbf16>, vector<64x64xf32> -> vector<64x64xf32>
    %150 = arith.addf %147, %149 : vector<64x64xf32>
    %151 = vector.extract_strided_slice %37 {offsets = [2, 0], sizes = [64, 3], strides = [1, 1]} : vector<66x3xbf16> to vector<64x3xbf16>
    %cst_100 = arith.constant dense<0.000000e+00> : vector<64x64xf32>
    %152 = tpu.matmul %151, %25, %cst_100 {dimension_numbers = #tpu.dot_dimension_numbers<[1], [0], [0], [1], [0, 0, 1, 1], [], []>} : vector<64x3xbf16>, vector<3x64xbf16>, vector<64x64xf32> -> vector<64x64xf32>
    %153 = arith.addf %150, %152 : vector<64x64xf32>
    %154 = vector.extract_strided_slice %35 {offsets = [0, 0], sizes = [64, 3], strides = [1, 1]} : vector<66x3xbf16> to vector<64x3xbf16>
    %cst_101 = arith.constant dense<0.000000e+00> : vector<64x64xf32>
    %155 = tpu.matmul %154, %9, %cst_101 {dimension_numbers = #tpu.dot_dimension_numbers<[1], [0], [0], [1], [0, 0, 1, 1], [], []>} : vector<64x3xbf16>, vector<3x64xbf16>, vector<64x64xf32> -> vector<64x64xf32>
    %156 = arith.addf %4, %155 : vector<64x64xf32>
    %157 = vector.extract_strided_slice %35 {offsets = [1, 0], sizes = [64, 3], strides = [1, 1]} : vector<66x3xbf16> to vector<64x3xbf16>
    %cst_102 = arith.constant dense<0.000000e+00> : vector<64x64xf32>
    %158 = tpu.matmul %157, %11, %cst_102 {dimension_numbers = #tpu.dot_dimension_numbers<[1], [0], [0], [1], [0, 0, 1, 1], [], []>} : vector<64x3xbf16>, vector<3x64xbf16>, vector<64x64xf32> -> vector<64x64xf32>
    %159 = arith.addf %156, %158 : vector<64x64xf32>
    %160 = vector.extract_strided_slice %35 {offsets = [2, 0], sizes = [64, 3], strides = [1, 1]} : vector<66x3xbf16> to vector<64x3xbf16>
    %cst_103 = arith.constant dense<0.000000e+00> : vector<64x64xf32>
    %161 = tpu.matmul %160, %13, %cst_103 {dimension_numbers = #tpu.dot_dimension_numbers<[1], [0], [0], [1], [0, 0, 1, 1], [], []>} : vector<64x3xbf16>, vector<3x64xbf16>, vector<64x64xf32> -> vector<64x64xf32>
    %162 = arith.addf %159, %161 : vector<64x64xf32>
    %163 = vector.extract_strided_slice %37 {offsets = [0, 0], sizes = [64, 3], strides = [1, 1]} : vector<66x3xbf16> to vector<64x3xbf16>
    %cst_104 = arith.constant dense<0.000000e+00> : vector<64x64xf32>
    %164 = tpu.matmul %163, %15, %cst_104 {dimension_numbers = #tpu.dot_dimension_numbers<[1], [0], [0], [1], [0, 0, 1, 1], [], []>} : vector<64x3xbf16>, vector<3x64xbf16>, vector<64x64xf32> -> vector<64x64xf32>
    %165 = arith.addf %162, %164 : vector<64x64xf32>
    %166 = vector.extract_strided_slice %37 {offsets = [1, 0], sizes = [64, 3], strides = [1, 1]} : vector<66x3xbf16> to vector<64x3xbf16>
    %cst_105 = arith.constant dense<0.000000e+00> : vector<64x64xf32>
    %167 = tpu.matmul %166, %17, %cst_105 {dimension_numbers = #tpu.dot_dimension_numbers<[1], [0], [0], [1], [0, 0, 1, 1], [], []>} : vector<64x3xbf16>, vector<3x64xbf16>, vector<64x64xf32> -> vector<64x64xf32>
    %168 = arith.addf %165, %167 : vector<64x64xf32>
    %169 = vector.extract_strided_slice %37 {offsets = [2, 0], sizes = [64, 3], strides = [1, 1]} : vector<66x3xbf16> to vector<64x3xbf16>
    %cst_106 = arith.constant dense<0.000000e+00> : vector<64x64xf32>
    %170 = tpu.matmul %169, %19, %cst_106 {dimension_numbers = #tpu.dot_dimension_numbers<[1], [0], [0], [1], [0, 0, 1, 1], [], []>} : vector<64x3xbf16>, vector<3x64xbf16>, vector<64x64xf32> -> vector<64x64xf32>
    %171 = arith.addf %168, %170 : vector<64x64xf32>
    %172 = vector.extract_strided_slice %39 {offsets = [0, 0], sizes = [64, 3], strides = [1, 1]} : vector<66x3xbf16> to vector<64x3xbf16>
    %cst_107 = arith.constant dense<0.000000e+00> : vector<64x64xf32>
    %173 = tpu.matmul %172, %21, %cst_107 {dimension_numbers = #tpu.dot_dimension_numbers<[1], [0], [0], [1], [0, 0, 1, 1], [], []>} : vector<64x3xbf16>, vector<3x64xbf16>, vector<64x64xf32> -> vector<64x64xf32>
    %174 = arith.addf %171, %173 : vector<64x64xf32>
    %175 = vector.extract_strided_slice %39 {offsets = [1, 0], sizes = [64, 3], strides = [1, 1]} : vector<66x3xbf16> to vector<64x3xbf16>
    %cst_108 = arith.constant dense<0.000000e+00> : vector<64x64xf32>
    %176 = tpu.matmul %175, %23, %cst_108 {dimension_numbers = #tpu.dot_dimension_numbers<[1], [0], [0], [1], [0, 0, 1, 1], [], []>} : vector<64x3xbf16>, vector<3x64xbf16>, vector<64x64xf32> -> vector<64x64xf32>
    %177 = arith.addf %174, %176 : vector<64x64xf32>
    %178 = vector.extract_strided_slice %39 {offsets = [2, 0], sizes = [64, 3], strides = [1, 1]} : vector<66x3xbf16> to vector<64x3xbf16>
    %cst_109 = arith.constant dense<0.000000e+00> : vector<64x64xf32>
    %179 = tpu.matmul %178, %25, %cst_109 {dimension_numbers = #tpu.dot_dimension_numbers<[1], [0], [0], [1], [0, 0, 1, 1], [], []>} : vector<64x3xbf16>, vector<3x64xbf16>, vector<64x64xf32> -> vector<64x64xf32>
    %180 = arith.addf %177, %179 : vector<64x64xf32>
    %181 = vector.extract_strided_slice %37 {offsets = [0, 0], sizes = [64, 3], strides = [1, 1]} : vector<66x3xbf16> to vector<64x3xbf16>
    %cst_110 = arith.constant dense<0.000000e+00> : vector<64x64xf32>
    %182 = tpu.matmul %181, %9, %cst_110 {dimension_numbers = #tpu.dot_dimension_numbers<[1], [0], [0], [1], [0, 0, 1, 1], [], []>} : vector<64x3xbf16>, vector<3x64xbf16>, vector<64x64xf32> -> vector<64x64xf32>
    %183 = arith.addf %5, %182 : vector<64x64xf32>
    %184 = vector.extract_strided_slice %37 {offsets = [1, 0], sizes = [64, 3], strides = [1, 1]} : vector<66x3xbf16> to vector<64x3xbf16>
    %cst_111 = arith.constant dense<0.000000e+00> : vector<64x64xf32>
    %185 = tpu.matmul %184, %11, %cst_111 {dimension_numbers = #tpu.dot_dimension_numbers<[1], [0], [0], [1], [0, 0, 1, 1], [], []>} : vector<64x3xbf16>, vector<3x64xbf16>, vector<64x64xf32> -> vector<64x64xf32>
    %186 = arith.addf %183, %185 : vector<64x64xf32>
    %187 = vector.extract_strided_slice %37 {offsets = [2, 0], sizes = [64, 3], strides = [1, 1]} : vector<66x3xbf16> to vector<64x3xbf16>
    %cst_112 = arith.constant dense<0.000000e+00> : vector<64x64xf32>
    %188 = tpu.matmul %187, %13, %cst_112 {dimension_numbers = #tpu.dot_dimension_numbers<[1], [0], [0], [1], [0, 0, 1, 1], [], []>} : vector<64x3xbf16>, vector<3x64xbf16>, vector<64x64xf32> -> vector<64x64xf32>
    %189 = arith.addf %186, %188 : vector<64x64xf32>
    %190 = vector.extract_strided_slice %39 {offsets = [0, 0], sizes = [64, 3], strides = [1, 1]} : vector<66x3xbf16> to vector<64x3xbf16>
    %cst_113 = arith.constant dense<0.000000e+00> : vector<64x64xf32>
    %191 = tpu.matmul %190, %15, %cst_113 {dimension_numbers = #tpu.dot_dimension_numbers<[1], [0], [0], [1], [0, 0, 1, 1], [], []>} : vector<64x3xbf16>, vector<3x64xbf16>, vector<64x64xf32> -> vector<64x64xf32>
    %192 = arith.addf %189, %191 : vector<64x64xf32>
    %193 = vector.extract_strided_slice %39 {offsets = [1, 0], sizes = [64, 3], strides = [1, 1]} : vector<66x3xbf16> to vector<64x3xbf16>
    %cst_114 = arith.constant dense<0.000000e+00> : vector<64x64xf32>
    %194 = tpu.matmul %193, %17, %cst_114 {dimension_numbers = #tpu.dot_dimension_numbers<[1], [0], [0], [1], [0, 0, 1, 1], [], []>} : vector<64x3xbf16>, vector<3x64xbf16>, vector<64x64xf32> -> vector<64x64xf32>
    %195 = arith.addf %192, %194 : vector<64x64xf32>
    %196 = vector.extract_strided_slice %39 {offsets = [2, 0], sizes = [64, 3], strides = [1, 1]} : vector<66x3xbf16> to vector<64x3xbf16>
    %cst_115 = arith.constant dense<0.000000e+00> : vector<64x64xf32>
    %197 = tpu.matmul %196, %19, %cst_115 {dimension_numbers = #tpu.dot_dimension_numbers<[1], [0], [0], [1], [0, 0, 1, 1], [], []>} : vector<64x3xbf16>, vector<3x64xbf16>, vector<64x64xf32> -> vector<64x64xf32>
    %198 = arith.addf %195, %197 : vector<64x64xf32>
    %199 = vector.extract_strided_slice %41 {offsets = [0, 0], sizes = [64, 3], strides = [1, 1]} : vector<66x3xbf16> to vector<64x3xbf16>
    %cst_116 = arith.constant dense<0.000000e+00> : vector<64x64xf32>
    %200 = tpu.matmul %199, %21, %cst_116 {dimension_numbers = #tpu.dot_dimension_numbers<[1], [0], [0], [1], [0, 0, 1, 1], [], []>} : vector<64x3xbf16>, vector<3x64xbf16>, vector<64x64xf32> -> vector<64x64xf32>
    %201 = arith.addf %198, %200 : vector<64x64xf32>
    %202 = vector.extract_strided_slice %41 {offsets = [1, 0], sizes = [64, 3], strides = [1, 1]} : vector<66x3xbf16> to vector<64x3xbf16>
    %cst_117 = arith.constant dense<0.000000e+00> : vector<64x64xf32>
    %203 = tpu.matmul %202, %23, %cst_117 {dimension_numbers = #tpu.dot_dimension_numbers<[1], [0], [0], [1], [0, 0, 1, 1], [], []>} : vector<64x3xbf16>, vector<3x64xbf16>, vector<64x64xf32> -> vector<64x64xf32>
    %204 = arith.addf %201, %203 : vector<64x64xf32>
    %205 = vector.extract_strided_slice %41 {offsets = [2, 0], sizes = [64, 3], strides = [1, 1]} : vector<66x3xbf16> to vector<64x3xbf16>
    %cst_118 = arith.constant dense<0.000000e+00> : vector<64x64xf32>
    %206 = tpu.matmul %205, %25, %cst_118 {dimension_numbers = #tpu.dot_dimension_numbers<[1], [0], [0], [1], [0, 0, 1, 1], [], []>} : vector<64x3xbf16>, vector<3x64xbf16>, vector<64x64xf32> -> vector<64x64xf32>
    %207 = arith.addf %204, %206 : vector<64x64xf32>
    %208 = vector.extract_strided_slice %39 {offsets = [0, 0], sizes = [64, 3], strides = [1, 1]} : vector<66x3xbf16> to vector<64x3xbf16>
    %cst_119 = arith.constant dense<0.000000e+00> : vector<64x64xf32>
    %209 = tpu.matmul %208, %9, %cst_119 {dimension_numbers = #tpu.dot_dimension_numbers<[1], [0], [0], [1], [0, 0, 1, 1], [], []>} : vector<64x3xbf16>, vector<3x64xbf16>, vector<64x64xf32> -> vector<64x64xf32>
    %210 = arith.addf %6, %209 : vector<64x64xf32>
    %211 = vector.extract_strided_slice %39 {offsets = [1, 0], sizes = [64, 3], strides = [1, 1]} : vector<66x3xbf16> to vector<64x3xbf16>
    %cst_120 = arith.constant dense<0.000000e+00> : vector<64x64xf32>
    %212 = tpu.matmul %211, %11, %cst_120 {dimension_numbers = #tpu.dot_dimension_numbers<[1], [0], [0], [1], [0, 0, 1, 1], [], []>} : vector<64x3xbf16>, vector<3x64xbf16>, vector<64x64xf32> -> vector<64x64xf32>
    %213 = arith.addf %210, %212 : vector<64x64xf32>
    %214 = vector.extract_strided_slice %39 {offsets = [2, 0], sizes = [64, 3], strides = [1, 1]} : vector<66x3xbf16> to vector<64x3xbf16>
    %cst_121 = arith.constant dense<0.000000e+00> : vector<64x64xf32>
    %215 = tpu.matmul %214, %13, %cst_121 {dimension_numbers = #tpu.dot_dimension_numbers<[1], [0], [0], [1], [0, 0, 1, 1], [], []>} : vector<64x3xbf16>, vector<3x64xbf16>, vector<64x64xf32> -> vector<64x64xf32>
    %216 = arith.addf %213, %215 : vector<64x64xf32>
    %217 = vector.extract_strided_slice %41 {offsets = [0, 0], sizes = [64, 3], strides = [1, 1]} : vector<66x3xbf16> to vector<64x3xbf16>
    %cst_122 = arith.constant dense<0.000000e+00> : vector<64x64xf32>
    %218 = tpu.matmul %217, %15, %cst_122 {dimension_numbers = #tpu.dot_dimension_numbers<[1], [0], [0], [1], [0, 0, 1, 1], [], []>} : vector<64x3xbf16>, vector<3x64xbf16>, vector<64x64xf32> -> vector<64x64xf32>
    %219 = arith.addf %216, %218 : vector<64x64xf32>
    %220 = vector.extract_strided_slice %41 {offsets = [1, 0], sizes = [64, 3], strides = [1, 1]} : vector<66x3xbf16> to vector<64x3xbf16>
    %cst_123 = arith.constant dense<0.000000e+00> : vector<64x64xf32>
    %221 = tpu.matmul %220, %17, %cst_123 {dimension_numbers = #tpu.dot_dimension_numbers<[1], [0], [0], [1], [0, 0, 1, 1], [], []>} : vector<64x3xbf16>, vector<3x64xbf16>, vector<64x64xf32> -> vector<64x64xf32>
    %222 = arith.addf %219, %221 : vector<64x64xf32>
    %223 = vector.extract_strided_slice %41 {offsets = [2, 0], sizes = [64, 3], strides = [1, 1]} : vector<66x3xbf16> to vector<64x3xbf16>
    %cst_124 = arith.constant dense<0.000000e+00> : vector<64x64xf32>
    %224 = tpu.matmul %223, %19, %cst_124 {dimension_numbers = #tpu.dot_dimension_numbers<[1], [0], [0], [1], [0, 0, 1, 1], [], []>} : vector<64x3xbf16>, vector<3x64xbf16>, vector<64x64xf32> -> vector<64x64xf32>
    %225 = arith.addf %222, %224 : vector<64x64xf32>
    %226 = vector.extract_strided_slice %43 {offsets = [0, 0], sizes = [64, 3], strides = [1, 1]} : vector<66x3xbf16> to vector<64x3xbf16>
    %cst_125 = arith.constant dense<0.000000e+00> : vector<64x64xf32>
    %227 = tpu.matmul %226, %21, %cst_125 {dimension_numbers = #tpu.dot_dimension_numbers<[1], [0], [0], [1], [0, 0, 1, 1], [], []>} : vector<64x3xbf16>, vector<3x64xbf16>, vector<64x64xf32> -> vector<64x64xf32>
    %228 = arith.addf %225, %227 : vector<64x64xf32>
    %229 = vector.extract_strided_slice %43 {offsets = [1, 0], sizes = [64, 3], strides = [1, 1]} : vector<66x3xbf16> to vector<64x3xbf16>
    %cst_126 = arith.constant dense<0.000000e+00> : vector<64x64xf32>
    %230 = tpu.matmul %229, %23, %cst_126 {dimension_numbers = #tpu.dot_dimension_numbers<[1], [0], [0], [1], [0, 0, 1, 1], [], []>} : vector<64x3xbf16>, vector<3x64xbf16>, vector<64x64xf32> -> vector<64x64xf32>
    %231 = arith.addf %228, %230 : vector<64x64xf32>
    %232 = vector.extract_strided_slice %43 {offsets = [2, 0], sizes = [64, 3], strides = [1, 1]} : vector<66x3xbf16> to vector<64x3xbf16>
    %cst_127 = arith.constant dense<0.000000e+00> : vector<64x64xf32>
    %233 = tpu.matmul %232, %25, %cst_127 {dimension_numbers = #tpu.dot_dimension_numbers<[1], [0], [0], [1], [0, 0, 1, 1], [], []>} : vector<64x3xbf16>, vector<3x64xbf16>, vector<64x64xf32> -> vector<64x64xf32>
    %234 = arith.addf %231, %233 : vector<64x64xf32>
    %235 = vector.extract_strided_slice %41 {offsets = [0, 0], sizes = [64, 3], strides = [1, 1]} : vector<66x3xbf16> to vector<64x3xbf16>
    %cst_128 = arith.constant dense<0.000000e+00> : vector<64x64xf32>
    %236 = tpu.matmul %235, %9, %cst_128 {dimension_numbers = #tpu.dot_dimension_numbers<[1], [0], [0], [1], [0, 0, 1, 1], [], []>} : vector<64x3xbf16>, vector<3x64xbf16>, vector<64x64xf32> -> vector<64x64xf32>
    %237 = arith.addf %7, %236 : vector<64x64xf32>
    %238 = vector.extract_strided_slice %41 {offsets = [1, 0], sizes = [64, 3], strides = [1, 1]} : vector<66x3xbf16> to vector<64x3xbf16>
    %cst_129 = arith.constant dense<0.000000e+00> : vector<64x64xf32>
    %239 = tpu.matmul %238, %11, %cst_129 {dimension_numbers = #tpu.dot_dimension_numbers<[1], [0], [0], [1], [0, 0, 1, 1], [], []>} : vector<64x3xbf16>, vector<3x64xbf16>, vector<64x64xf32> -> vector<64x64xf32>
    %240 = arith.addf %237, %239 : vector<64x64xf32>
    %241 = vector.extract_strided_slice %41 {offsets = [2, 0], sizes = [64, 3], strides = [1, 1]} : vector<66x3xbf16> to vector<64x3xbf16>
    %cst_130 = arith.constant dense<0.000000e+00> : vector<64x64xf32>
    %242 = tpu.matmul %241, %13, %cst_130 {dimension_numbers = #tpu.dot_dimension_numbers<[1], [0], [0], [1], [0, 0, 1, 1], [], []>} : vector<64x3xbf16>, vector<3x64xbf16>, vector<64x64xf32> -> vector<64x64xf32>
    %243 = arith.addf %240, %242 : vector<64x64xf32>
    %244 = vector.extract_strided_slice %43 {offsets = [0, 0], sizes = [64, 3], strides = [1, 1]} : vector<66x3xbf16> to vector<64x3xbf16>
    %cst_131 = arith.constant dense<0.000000e+00> : vector<64x64xf32>
    %245 = tpu.matmul %244, %15, %cst_131 {dimension_numbers = #tpu.dot_dimension_numbers<[1], [0], [0], [1], [0, 0, 1, 1], [], []>} : vector<64x3xbf16>, vector<3x64xbf16>, vector<64x64xf32> -> vector<64x64xf32>
    %246 = arith.addf %243, %245 : vector<64x64xf32>
    %247 = vector.extract_strided_slice %43 {offsets = [1, 0], sizes = [64, 3], strides = [1, 1]} : vector<66x3xbf16> to vector<64x3xbf16>
    %cst_132 = arith.constant dense<0.000000e+00> : vector<64x64xf32>
    %248 = tpu.matmul %247, %17, %cst_132 {dimension_numbers = #tpu.dot_dimension_numbers<[1], [0], [0], [1], [0, 0, 1, 1], [], []>} : vector<64x3xbf16>, vector<3x64xbf16>, vector<64x64xf32> -> vector<64x64xf32>
    %249 = arith.addf %246, %248 : vector<64x64xf32>
    %250 = vector.extract_strided_slice %43 {offsets = [2, 0], sizes = [64, 3], strides = [1, 1]} : vector<66x3xbf16> to vector<64x3xbf16>
    %cst_133 = arith.constant dense<0.000000e+00> : vector<64x64xf32>
    %251 = tpu.matmul %250, %19, %cst_133 {dimension_numbers = #tpu.dot_dimension_numbers<[1], [0], [0], [1], [0, 0, 1, 1], [], []>} : vector<64x3xbf16>, vector<3x64xbf16>, vector<64x64xf32> -> vector<64x64xf32>
    %252 = arith.addf %249, %251 : vector<64x64xf32>
    %253 = vector.extract_strided_slice %45 {offsets = [0, 0], sizes = [64, 3], strides = [1, 1]} : vector<66x3xbf16> to vector<64x3xbf16>
    %cst_134 = arith.constant dense<0.000000e+00> : vector<64x64xf32>
    %254 = tpu.matmul %253, %21, %cst_134 {dimension_numbers = #tpu.dot_dimension_numbers<[1], [0], [0], [1], [0, 0, 1, 1], [], []>} : vector<64x3xbf16>, vector<3x64xbf16>, vector<64x64xf32> -> vector<64x64xf32>
    %255 = arith.addf %252, %254 : vector<64x64xf32>
    %256 = vector.extract_strided_slice %45 {offsets = [1, 0], sizes = [64, 3], strides = [1, 1]} : vector<66x3xbf16> to vector<64x3xbf16>
    %cst_135 = arith.constant dense<0.000000e+00> : vector<64x64xf32>
    %257 = tpu.matmul %256, %23, %cst_135 {dimension_numbers = #tpu.dot_dimension_numbers<[1], [0], [0], [1], [0, 0, 1, 1], [], []>} : vector<64x3xbf16>, vector<3x64xbf16>, vector<64x64xf32> -> vector<64x64xf32>
    %258 = arith.addf %255, %257 : vector<64x64xf32>
    %259 = vector.extract_strided_slice %45 {offsets = [2, 0], sizes = [64, 3], strides = [1, 1]} : vector<66x3xbf16> to vector<64x3xbf16>
    %cst_136 = arith.constant dense<0.000000e+00> : vector<64x64xf32>
    %260 = tpu.matmul %259, %25, %cst_136 {dimension_numbers = #tpu.dot_dimension_numbers<[1], [0], [0], [1], [0, 0, 1, 1], [], []>} : vector<64x3xbf16>, vector<3x64xbf16>, vector<64x64xf32> -> vector<64x64xf32>
    %261 = arith.addf %258, %260 : vector<64x64xf32>
    %c0_137 = arith.constant 0 : index
    %c0_138 = arith.constant 0 : index
    %262 = vector.load %arg5[%c0_137, %c0_138] : memref<1x64xf32, #tpu.memory_space<vmem>>, vector<1x64xf32>
    %263 = vector.broadcast %262 : vector<1x64xf32> to vector<64x64xf32>
    %264 = arith.addf %72, %263 : vector<64x64xf32>
    %cst_139 = arith.constant 0.000000e+00 : f32
    %265 = vector.broadcast %cst_139 : f32 to vector<64x64xf32>
    %266 = arith.maximumf %264, %265 : vector<64x64xf32>
    %267 = arith.truncf %266 : vector<64x64xf32> to vector<64x64xbf16>
    %c0_140 = arith.constant 0 : index
    %c0_141 = arith.constant 0 : index
    %c0_142 = arith.constant 0 : index
    %c0_143 = arith.constant 0 : index
    %268 = vector.load %arg6[%c0_140, %c0_141, %c0_142, %c0_143] : memref<1x8x64x64xbf16, #tpu.memory_space<vmem>>, vector<1x1x64x64xbf16>
    %269 = vector.shape_cast %268 : vector<1x1x64x64xbf16> to vector<64x64xbf16>
    %270 = vector.shape_cast %267 : vector<64x64xbf16> to vector<1x1x64x64xbf16>
    tpu.vector_store %arg6[%c0_140, %c0_141, %c0_142, %c0_143], %270 {strides = array<i32>} : memref<1x8x64x64xbf16, #tpu.memory_space<vmem>>, vector<1x1x64x64xbf16>,
    %271 = vector.broadcast %262 : vector<1x64xf32> to vector<64x64xf32>
    %272 = arith.addf %99, %271 : vector<64x64xf32>
    %cst_144 = arith.constant 0.000000e+00 : f32
    %273 = vector.broadcast %cst_144 : f32 to vector<64x64xf32>
    %274 = arith.maximumf %272, %273 : vector<64x64xf32>
    %275 = arith.truncf %274 : vector<64x64xf32> to vector<64x64xbf16>
    %c0_145 = arith.constant 0 : index
    %c1_146 = arith.constant 1 : index
    %c0_147 = arith.constant 0 : index
    %c0_148 = arith.constant 0 : index
    %276 = vector.load %arg6[%c0_145, %c1_146, %c0_147, %c0_148] : memref<1x8x64x64xbf16, #tpu.memory_space<vmem>>, vector<1x1x64x64xbf16>
    %277 = vector.shape_cast %276 : vector<1x1x64x64xbf16> to vector<64x64xbf16>
    %278 = vector.shape_cast %275 : vector<64x64xbf16> to vector<1x1x64x64xbf16>
    tpu.vector_store %arg6[%c0_145, %c1_146, %c0_147, %c0_148], %278 {strides = array<i32>} : memref<1x8x64x64xbf16, #tpu.memory_space<vmem>>, vector<1x1x64x64xbf16>,
    %279 = vector.broadcast %262 : vector<1x64xf32> to vector<64x64xf32>
    %280 = arith.addf %126, %279 : vector<64x64xf32>
    %cst_149 = arith.constant 0.000000e+00 : f32
    %281 = vector.broadcast %cst_149 : f32 to vector<64x64xf32>
    %282 = arith.maximumf %280, %281 : vector<64x64xf32>
    %283 = arith.truncf %282 : vector<64x64xf32> to vector<64x64xbf16>
    %c0_150 = arith.constant 0 : index
    %c2_151 = arith.constant 2 : index
    %c0_152 = arith.constant 0 : index
    %c0_153 = arith.constant 0 : index
    %284 = vector.load %arg6[%c0_150, %c2_151, %c0_152, %c0_153] : memref<1x8x64x64xbf16, #tpu.memory_space<vmem>>, vector<1x1x64x64xbf16>
    %285 = vector.shape_cast %284 : vector<1x1x64x64xbf16> to vector<64x64xbf16>
    %286 = vector.shape_cast %283 : vector<64x64xbf16> to vector<1x1x64x64xbf16>
    tpu.vector_store %arg6[%c0_150, %c2_151, %c0_152, %c0_153], %286 {strides = array<i32>} : memref<1x8x64x64xbf16, #tpu.memory_space<vmem>>, vector<1x1x64x64xbf16>,
    %287 = vector.broadcast %262 : vector<1x64xf32> to vector<64x64xf32>
    %288 = arith.addf %153, %287 : vector<64x64xf32>
    %cst_154 = arith.constant 0.000000e+00 : f32
    %289 = vector.broadcast %cst_154 : f32 to vector<64x64xf32>
    %290 = arith.maximumf %288, %289 : vector<64x64xf32>
    %291 = arith.truncf %290 : vector<64x64xf32> to vector<64x64xbf16>
    %c0_155 = arith.constant 0 : index
    %c3_156 = arith.constant 3 : index
    %c0_157 = arith.constant 0 : index
    %c0_158 = arith.constant 0 : index
    %292 = vector.load %arg6[%c0_155, %c3_156, %c0_157, %c0_158] : memref<1x8x64x64xbf16, #tpu.memory_space<vmem>>, vector<1x1x64x64xbf16>
    %293 = vector.shape_cast %292 : vector<1x1x64x64xbf16> to vector<64x64xbf16>
    %294 = vector.shape_cast %291 : vector<64x64xbf16> to vector<1x1x64x64xbf16>
    tpu.vector_store %arg6[%c0_155, %c3_156, %c0_157, %c0_158], %294 {strides = array<i32>} : memref<1x8x64x64xbf16, #tpu.memory_space<vmem>>, vector<1x1x64x64xbf16>,
    %295 = vector.broadcast %262 : vector<1x64xf32> to vector<64x64xf32>
    %296 = arith.addf %180, %295 : vector<64x64xf32>
    %cst_159 = arith.constant 0.000000e+00 : f32
    %297 = vector.broadcast %cst_159 : f32 to vector<64x64xf32>
    %298 = arith.maximumf %296, %297 : vector<64x64xf32>
    %299 = arith.truncf %298 : vector<64x64xf32> to vector<64x64xbf16>
    %c0_160 = arith.constant 0 : index
    %c4_161 = arith.constant 4 : index
    %c0_162 = arith.constant 0 : index
    %c0_163 = arith.constant 0 : index
    %300 = vector.load %arg6[%c0_160, %c4_161, %c0_162, %c0_163] : memref<1x8x64x64xbf16, #tpu.memory_space<vmem>>, vector<1x1x64x64xbf16>
    %301 = vector.shape_cast %300 : vector<1x1x64x64xbf16> to vector<64x64xbf16>
    %302 = vector.shape_cast %299 : vector<64x64xbf16> to vector<1x1x64x64xbf16>
    tpu.vector_store %arg6[%c0_160, %c4_161, %c0_162, %c0_163], %302 {strides = array<i32>} : memref<1x8x64x64xbf16, #tpu.memory_space<vmem>>, vector<1x1x64x64xbf16>,
    %303 = vector.broadcast %262 : vector<1x64xf32> to vector<64x64xf32>
    %304 = arith.addf %207, %303 : vector<64x64xf32>
    %cst_164 = arith.constant 0.000000e+00 : f32
    %305 = vector.broadcast %cst_164 : f32 to vector<64x64xf32>
    %306 = arith.maximumf %304, %305 : vector<64x64xf32>
    %307 = arith.truncf %306 : vector<64x64xf32> to vector<64x64xbf16>
    %c0_165 = arith.constant 0 : index
    %c5_166 = arith.constant 5 : index
    %c0_167 = arith.constant 0 : index
    %c0_168 = arith.constant 0 : index
    %308 = vector.load %arg6[%c0_165, %c5_166, %c0_167, %c0_168] : memref<1x8x64x64xbf16, #tpu.memory_space<vmem>>, vector<1x1x64x64xbf16>
    %309 = vector.shape_cast %308 : vector<1x1x64x64xbf16> to vector<64x64xbf16>
    %310 = vector.shape_cast %307 : vector<64x64xbf16> to vector<1x1x64x64xbf16>
    tpu.vector_store %arg6[%c0_165, %c5_166, %c0_167, %c0_168], %310 {strides = array<i32>} : memref<1x8x64x64xbf16, #tpu.memory_space<vmem>>, vector<1x1x64x64xbf16>,
    %311 = vector.broadcast %262 : vector<1x64xf32> to vector<64x64xf32>
    %312 = arith.addf %234, %311 : vector<64x64xf32>
    %cst_169 = arith.constant 0.000000e+00 : f32
    %313 = vector.broadcast %cst_169 : f32 to vector<64x64xf32>
    %314 = arith.maximumf %312, %313 : vector<64x64xf32>
    %315 = arith.truncf %314 : vector<64x64xf32> to vector<64x64xbf16>
    %c0_170 = arith.constant 0 : index
    %c6_171 = arith.constant 6 : index
    %c0_172 = arith.constant 0 : index
    %c0_173 = arith.constant 0 : index
    %316 = vector.load %arg6[%c0_170, %c6_171, %c0_172, %c0_173] : memref<1x8x64x64xbf16, #tpu.memory_space<vmem>>, vector<1x1x64x64xbf16>
    %317 = vector.shape_cast %316 : vector<1x1x64x64xbf16> to vector<64x64xbf16>
    %318 = vector.shape_cast %315 : vector<64x64xbf16> to vector<1x1x64x64xbf16>
    tpu.vector_store %arg6[%c0_170, %c6_171, %c0_172, %c0_173], %318 {strides = array<i32>} : memref<1x8x64x64xbf16, #tpu.memory_space<vmem>>, vector<1x1x64x64xbf16>,
    %319 = vector.broadcast %262 : vector<1x64xf32> to vector<64x64xf32>
    %320 = arith.addf %261, %319 : vector<64x64xf32>
    %cst_174 = arith.constant 0.000000e+00 : f32
    %321 = vector.broadcast %cst_174 : f32 to vector<64x64xf32>
    %322 = arith.maximumf %320, %321 : vector<64x64xf32>
    %323 = arith.truncf %322 : vector<64x64xf32> to vector<64x64xbf16>
    %c0_175 = arith.constant 0 : index
    %c7_176 = arith.constant 7 : index
    %c0_177 = arith.constant 0 : index
    %c0_178 = arith.constant 0 : index
    %324 = vector.load %arg6[%c0_175, %c7_176, %c0_177, %c0_178] : memref<1x8x64x64xbf16, #tpu.memory_space<vmem>>, vector<1x1x64x64xbf16>
    %325 = vector.shape_cast %324 : vector<1x1x64x64xbf16> to vector<64x64xbf16>
    %326 = vector.shape_cast %323 : vector<64x64xbf16> to vector<1x1x64x64xbf16>
    tpu.vector_store %arg6[%c0_175, %c7_176, %c0_177, %c0_178], %326 {strides = array<i32>} : memref<1x8x64x64xbf16, #tpu.memory_space<vmem>>, vector<1x1x64x64xbf16>,
    return
  }
  func.func @transform_0(%arg0: i32, %arg1: i32) -> (i32, i32, i32, i32) {
    %c0_i32 = arith.constant 0 : i32
    %c0_i32_0 = arith.constant 0 : i32
    %c0_i32_1 = arith.constant 0 : i32
    return %arg0, %arg1, %c0_i32, %c0_i32_0 : i32, i32, i32, i32
  }
  func.func @transform_1(%arg0: i32, %arg1: i32) -> (i32, i32, i32, i32) {
    %c1_i32 = arith.constant 1 : i32
    %0 = arith.addi %arg1, %c1_i32 : i32
    %c0_i32 = arith.constant 0 : i32
    %c0_i32_0 = arith.constant 0 : i32
    %c0_i32_1 = arith.constant 0 : i32
    return %arg0, %0, %c0_i32, %c0_i32_0 : i32, i32, i32, i32
  }
  func.func @transform_2(%arg0: i32, %arg1: i32) -> (i32, i32, i32) {
    %c0_i32 = arith.constant 0 : i32
    %c0_i32_0 = arith.constant 0 : i32
    %c0_i32_1 = arith.constant 0 : i32
    %c0_i32_2 = arith.constant 0 : i32
    return %c0_i32, %c0_i32_0, %c0_i32_1 : i32, i32, i32
  }
  func.func @transform_3(%arg0: i32, %arg1: i32) -> (i32, i32) {
    %c0_i32 = arith.constant 0 : i32
    %c0_i32_0 = arith.constant 0 : i32
    %c0_i32_1 = arith.constant 0 : i32
    return %c0_i32, %c0_i32_0 : i32, i32
  }
  func.func @transform_4(%arg0: i32, %arg1: i32) -> (i32, i32, i32, i32) {
    %c0_i32 = arith.constant 0 : i32
    %c0_i32_0 = arith.constant 0 : i32
    %c0_i32_1 = arith.constant 0 : i32
    return %arg0, %arg1, %c0_i32, %c0_i32_0 : i32, i32, i32, i32
  }
}

</mosaic_0001>

<bundles_post_ra>
// kernel: tpu_custom_call.1
= control target key start
LH: loop header
LB: loop body
LE: loop exit
PB: predicated region body
PF: predicated region fallthrough
CT: control target
= control target key end

     0   :  { %9 = vsyncpa [#allocation3], 0  ;;  %s11123_s0 = inlined_call_operand.vmem [shape: bf16[1,72,66,3], index: 0, kind: input, shape index: {}]   ;;  %s11124_s1 = inlined_call_operand.vmem [shape: bf16[1,72,66,3], index: 1, kind: input, shape index: {}]   ;;  %s11125_s2 = inlined_call_operand.vmem [shape: bf16[9,3,64], index: 2, kind: input, shape index: {}]   ;;  %s11126_s3 = inlined_call_operand.vmem [shape: f32[1,64], index: 3, kind: input, shape index: {}]   ;;  %s11127_s4 = inlined_call_operand.hbm [shape: bf16[1,64,64,64], index: 4, kind: output, shape index: {}]  }
   0x1   :  { %11 = vsyncpa [#allocation3 + $0x1], 0  ;;  %s9572_s15 = smov 0   ;;  %s9574_s16 = smov 0  }
   0x2   :  { %s9576_s17 = smov 0   ;;  %s9578_s18 = smov 0  }
   0x3   :  { %s9580_s19 = smov 0   ;;  %s9582_s20 = smov 0  }
   0x4 LB: > { %s7137_s21 = sadd.s32 4294967295, %s9541_s20   ;;  %s7138_s22 = sadd.s32 4294967294, %s9541_s20   ;;  %s9541_s20 = sphi %s9582_s20, %s17_s20   ;;  %s9537_s19 = sphi %s9580_s19, %s11134_s19   ;;  %s9533_s18 = sphi %s9578_s18, %s11133_s18   ;;  %s9529_s17 = sphi %s9576_s17, %s11132_s17   ;;  %s9525_s16 = sphi %s9574_s16, %s11131_s16   ;;  %s9521_s15 = sphi %s9572_s15, %s11130_s15  }
   0x5   : > { %s26_s23 = sadd.s32 1, %s9537_s19  ;;  %s138_s24 = sadd.s32 1, %s9529_s17 }
   0x6   : > { %p27_p0 = scmp.ge.s32.totalorder %s26_s23, 8  ;;  %p148_p1 = scmp.ne.s32.totalorder %s9529_s17, %s9525_s16 }
   0x7   : > { %p149_p2 = scmp.eq.s32.totalorder %s7137_s21, 7  ;;  %p154_p3 = scmp.ne.s32.totalorder %s9525_s16, %s9521_s15 }
   0x8   : > { %s11136_s23 = smov (%p27_p0, %s26_s23), 0  ;;  %p155_p5 = scmp.eq.s32.totalorder %s7138_s22, 7 }
   0x9   : > { %p9612_p4 = por %p149_p2, %p148_p1  ;;  %s134_s26 = ssub.s32 %s9537_s19, %s11136_s23 }
   0xa   : > { %p7141_p6 = scmp.ge.s32.totalorder %s9541_s20, 1  ;;  %p136_p7 = scmp.eq.s32.totalorder %s134_s26, 0 }
   0xb   : > { %p9619_p8 = por %p155_p5, %p154_p3  ;;  %p209_p9 = scmp.lt.s32.totalorder %s9541_s20, 9 }
   0xc   : > { %s9625_s28 = scalar_select %p136_p7, %s9529_s17, %s138_s24  }
   0xd   : > { %p210_p10 = pnand %p7141_p6, %p209_p9 }
   0xe   : > { %v7147_v0 = vld [vmem:[%s11125_s2 + $0x2] sm:$0x3] (!%p210_p10)  ;;  %vm465_vm0 = vcmask (!%p210_p10), 1040384   ;;  %vm466_vm1 = vcmask (!%p210_p10), 1041408   ;;  %s9631_s5 = sshll.u32 (!%p210_p10), %s9533_s18, 3  ;;  %v9543_v1 = vmov (!%p210_p10), 65535  }
   0xf   : > { %213 = sbr.rel (%p210_p10) target bundleno = 842 (0x34a), region = 36  ;;  %v467_v2 = vsel (!%p210_p10), %vm465_vm0, 4294967295, %v9543_v1  ;;  %p254_p11 = scmp.lt.s32.totalorder (!%p210_p10), %s9631_s5, 71  ;;  %v277_v4 = vld [vmem:[%s11125_s2] sm:$0x3] (!%p210_p10)  ;;  %vm452_vm3 = vcmask (!%p210_p10), 23552  }
  0x10   : > { %v9634_v3 = vsel (!%p210_p10), %vm466_vm1, %v467_v2, 0  ;;  %vm415_vm2 = vsmask.f32 (!%p210_p10), 7424  ;;  %v7148_v15 = vld [vmem:[%s11125_s2 + $0x4] sm:$0x3] (!%p210_p10)  ;;  %vm613_vm4 = vcmask (!%p210_p10), 1046528  }
  0x11   : > { %v9640_v5 = vand.u32 (!%p210_p10), %v7147_v0, %v9634_v3  ;;  %v9644_v6 = vand.u32 (!%p210_p10), %v9634_v3, %v277_v4  ;;  %v9694_v35 = vand.u32 (!%p210_p10), %v7148_v15, %v9634_v3  ;;  %v7149_v63 = vld [vmem:[%s11125_s2 + $0x6] sm:$0x3] (!%p210_p10)  ;;  %s248_s13 = sand.u32 (!%p210_p10), 1, %s9525_s16   ;;  %vm6609_vm5 = vcmask (!%p210_p10), 519168   ;;  %s7693_s24 = sadd.s32 (!%p210_p10), 8, %s9631_s5 }
  0x12   : > { %v9751_v0 = vand.u32 (!%p210_p10), %v7149_v63, %v9634_v3  ;;  %s10438_s22 = sshll.u32 (!%p210_p10), %s248_s13, 8  ;;  %p266_p12 = scmp.lt.s32.totalorder (!%p210_p10), %s7693_s24, 71 }
  0x13   : > { %8120 = vmatprep.subr.bf16.mxu0 (!%p210_p10), %v9640_v5  ;;  %8210 = vmatprep.subr.bf16.mxu1 (!%p210_p10), %v9640_v5  ;;  %s10463_s26 = scalar_lea.vmem (!%p210_p10), [#allocation2], %s10438_s22  ;;  %s11077_s14 = scalar_lea.sflag (!%p210_p10), [#allocation3], %s248_s13 }
  0x14   : > { %8121 = vmatpush3.bf16.msra.mxu0 (!%p210_p10), %v9640_v5  ;;  %8211 = vmatpush3.bf16.msra.mxu1 (!%p210_p10), %v9640_v5  ;;  %s9544_s22 = smov (!%p210_p10), [#allocation2]  }
  0x15   : > { %8130 = vmatprep.subr.bf16.mxu0 (!%p210_p10), %v9644_v6  ;;  %8220 = vmatprep.subr.bf16.mxu1 (!%p210_p10), %v9644_v6 }
  0x16   : > { %s255_s8 = scalar_select %p254_p11, %s9631_s5, 71 }
  0x17   : > { %s11138_s24 = smov (!%p266_p12, %s7693_s24), 71 }
  0x18   : > { %s9352_s9 = smul.u32 36, %s255_s8  ;;  %s7759_s8 = sshll.u32 %s9533_s18, 12 }
  0x19   : > { %s9353_s5 = smul.u32 36, %s11138_s24  ;;  %s11063_s11 = scalar_lea.hbm %s11127_s4, %s7759_s8 }
  0x1a   : > { %s9653_s12 = scalar_lea.vmem %s11123_s0, %s9352_s9  ;;  %s7034_s9 = sshll.u32 %s10463_s26, 4  ;;  %s11065_s9 = int_to_ptr.vmem [resolvable:$true] %s7034_s9 }
  0x1b   : > { %v9658_v7 = vld [vmem:[%s9653_s12] sm:$0xff]   ;;  %v9661_v8 = vld [vmem:[%s9653_s12 + $0x8] sm:$0xff]   ;;  %v9677_v18 = vld [vmem:[%s9653_s12 + $0x10] sm:$0xff]   ;;  %s10497_s6 = scalar_lea.vmem %s11124_s1, %s9353_s5  ;;  %s9463_s21 = scalar_lea.vmem %s11065_s9, 4096 }
  0x1c   : > { %v417_v9 = vshrl.u32 %v9658_v7, 16  ;;  %v419_v10 = vshll.u32 %v9658_v7, 16  ;;  %v424_v11 = vshll.u32 %v9661_v8, 16  ;;  %v428_v12 = vshrl.u32 %v9661_v8, 16  ;;  %v9668_v13 = vld [vmem:[%s9653_s12 + $0x24] sm:$0xff]   ;;  %v9671_v14 = vld [vmem:[%s9653_s12 + $0x2c] sm:$0xff]   ;;  %p9464_p13 = scmp.ne.s32.totalorder %s11065_s9, %s9463_s21 }
  0x1d   : > { %v9680_v19 = vld [vmem:[%s9653_s12 + $0x34] sm:$0xff]   ;;  %v822_v20 = vshrl.u32 %v9668_v13, 16  ;;  %v824_v21 = vshll.u32 %v9668_v13, 16  ;;  %v828_v22 = vshll.u32 %v9671_v14, 16  ;;  %v832_v23 = vshrl.u32 %v9671_v14, 16  ;;  %v9699_v39 = vld [vmem:[%s9653_s12 + $0x3c] sm:$0xff]  }
  0x1e   : > { %v421_v16 = vrot.slane %v419_v10, 1  ;;  %v426_v17 = vrot.slane %v424_v11, 1  ;;  %v432_v26 = vshll.u32 %v9677_v18, 16  ;;  %v835_v27 = vshll.u32 %v9680_v19, 16  ;;  %v9689_v30 = vld [vmem:[%s9653_s12 + $0x18] sm:$0xff]   ;;  %p9465_p0 = pnand %p9464_p13, %p9612_p4  ;;  %s9467_s24 = sshll.u32 %s9544_s22, 4  ;;  %s9468_s24 = int_to_ptr.vmem [resolvable:$false] %s9467_s24 }
  0x1f   : > { %v826_v28 = vrot.slane %v824_v21, 1  ;;  %v830_v29 = vrot.slane %v828_v22, 1  ;;  %v436_v31 = vshrl.u32 %v9677_v18, 16  ;;  %v440_v38 = vshll.u32 %v9689_v30, 16  ;;  %s9469_s5 = scalar_lea.vmem %s9468_s24, 8192  ;;  %p9470_p2 = scmp.lt.s32.totalorder %s11065_s9, %s9468_s24 }
  0x20   : > { %v422_v24 = vor.u32 %v421_v16, %v417_v9  ;;  %v430_v25 = vor.u32 %v428_v12, %v426_v17  ;;  %v434_v33 = vrot.slane %v432_v26, 1  ;;  %v837_v34 = vrot.slane %v835_v27, 1  ;;  %v9704_v43 = vld [vmem:[%s9653_s12 + $0x20] ss:$0 sps:$4 sm:$0x11]   ;;  %v9815_v27 = vld [vmem:[%s9653_s12 + $0x48] sm:$0xff]   ;;  %p9466_p1 = pneg %p9465_p0  ;;  %p9471_p3 = scmp.lt.s32.totalorder %s9469_s5, %s9463_s21 }
  0x21   : > { %v827_v36 = vor.u32 %v826_v28, %v822_v20  ;;  %v834_v37 = vor.u32 %v832_v23, %v830_v29  ;;  %v839_v40 = vshrl.u32 %v9680_v19, 16  ;;  %v444_v44 = vshrl.u32 %v9689_v30, 16  ;;  %v9715_v48 = vld [vmem:[%s9653_s12 + $0x44] ss:$0 sps:$4 sm:$0x11]  }
  0x22   : > { %v427_v32 = vsel %vm415_vm2, %v422_v24, %v426_v17  ;;  %v435_v41 = vsel %vm415_vm2, %v430_v25, %v434_v33  ;;  %v438_v42 = vor.u32 %v436_v31, %v434_v33  ;;  %v442_v47 = vrot.slane %v440_v38, 1  ;;  %v7150_v16 = vld [vmem:[%s11125_s2 + $0x8] sm:$0x3]  ;;  %v7151_v28 = vld [vmem:[%s11125_s2 + $0xa] sm:$0x3]  ;;  %p9472_p5 = por %p9471_p3, %p9470_p2 }
  0x23   : > { %8122 = vmatprep.mubr.msk.bf16.mxu0 %vm452_vm3, %v427_v32  ;;  %v9708_v45 = vsel %vm415_vm2, %v827_v36, %v830_v29  ;;  %v9712_v46 = vsel %vm415_vm2, %v834_v37, %v837_v34  ;;  %v841_v49 = vor.u32 %v839_v40, %v837_v34  ;;  %v842_v50 = vshll.u32 %v9699_v39, 16  ;;  %v9835_v32 = vld [vmem:[%s9653_s12 + $0x58] sm:$0xff]   ;;  %v9852_v37 = vld [vmem:[%s9653_s12 + $0x60] sm:$0xff]  }
  0x24   : > { %8123 = vmatmul.mubr.msk.bf16.vlgmr.msra.gmra.mrb[0].mxu0 %vm452_vm3, %v435_v41  ;;  %8212 = vmatprep.mubr.msk.bf16.mxu1 %vm452_vm3, %v9708_v45  ;;  %v448_v51 = vshll.u32 %v9704_v43, 16  ;;  %v846_v52 = vshrl.u32 %v9699_v39, 16  ;;  %v443_v53 = vsel %vm415_vm2, %v438_v42, %v442_v47  ;;  %v446_v54 = vor.u32 %v444_v44, %v442_v47  ;;  %v9426_v47 = vld [vmem:[%s9653_s12 + $0x68] ss:$0 sps:$4 sm:$0x11]   ;;  %p9473_p6 = pnand %p9472_p5, %p9466_p1 }
  0x25   : > { %8131 = vmatpush3.bf16.msra.mxu0 %v9644_v6  ;;  %8213 = vmatmul.mubr.msk.bf16.vlgmr.msra.gmra.mrb[0].mxu1 %vm452_vm3, %v9712_v46  ;;  %v850_v55 = vshll.u32 %v9715_v48, 16  ;;  %v844_v56 = vrot.slane %v842_v50, 1  ;;  %v614_v1 = vrot.slane %v9658_v7, 1  ;;  %v615_v2 = vrot.slane %v9661_v8, 1 }
  0x26   : > { %8140 = vmatprep.subr.bf16.mxu0 %v9694_v35  ;;  %8221 = vmatpush3.bf16.msra.mxu1 %v9644_v6  ;;  %v450_v57 = vrot.slane %v448_v51, 1  ;;  %v942_v4 = vrot.slane %v9668_v13, 1  ;;  %v943_v9 = vrot.slane %v9671_v14, 1  ;;  %v617_v10 = vrot.slane %v9677_v18, 1 }
  0x27   : > { %8126 = vmatprep.mubr.msk.bf16.mxu0 %vm452_vm3, %v443_v53  ;;  %v852_v58 = vrot.slane %v850_v55, 1  ;;  %8230 = vmatprep.subr.bf16.mxu1 %v9694_v35  ;;  %v9732_v59 = vsel %vm415_vm2, %v841_v49, %v844_v56  ;;  %v848_v61 = vor.u32 %v846_v52, %v844_v56  ;;  %v619_v11 = vrot.slane %v9689_v30, 1 }
  0x28   : > { %v451_v60 = vsel %vm415_vm2, %v446_v54, %v450_v57  ;;  %8216 = vmatprep.mubr.msk.bf16.mxu1 %vm452_vm3, %v9732_v59  ;;  %v947_v12 = vrot.slane %v9699_v39, 1  ;;  %v9777_v15 = vsel %vm613_vm4, %v942_v4, %v943_v9  ;;  %v618_v17 = vsel %vm613_vm4, %v615_v2, %v617_v10 }
  0x29   : > { %v9738_v62 = vsel %vm415_vm2, %v848_v61, %v852_v58  ;;  %v9790_v20 = vand.u32 %v7150_v16, %v9634_v3  ;;  %v621_v23 = vrot.slane %v9704_v43, 1  ;;  %v949_v24 = vrot.slane %v9715_v48, 1 }
  0x2a   : > { %v1152_v29 = vshll.u32 %v9815_v27, 16  ;;  %v9832_v31 = vand.u32 %v7151_v28, %v9634_v3  ;;  %v1163_v38 = vshll.u32 %v9835_v32, 16  ;;  %v1167_v41 = vshrl.u32 %v9835_v32, 16 }
  0x2b   : > { %v622_v25 = vsel %vm613_vm4, %v619_v11, %v621_v23  ;;  %v9812_v26 = vsel %vm613_vm4, %v947_v12, %v949_v24  ;;  %v1170_v42 = vshll.u32 %v9852_v37, 16  ;;  %v1174_v51 = vshrl.u32 %v9852_v37, 16 }
  0x2c   : > { %8127 = vmatmul.mubr.msk.bf16.gmra.mrb[4].mxu0 %vm452_vm3, %v451_v60  ;;  %v1154_v33 = vrot.slane %v1152_v29, 1  ;;  %v1165_v43 = vrot.slane %v1163_v38, 1  ;;  %v1178_v52 = vshll.u32 %v9426_v47, 16  ;;  %v1270_v55 = vrot.slane %v9815_v27, 1  ;;  %v7153_v60 = vld [vmem:[%s11125_s2 + $0xe] sm:$0x3] }
  0x2d   : > { %8132 = vmatprep.mubr.msk.bf16.mxu0 %vm452_vm3, %v9658_v7  ;;  %8217 = vmatmul.mubr.msk.bf16.gmra.mrb[4].mxu1 %vm452_vm3, %v9738_v62  ;;  %v945_v7 = vrot.slane %v9680_v19, 1  ;;  %v1172_v49 = vrot.slane %v1170_v42, 1  ;;  %v1275_v61 = vrot.slane %v9852_v37, 1 }
  0x2e   : > { %8222 = vmatprep.mubr.msk.bf16.mxu1 %vm452_vm3, %v9668_v13  ;;  %v1169_v48 = vor.u32 %v1167_v41, %v1165_v43 }
  0x2f   : > { %v9793_v21 = vsel %vm613_vm4, %v943_v9, %v945_v7  ;;  %v9797_v22 = vsel %vm613_vm4, %v945_v7, %v947_v12  ;;  %v1176_v54 = vor.u32 %v1174_v51, %v1172_v49  ;;  %v9941_v9 = vld [vmem:[%s9653_s12 + $0x6c] sm:$0xff]   ;;  %v9962_v12 = vld [vmem:[%s9653_s12 + $0x7c] sm:$0xff]  }
  0x30   : > { %v9883_v53 = vsel %vm415_vm2, %v1169_v48, %v1172_v49  ;;  %v1899_v7 = vshll.u32 %v9941_v9, 16  ;;  %v2017_v48 = vrot.slane %v9962_v12, 1 }
  0x32   : > { %v1901_v16 = vrot.slane %v1899_v7, 1 }
  0x34   : > { %8133 = vmatmul.mubr.msk.bf16.vlgmr.msra.gmra.mrb[0].mxu0 %vm452_vm3, %v9661_v8  ;;  %v616_v8 = vsel %vm613_vm4, %v614_v1, %v615_v2  ;;  %v1277_v2 = vrot.slane %v9426_v47, 1 }
  0x35   : > { %8141 = vmatpush3.bf16.msra.mxu0 %v9694_v35  ;;  %8136 = vmatprep.mubr.msk.bf16.mxu0 %vm452_vm3, %v9677_v18  ;;  %v620_v18 = vsel %vm613_vm4, %v617_v10, %v619_v11  ;;  %v7154_v10 = vld [vmem:[%s11125_s2 + $0x10] sm:$0x3] }
  0x36   : > { %8223 = vmatmul.mubr.msk.bf16.vlgmr.msra.gmra.mrb[0].mxu1 %vm452_vm3, %v9671_v14  ;;  %8150 = vmatprep.subr.bf16.mxu0 %v9751_v0  ;;  %v9938_v4 = vsel %vm613_vm4, %v1275_v61, %v1277_v2  ;;  %v9959_v11 = vand.u32 %v7154_v10, %v9634_v3 }
  0x37   : > { %8231 = vmatpush3.bf16.msra.mxu1 %v9694_v35  ;;  %8226 = vmatprep.mubr.msk.bf16.mxu1 %vm452_vm3, %v9680_v19 }
  0x38   : > { %8240 = vmatprep.subr.bf16.mxu1 %v9751_v0 }
  0x3c   : > { %8137 = vmatmul.mubr.msk.bf16.gmra.mrb[4].mxu0 %vm452_vm3, %v9689_v30  ;;  %v9829_v30 = vld [vmem:[%s9653_s12 + $0x50] sm:$0xff]  }
  0x3d   : > { %8142 = vmatprep.mubr.msk.bf16.mxu0 %vm452_vm3, %v616_v8  ;;  %v1156_v34 = vshll.u32 %v9829_v30, 16  ;;  %v1271_v56 = vrot.slane %v9829_v30, 1  ;;  %v9956_v8 = vld [vmem:[%s9653_s12 + $0x74] sm:$0xff]  }
  0x3e   : > { %8227 = vmatmul.mubr.msk.bf16.gmra.mrb[4].mxu1 %vm452_vm3, %v9699_v39  ;;  %v1907_v23 = vshrl.u32 %v9956_v8, 16 }
  0x3f   : > { %8232 = vmatprep.mubr.msk.bf16.mxu1 %vm452_vm3, %v9777_v15  ;;  %v1158_v36 = vrot.slane %v1156_v34, 1  ;;  %v9903_v58 = vsel %vm613_vm4, %v1270_v55, %v1271_v56 }
  0x44   : > { %8143 = vmatmul.mubr.msk.bf16.vlgmr.msra.gmra.mrb[0].mxu0 %vm452_vm3, %v618_v17  ;;  %v1903_v17 = vshll.u32 %v9956_v8, 16 }
  0x45   : > { %8151 = vmatpush3.bf16.msra.mxu0 %v9751_v0  ;;  %8146 = vmatprep.mubr.msk.bf16.mxu0 %vm452_vm3, %v620_v18 }
  0x46   : > { %8233 = vmatmul.mubr.msk.bf16.vlgmr.msra.gmra.mrb[0].mxu1 %vm452_vm3, %v9793_v21  ;;  %8160 = vmatprep.subr.bf16.mxu0 %v9790_v20  ;;  %v1905_v18 = vrot.slane %v1903_v17, 1 }
  0x47   : > { %8241 = vmatpush3.bf16.msra.mxu1 %v9751_v0  ;;  %8236 = vmatprep.mubr.msk.bf16.mxu1 %vm452_vm3, %v9797_v22 }
  0x48   : > { %8250 = vmatprep.subr.bf16.mxu1 %v9790_v20  ;;  %v1909_v29 = vor.u32 %v1907_v23, %v1905_v18 }
  0x4c   : > { %8147 = vmatmul.mubr.msk.bf16.gmra.mrb[4].mxu0 %vm452_vm3, %v622_v25  ;;  %v1914_v25 = vshrl.u32 %v9962_v12, 16 }
  0x4d   : > { %8152 = vmatprep.mubr.msk.bf16.mxu0 %vm452_vm3, %v9668_v13  ;;  %v1150_v13 = vshrl.u32 %v9815_v27, 16 }
  0x4e   : > { %8237 = vmatmul.mubr.msk.bf16.gmra.mrb[4].mxu1 %vm452_vm3, %v9812_v26 }
  0x4f   : > { %8242 = vmatprep.mubr.msk.bf16.mxu1 %vm452_vm3, %v9815_v27 }
  0x54   : > { %8153 = vmatmul.mubr.msk.bf16.vlgmr.msra.gmra.mrb[0].mxu0 %vm452_vm3, %v9671_v14  ;;  %v1155_v14 = vor.u32 %v1154_v33, %v1150_v13  ;;  %v9431_v13 = vld [vmem:[%s9653_s12 + $0x8c] ss:$0 sps:$4 sm:$0x11]  }
  0x55   : > { %8161 = vmatpush3.bf16.msra.mxu0 %v9790_v20  ;;  %8156 = vmatprep.mubr.msk.bf16.mxu0 %vm452_vm3, %v9680_v19  ;;  %v1160_v19 = vshrl.u32 %v9829_v30, 16  ;;  %v1925_v38 = vshll.u32 %v9431_v13, 16 }
  0x56   : > { %8243 = vmatmul.mubr.msk.bf16.vlgmr.msra.gmra.mrb[0].mxu1 %vm452_vm3, %v9829_v30  ;;  %8170 = vmatprep.subr.bf16.mxu0 %v9832_v31  ;;  %v9859_v40 = vsel %vm415_vm2, %v1155_v14, %v1158_v36 }
  0x57   : > { %8251 = vmatpush3.bf16.msra.mxu1 %v9790_v20  ;;  %8246 = vmatprep.mubr.msk.bf16.mxu1 %vm452_vm3, %v9835_v32  ;;  %v1162_v44 = vor.u32 %v1160_v19, %v1158_v36  ;;  %v1927_v42 = vrot.slane %v1925_v38, 1 }
  0x58   : > { %8260 = vmatprep.subr.bf16.mxu1 %v9832_v31 }
  0x5c   : > { %8157 = vmatmul.mubr.msk.bf16.gmra.mrb[4].mxu0 %vm452_vm3, %v9699_v39  ;;  %v7152_v39 = vld [vmem:[%s11125_s2 + $0xc] sm:$0x3] }
  0x5d   : > { %8162 = vmatprep.mubr.msk.bf16.mxu0 %vm452_vm3, %v9708_v45  ;;  %v9874_v50 = vand.u32 %v7152_v39, %v9634_v3  ;;  %v9877_v45 = vsel %vm415_vm2, %v1162_v44, %v1165_v43  ;;  %v2014_v43 = vrot.slane %v9941_v9, 1  ;;  %v2015_v44 = vrot.slane %v9956_v8, 1 }
  0x5e   : > { %8247 = vmatmul.mubr.msk.bf16.gmra.mrb[4].mxu1 %vm452_vm3, %v9852_v37 }
  0x5f   : > { %8252 = vmatprep.mubr.msk.bf16.mxu1 %vm452_vm3, %v9859_v40  ;;  %v10024_v39 = vsel %vm613_vm4, %v2014_v43, %v2015_v44  ;;  %v10035_v51 = vsel %vm613_vm4, %v2015_v44, %v2017_v48  ;;  %v10257_v43 = vld [vmem:[%s9653_s12 + $0xcc] sm:$0xff]  }
  0x64   : > { %8163 = vmatmul.mubr.msk.bf16.vlgmr.msra.gmra.mrb[0].mxu0 %vm452_vm3, %v9712_v46  ;;  %v1180_v46 = vrot.slane %v1178_v52, 1 }
  0x65   : > { %8171 = vmatpush3.bf16.msra.mxu0 %v9832_v31  ;;  %8166 = vmatprep.mubr.msk.bf16.mxu0 %vm452_vm3, %v9732_v59  ;;  %v1273_v59 = vrot.slane %v9835_v32, 1 }
  0x66   : > { %8253 = vmatmul.mubr.msk.bf16.vlgmr.msra.gmra.mrb[0].mxu1 %vm452_vm3, %v9877_v45  ;;  %8180 = vmatprep.subr.bf16.mxu0 %v9874_v50  ;;  %v9898_v57 = vsel %vm415_vm2, %v1176_v54, %v1180_v46  ;;  %v2021_v54 = vrot.slane %v9431_v13, 1  ;;  %v10225_v13 = vld [vmem:[%s9653_s12 + $0xb4] sm:$0xff]  }
  0x67   : > { %8261 = vmatpush3.bf16.msra.mxu1 %v9832_v31  ;;  %8256 = vmatprep.mubr.msk.bf16.mxu1 %vm452_vm3, %v9883_v53  ;;  %v9920_v63 = vsel %vm613_vm4, %v1271_v56, %v1273_v59  ;;  %v9925_v1 = vsel %vm613_vm4, %v1273_v59, %v1275_v61 }
  0x68   : > { %8270 = vmatprep.subr.bf16.mxu1 %v9874_v50 }
  0x6c   : > { %8167 = vmatmul.mubr.msk.bf16.gmra.mrb[4].mxu0 %vm452_vm3, %v9738_v62  ;;  %v9917_v62 = vand.u32 %v7153_v60, %v9634_v3 }
  0x6d   : > { %8172 = vmatprep.mubr.msk.bf16.mxu0 %vm452_vm3, %v9777_v15  ;;  %v1897_v15 = vshrl.u32 %v9941_v9, 16 }
  0x6e   : > { %8257 = vmatmul.mubr.msk.bf16.gmra.mrb[4].mxu1 %vm452_vm3, %v9898_v57 }
  0x6f   : > { %8262 = vmatprep.mubr.msk.bf16.mxu1 %vm452_vm3, %v9903_v58  ;;  %v1902_v3 = vor.u32 %v1901_v16, %v1897_v15 }
  0x71   : > { %v9986_v24 = vsel %vm415_vm2, %v1902_v3, %v1905_v18 }
  0x74   : > { %8173 = vmatmul.mubr.msk.bf16.vlgmr.msra.gmra.mrb[0].mxu0 %vm452_vm3, %v9793_v21  ;;  %v9979_v21 = vld [vmem:[%s9653_s12 + $0x84] sm:$0xff]  }
  0x75   : > { %8181 = vmatpush3.bf16.msra.mxu0 %v9874_v50  ;;  %8176 = vmatprep.mubr.msk.bf16.mxu0 %vm452_vm3, %v9797_v22  ;;  %v1910_v22 = vshll.u32 %v9962_v12, 16  ;;  %v1921_v36 = vshrl.u32 %v9979_v21, 16  ;;  %v2019_v49 = vrot.slane %v9979_v21, 1 }
  0x76   : > { %8263 = vmatmul.mubr.msk.bf16.vlgmr.msra.gmra.mrb[0].mxu1 %vm452_vm3, %v9920_v63  ;;  %8190 = vmatprep.subr.bf16.mxu0 %v9917_v62 }
  0x77   : > { %8271 = vmatpush3.bf16.msra.mxu1 %v9874_v50  ;;  %8266 = vmatprep.mubr.msk.bf16.mxu1 %vm452_vm3, %v9925_v1  ;;  %v1912_v28 = vrot.slane %v1910_v22, 1  ;;  %v10040_v52 = vsel %vm613_vm4, %v2017_v48, %v2019_v49  ;;  %v10053_v46 = vsel %vm613_vm4, %v2019_v49, %v2021_v54  ;;  %v3399_v49 = vshll.u32 %v10257_v43, 16  ;;  %v9441_v54 = vld [vmem:[%s9653_s12 + $0xd4] ss:$0 sps:$4 sm:$0x11]  }
  0x78   : > { %8280 = vmatprep.subr.bf16.mxu1 %v9917_v62 }
  0x79   : > { %v1916_v33 = vor.u32 %v1914_v25, %v1912_v28  ;;  %v9998_v14 = vsel %vm415_vm2, %v1909_v29, %v1912_v28 }
  0x7c   : > { %8177 = vmatmul.mubr.msk.bf16.gmra.mrb[4].mxu0 %vm452_vm3, %v9812_v26  ;;  %v1917_v26 = vshll.u32 %v9979_v21, 16 }
  0x7d   : > { %8182 = vmatprep.mubr.msk.bf16.mxu0 %vm452_vm3, %v9815_v27 }
  0x7e   : > { %8267 = vmatmul.mubr.msk.bf16.gmra.mrb[4].mxu1 %vm452_vm3, %v9938_v4  ;;  %v1919_v34 = vrot.slane %v1917_v26, 1 }
  0x7f   : > { %8272 = vmatprep.mubr.msk.bf16.mxu1 %vm452_vm3, %v9941_v9 }
  0x80   : > { %v10004_v19 = vsel %vm415_vm2, %v1916_v33, %v1919_v34  ;;  %v1923_v41 = vor.u32 %v1921_v36, %v1919_v34  ;;  %v3381_v33 = vshll.u32 %v10225_v13, 16  ;;  %v10237_v34 = vld [vmem:[%s9653_s12 + $0xbc] sm:$0xff]   ;;  %v3379_v36 = vshrl.u32 %v10225_v13, 16 }
  0x82   : > { %v10019_v47 = vsel %vm415_vm2, %v1923_v41, %v1927_v42  ;;  %v3383_v38 = vrot.slane %v3381_v33, 1 }
  0x84   : > { %8183 = vmatmul.mubr.msk.bf16.vlgmr.msra.gmra.mrb[0].mxu0 %vm452_vm3, %v9829_v30  ;;  %v3384_v41 = vor.u32 %v3383_v38, %v3379_v36  ;;  %v10448_v38 = vld [vmem:[%s9653_s12 + $0xf8] ss:$0 sps:$4 sm:$0x11]  }
  0x85   : > { %8191 = vmatpush3.bf16.msra.mxu0 %v9917_v62  ;;  %8186 = vmatprep.mubr.msk.bf16.mxu0 %vm452_vm3, %v9835_v32 }
  0x86   : > { %8273 = vmatmul.mubr.msk.bf16.vlgmr.msra.gmra.mrb[0].mxu1 %vm452_vm3, %v9956_v8  ;;  %8200 = vmatprep.subr.bf16.mxu0 %v9959_v11 }
  0x87   : > { %8281 = vmatpush3.bf16.msra.mxu1 %v9917_v62  ;;  %8276 = vmatprep.mubr.msk.bf16.mxu1 %vm452_vm3, %v9962_v12 }
  0x88   : > { %8290 = vmatprep.subr.bf16.mxu1 %v9959_v11 }
  0x8c   : > { %8187 = vmatmul.mubr.msk.bf16.gmra.mrb[4].mxu0 %vm452_vm3, %v9852_v37 }
  0x8d   : > { %8192 = vmatprep.mubr.msk.bf16.mxu0 %vm452_vm3, %v9859_v40 }
  0x8e   : > { %8277 = vmatmul.mubr.msk.bf16.gmra.mrb[4].mxu1 %vm452_vm3, %v9979_v21 }
  0x8f   : > { %8282 = vmatprep.mubr.msk.bf16.mxu1 %vm452_vm3, %v9986_v24 }
  0x94   : > { %8193 = vmatmul.mubr.msk.bf16.vlgmr.msra.gmra.mrb[0].mxu0 %vm452_vm3, %v9877_v45 }
  0x95   : > { %8201 = vmatpush3.bf16.msra.mxu0 %v9959_v11  ;;  %8196 = vmatprep.mubr.msk.bf16.mxu0 %vm452_vm3, %v9883_v53 }
  0x96   : > { %8283 = vmatmul.mubr.msk.bf16.vlgmr.msra.gmra.mrb[0].mxu1 %vm452_vm3, %v9998_v14  ;;  %8300 = vmatprep.subr.bf16.mxu0 %v9640_v5 }
  0x97   : > { %8291 = vmatpush3.bf16.msra.mxu1 %v9959_v11  ;;  %8286 = vmatprep.mubr.msk.bf16.mxu1 %vm452_vm3, %v10004_v19 }
  0x98   : > { %8390 = vmatprep.subr.bf16.mxu1 %v9640_v5 }
  0x9c   : > { %8197 = vmatmul.mubr.msk.bf16.gmra.mrb[4].mxu0 %vm452_vm3, %v9898_v57 }
  0x9d   : > { %8202 = vmatprep.mubr.msk.bf16.mxu0 %vm452_vm3, %v9903_v58 }
  0x9e   : > { %8287 = vmatmul.mubr.msk.bf16.gmra.mrb[4].mxu1 %vm452_vm3, %v10019_v47 }
  0x9f   : > { %8292 = vmatprep.mubr.msk.bf16.mxu1 %vm452_vm3, %v10024_v39 }
  0xa4   : > { %8203 = vmatmul.mubr.msk.bf16.vlgmr.msra.gmra.mrb[0].mxu0 %vm452_vm3, %v9920_v63 }
  0xa5   : > { %8301 = vmatpush3.bf16.msra.mxu0 %v9640_v5  ;;  %8206 = vmatprep.mubr.msk.bf16.mxu0 %vm452_vm3, %v9925_v1 }
  0xa6   : > { %8293 = vmatmul.mubr.msk.bf16.vlgmr.msra.gmra.mrb[0].mxu1 %vm452_vm3, %v10035_v51  ;;  %8310 = vmatprep.subr.bf16.mxu0 %v9644_v6 }
  0xa7   : > { %8391 = vmatpush3.bf16.msra.mxu1 %v9640_v5  ;;  %8296 = vmatprep.mubr.msk.bf16.mxu1 %vm452_vm3, %v10040_v52 }
  0xa8   : > { %8400 = vmatprep.subr.bf16.mxu1 %v9644_v6 }
  0xac   : > { %8207 = vmatmul.mubr.msk.bf16.gmra.mrb[4].mxu0 %vm452_vm3, %v9938_v4 }
  0xad   : > { %8302 = vmatprep.mubr.msk.bf16.mxu0 %vm452_vm3, %v9859_v40 }
  0xae   : > { %8297 = vmatmul.mubr.msk.bf16.gmra.mrb[4].mxu1 %vm452_vm3, %v10053_v46 }
  0xaf   : > { %8392 = vmatprep.mubr.msk.bf16.mxu1 %vm452_vm3, %v9986_v24 }
  0xb4   : > { %8303 = vmatmul.mubr.msk.bf16.vlgmr.msra.gmra.mrb[8].mxu0 %vm452_vm3, %v9877_v45 }
  0xb5   : > { %8311 = vmatpush3.bf16.msra.mxu0 %v9644_v6  ;;  %8306 = vmatprep.mubr.msk.bf16.mxu0 %vm452_vm3, %v9883_v53 }
  0xb6   : > { %8393 = vmatmul.mubr.msk.bf16.vlgmr.msra.gmra.mrb[8].mxu1 %vm452_vm3, %v9998_v14  ;;  %8320 = vmatprep.subr.bf16.mxu0 %v9694_v35 }
  0xb7   : > { %8401 = vmatpush3.bf16.msra.mxu1 %v9644_v6  ;;  %8396 = vmatprep.mubr.msk.bf16.mxu1 %vm452_vm3, %v10004_v19 }
  0xb8   : > { %8410 = vmatprep.subr.bf16.mxu1 %v9694_v35 }
  0xbc   : > { %8307 = vmatmul.mubr.msk.bf16.gmra.mrb[12].mxu0 %vm452_vm3, %v9898_v57  ;;  %v10148_v57 = vld [vmem:[%s9653_s12 + $0xa8] sm:$0xff]  }
  0xbd   : > { %8312 = vmatprep.mubr.msk.bf16.mxu0 %vm452_vm3, %v9815_v27  ;;  %v10116_v27 = vld [vmem:[%s9653_s12 + $0x90] sm:$0xff]  }
  0xbe   : > { %8397 = vmatmul.mubr.msk.bf16.gmra.mrb[12].mxu1 %vm452_vm3, %v10019_v47  ;;  %v2638_v40 = vshrl.u32 %v10116_v27, 16  ;;  %v2755_v3 = vrot.slane %v10116_v27, 1 }
  0xbf   : > { %8402 = vmatprep.mubr.msk.bf16.mxu1 %vm452_vm3, %v9941_v9 }
  0xc4   : > { %8313 = vmatmul.mubr.msk.bf16.vlgmr.msra.gmra.mrb[8].mxu0 %vm452_vm3, %v9829_v30  ;;  %v2640_v30 = vshll.u32 %v10116_v27, 16 }
  0xc5   : > { %8321 = vmatpush3.bf16.msra.mxu0 %v9694_v35  ;;  %8316 = vmatprep.mubr.msk.bf16.mxu0 %vm452_vm3, %v9835_v32  ;;  %v10128_v32 = vld [vmem:[%s9653_s12 + $0x98] sm:$0xff]  }
  0xc6   : > { %8403 = vmatmul.mubr.msk.bf16.vlgmr.msra.gmra.mrb[8].mxu1 %vm452_vm3, %v9956_v8  ;;  %8330 = vmatprep.subr.bf16.mxu0 %v9751_v0  ;;  %v2642_v45 = vrot.slane %v2640_v30, 1  ;;  %v2644_v53 = vshll.u32 %v10128_v32, 16  ;;  %v2648_v59 = vshrl.u32 %v10128_v32, 16  ;;  %v2756_v18 = vrot.slane %v10128_v32, 1 }
  0xc7   : > { %8411 = vmatpush3.bf16.msra.mxu1 %v9694_v35  ;;  %8406 = vmatprep.mubr.msk.bf16.mxu1 %vm452_vm3, %v9962_v12  ;;  %v3401_v30 = vrot.slane %v3399_v49, 1 }
  0xc8   : > { %8420 = vmatprep.subr.bf16.mxu1 %v9751_v0  ;;  %v2643_v55 = vor.u32 %v2642_v45, %v2638_v40  ;;  %v2646_v56 = vrot.slane %v2644_v53, 1  ;;  %v10193_v22 = vsel %vm613_vm4, %v2755_v3, %v2756_v18  ;;  %v3403_v45 = vshrl.u32 %v10257_v43, 16  ;;  %v10424_v3 = vld [vmem:[%s11126_s3] ss:$0 sm:$0xff] }
  0xc9   : > { %v3407_v53 = vshll.u32 %v9441_v54, 16 }
  0xca   : > { %v10155_v60 = vsel %vm415_vm2, %v2643_v55, %v2646_v56  ;;  %v2650_v2 = vor.u32 %v2648_v59, %v2646_v56  ;;  %v3405_v56 = vor.u32 %v3403_v45, %v3401_v30  ;;  %v3496_v59 = vrot.slane %v10225_v13, 1 }
  0xcc   : > { %8317 = vmatmul.mubr.msk.bf16.gmra.mrb[12].mxu0 %vm452_vm3, %v9852_v37  ;;  %v10131_v37 = vld [vmem:[%s9653_s12 + $0xa0] sm:$0xff]  }
  0xcd   : > { %8322 = vmatprep.mubr.msk.bf16.mxu0 %vm452_vm3, %v9903_v58  ;;  %v2651_v58 = vshll.u32 %v10131_v37, 16  ;;  %v2655_v61 = vshrl.u32 %v10131_v37, 16  ;;  %v2758_v23 = vrot.slane %v10131_v37, 1 }
  0xce   : > { %8407 = vmatmul.mubr.msk.bf16.gmra.mrb[12].mxu1 %vm452_vm3, %v9979_v21 }
  0xcf   : > { %8412 = vmatprep.mubr.msk.bf16.mxu1 %vm452_vm3, %v10024_v39  ;;  %v10204_v25 = vsel %vm613_vm4, %v2756_v18, %v2758_v23 }
  0xd4   : > { %8323 = vmatmul.mubr.msk.bf16.vlgmr.msra.gmra.mrb[8].mxu0 %vm452_vm3, %v9920_v63  ;;  %v2658_v63 = vshll.u32 %v10148_v57, 16 }
  0xd5   : > { %8331 = vmatpush3.bf16.msra.mxu0 %v9751_v0  ;;  %8326 = vmatprep.mubr.msk.bf16.mxu0 %vm452_vm3, %v9925_v1  ;;  %v2653_v1 = vrot.slane %v2651_v58, 1  ;;  %v3409_v58 = vrot.slane %v3407_v53, 1 }
  0xd6   : > { %8413 = vmatmul.mubr.msk.bf16.vlgmr.msra.gmra.mrb[8].mxu1 %vm452_vm3, %v10035_v51  ;;  %8340 = vmatprep.subr.bf16.mxu0 %v9790_v20  ;;  %v2660_v10 = vrot.slane %v2658_v63, 1 }
  0xd7   : > { %8421 = vmatpush3.bf16.msra.mxu1 %v9751_v0  ;;  %8416 = vmatprep.mubr.msk.bf16.mxu1 %vm452_vm3, %v10040_v52  ;;  %v10167_v7 = vsel %vm415_vm2, %v2650_v2, %v2653_v1  ;;  %v10297_v63 = vsel %vm415_vm2, %v3405_v56, %v3409_v58 }
  0xd8   : > { %8430 = vmatprep.subr.bf16.mxu1 %v9790_v20 }
  0xdc   : > { %8327 = vmatmul.mubr.msk.bf16.gmra.mrb[12].mxu0 %vm452_vm3, %v9938_v4  ;;  %v9436_v4 = vld [vmem:[%s9653_s12 + $0xb0] ss:$0 sps:$4 sm:$0x11]  }
  0xdd   : > { %8332 = vmatprep.mubr.msk.bf16.mxu0 %vm452_vm3, %v9941_v9  ;;  %v2657_v9 = vor.u32 %v2655_v61, %v2653_v1  ;;  %v2762_v28 = vrot.slane %v9436_v4, 1  ;;  %v3497_v61 = vrot.slane %v10237_v34, 1 }
  0xde   : > { %8417 = vmatmul.mubr.msk.bf16.gmra.mrb[12].mxu1 %vm452_vm3, %v10053_v46 }
  0xdf   : > { %8422 = vmatprep.mubr.msk.bf16.mxu1 %vm452_vm3, %v10116_v27  ;;  %v10173_v15 = vsel %vm415_vm2, %v2657_v9, %v2660_v10  ;;  %v10302_v1 = vsel %vm613_vm4, %v3496_v59, %v3497_v61 }
  0xe4   : > { %8333 = vmatmul.mubr.msk.bf16.vlgmr.msra.gmra.mrb[8].mxu0 %vm452_vm3, %v9956_v8  ;;  %v2662_v8 = vshrl.u32 %v10148_v57, 16 }
  0xe5   : > { %8341 = vmatpush3.bf16.msra.mxu0 %v9790_v20  ;;  %8336 = vmatprep.mubr.msk.bf16.mxu0 %vm452_vm3, %v9962_v12  ;;  %v2666_v12 = vshll.u32 %v9436_v4, 16  ;;  %v3501_v4 = vrot.slane %v10257_v43, 1 }
  0xe6   : > { %8423 = vmatmul.mubr.msk.bf16.vlgmr.msra.gmra.mrb[8].mxu1 %vm452_vm3, %v10128_v32  ;;  %8350 = vmatprep.subr.bf16.mxu0 %v9832_v31  ;;  %v2664_v16 = vor.u32 %v2662_v8, %v2660_v10  ;;  %v3503_v8 = vrot.slane %v9441_v54, 1 }
  0xe7   : > { %8431 = vmatpush3.bf16.msra.mxu1 %v9790_v20  ;;  %8426 = vmatprep.mubr.msk.bf16.mxu1 %vm452_vm3, %v10131_v37  ;;  %v2668_v17 = vrot.slane %v2666_v12, 1 }
  0xe8   : > { %8440 = vmatprep.subr.bf16.mxu1 %v9832_v31  ;;  %v10331_v12 = vsel %vm613_vm4, %v3501_v4, %v3503_v8 }
  0xec   : > { %8337 = vmatmul.mubr.msk.bf16.gmra.mrb[12].mxu0 %vm452_vm3, %v9979_v21  ;;  %v10188_v21 = vsel %vm415_vm2, %v2664_v16, %v2668_v17  ;;  %v10416_v16 = vld [vmem:[%s9653_s12 + $0xf0] sm:$0xff]  }
  0xed   : > { %8342 = vmatprep.mubr.msk.bf16.mxu0 %vm452_vm3, %v9986_v24  ;;  %v2760_v24 = vrot.slane %v10148_v57, 1 }
  0xee   : > { %8427 = vmatmul.mubr.msk.bf16.gmra.mrb[12].mxu1 %vm452_vm3, %v10148_v57 }
  0xef   : > { %8432 = vmatprep.mubr.msk.bf16.mxu1 %vm452_vm3, %v10155_v60  ;;  %v10209_v26 = vsel %vm613_vm4, %v2758_v23, %v2760_v24  ;;  %v10222_v29 = vsel %vm613_vm4, %v2760_v24, %v2762_v28  ;;  %v4140_v23 = vshll.u32 %v10416_v16, 16 }
  0xf4   : > { %8343 = vmatmul.mubr.msk.bf16.vlgmr.msra.gmra.mrb[8].mxu0 %vm452_vm3, %v9998_v14  ;;  %v10240_v14 = vld [vmem:[%s9653_s12 + $0xc4] sm:$0xff]  }
  0xf5   : > { %8351 = vmatpush3.bf16.msra.mxu0 %v9832_v31  ;;  %8346 = vmatprep.mubr.msk.bf16.mxu0 %vm452_vm3, %v10004_v19  ;;  %v3385_v19 = vshll.u32 %v10237_v34, 16  ;;  %v3392_v44 = vshll.u32 %v10240_v14, 16  ;;  %v3396_v48 = vshrl.u32 %v10240_v14, 16  ;;  %v3499_v2 = vrot.slane %v10240_v14, 1 }
  0xf6   : > { %8433 = vmatmul.mubr.msk.bf16.vlgmr.msra.gmra.mrb[8].mxu1 %vm452_vm3, %v10167_v7  ;;  %8360 = vmatprep.subr.bf16.mxu0 %v9874_v50 }
  0xf7   : > { %8441 = vmatpush3.bf16.msra.mxu1 %v9832_v31  ;;  %8436 = vmatprep.mubr.msk.bf16.mxu1 %vm452_vm3, %v10173_v15  ;;  %v3387_v42 = vrot.slane %v3385_v19, 1  ;;  %v10313_v9 = vsel %vm613_vm4, %v3497_v61, %v3499_v2  ;;  %v10318_v10 = vsel %vm613_vm4, %v3499_v2, %v3501_v4 }
  0xf8   : > { %8450 = vmatprep.subr.bf16.mxu1 %v9874_v50 }
  0xfc   : > { %8347 = vmatmul.mubr.msk.bf16.gmra.mrb[12].mxu0 %vm452_vm3, %v10019_v47  ;;  %v3389_v47 = vshrl.u32 %v10237_v34, 16 }
  0xfd   : > { %8352 = vmatprep.mubr.msk.bf16.mxu0 %vm452_vm3, %v10024_v39  ;;  %v10264_v39 = vsel %vm415_vm2, %v3384_v41, %v3387_v42 }
  0xfe   : > { %8437 = vmatmul.mubr.msk.bf16.gmra.mrb[12].mxu1 %vm452_vm3, %v10188_v21 }
  0xff   : > { %8442 = vmatprep.mubr.msk.bf16.mxu1 %vm452_vm3, %v10193_v22 }
 0x104   : > { %8353 = vmatmul.mubr.msk.bf16.vlgmr.msra.gmra.mrb[8].mxu0 %vm452_vm3, %v10035_v51  ;;  %v3394_v51 = vrot.slane %v3392_v44, 1 }
 0x105   : > { %8361 = vmatpush3.bf16.msra.mxu0 %v9874_v50  ;;  %8356 = vmatprep.mubr.msk.bf16.mxu0 %vm452_vm3, %v10040_v52  ;;  %v3391_v52 = vor.u32 %v3389_v47, %v3387_v42 }
 0x106   : > { %8443 = vmatmul.mubr.msk.bf16.vlgmr.msra.gmra.mrb[8].mxu1 %vm452_vm3, %v10204_v25  ;;  %8370 = vmatprep.subr.bf16.mxu0 %v9917_v62 }
 0x107   : > { %8451 = vmatpush3.bf16.msra.mxu1 %v9874_v50  ;;  %8446 = vmatprep.mubr.msk.bf16.mxu1 %vm452_vm3, %v10209_v26  ;;  %v10276_v40 = vsel %vm415_vm2, %v3391_v52, %v3394_v51 }
 0x108   : > { %8460 = vmatprep.subr.bf16.mxu1 %v9917_v62 }
 0x10c   : > { %8357 = vmatmul.mubr.msk.bf16.gmra.mrb[12].mxu0 %vm452_vm3, %v10053_v46  ;;  %v3398_v46 = vor.u32 %v3396_v48, %v3394_v51  ;;  %v4142_v48 = vrot.slane %v4140_v23, 1 }
 0x10d   : > { %8362 = vmatprep.mubr.msk.bf16.mxu0 %vm452_vm3, %v10116_v27 }
 0x10e   : > { %8447 = vmatmul.mubr.msk.bf16.gmra.mrb[12].mxu1 %vm452_vm3, %v10222_v29  ;;  %v10282_v55 = vsel %vm415_vm2, %v3398_v46, %v3401_v30  ;;  %v4144_v46 = vshrl.u32 %v10416_v16, 16 }
 0x10f   : > { %8452 = vmatprep.mubr.msk.bf16.mxu1 %vm452_vm3, %v10225_v13 }
 0x114   : > { %8363 = vmatmul.mubr.msk.bf16.vlgmr.msra.gmra.mrb[8].mxu0 %vm452_vm3, %v10128_v32 }
 0x115   : > { %8371 = vmatpush3.bf16.msra.mxu0 %v9917_v62  ;;  %8366 = vmatprep.mubr.msk.bf16.mxu0 %vm452_vm3, %v10131_v37 }
 0x116   : > { %8453 = vmatmul.mubr.msk.bf16.vlgmr.msra.gmra.mrb[8].mxu1 %vm452_vm3, %v10237_v34  ;;  %8380 = vmatprep.subr.bf16.mxu0 %v9959_v11 }
 0x117   : > { %8461 = vmatpush3.bf16.msra.mxu1 %v9917_v62  ;;  %8456 = vmatprep.mubr.msk.bf16.mxu1 %vm452_vm3, %v10240_v14 }
 0x118   : > { %8470 = vmatprep.subr.bf16.mxu1 %v9959_v11 }
 0x11c   : > { %8367 = vmatmul.mubr.msk.bf16.gmra.mrb[12].mxu0 %vm452_vm3, %v10148_v57 }
 0x11d   : > { %8372 = vmatprep.mubr.msk.bf16.mxu0 %vm452_vm3, %v10155_v60 }
 0x11e   : > { %8457 = vmatmul.mubr.msk.bf16.gmra.mrb[12].mxu1 %vm452_vm3, %v10257_v43 }
 0x11f   : > { %8462 = vmatprep.mubr.msk.bf16.mxu1 %vm452_vm3, %v10264_v39 }
 0x124   : > { %8373 = vmatmul.mubr.msk.bf16.vlgmr.msra.gmra.mrb[8].mxu0 %vm452_vm3, %v10167_v7 }
 0x125   : > { %8381 = vmatpush3.bf16.msra.mxu0 %v9959_v11  ;;  %8376 = vmatprep.mubr.msk.bf16.mxu0 %vm452_vm3, %v10173_v15 }
 0x126   : > { %8463 = vmatmul.mubr.msk.bf16.vlgmr.msra.gmra.mrb[8].mxu1 %vm452_vm3, %v10276_v40  ;;  %8480 = vmatprep.subr.bf16.mxu0 %v9640_v5 }
 0x127   : > { %8471 = vmatpush3.bf16.msra.mxu1 %v9959_v11  ;;  %8466 = vmatprep.mubr.msk.bf16.mxu1 %vm452_vm3, %v10282_v55 }
 0x128   : > { %8570 = vmatprep.subr.bf16.mxu1 %v9640_v5 }
 0x12c   : > { %8377 = vmatmul.mubr.msk.bf16.gmra.mrb[12].mxu0 %vm452_vm3, %v10188_v21 }
 0x12d   : > { %8382 = vmatprep.mubr.msk.bf16.mxu0 %vm452_vm3, %v10193_v22 }
 0x12e   : > { %8467 = vmatmul.mubr.msk.bf16.gmra.mrb[12].mxu1 %vm452_vm3, %v10297_v63 }
 0x12f   : > { %8472 = vmatprep.mubr.msk.bf16.mxu1 %vm452_vm3, %v10302_v1 }
 0x134   : > { %8383 = vmatmul.mubr.msk.bf16.vlgmr.msra.gmra.mrb[8].mxu0 %vm452_vm3, %v10204_v25 }
 0x135   : > { %8481 = vmatpush3.bf16.msra.mxu0 %v9640_v5  ;;  %8386 = vmatprep.mubr.msk.bf16.mxu0 %vm452_vm3, %v10209_v26 }
 0x136   : > { %8473 = vmatmul.mubr.msk.bf16.vlgmr.msra.gmra.mrb[8].mxu1 %vm452_vm3, %v10313_v9  ;;  %8490 = vmatprep.subr.bf16.mxu0 %v9644_v6 }
 0x137   : > { %8571 = vmatpush3.bf16.msra.mxu1 %v9640_v5  ;;  %8476 = vmatprep.mubr.msk.bf16.mxu1 %vm452_vm3, %v10318_v10 }
 0x138   : > { %8580 = vmatprep.subr.bf16.mxu1 %v9644_v6 }
 0x13c   : > { %8387 = vmatmul.mubr.msk.bf16.gmra.mrb[12].mxu0 %vm452_vm3, %v10222_v29 }
 0x13d   : > { %8482 = vmatprep.mubr.msk.bf16.mxu0 %vm452_vm3, %v10155_v60 }
 0x13e   : > { %8477 = vmatmul.mubr.msk.bf16.gmra.mrb[12].mxu1 %vm452_vm3, %v10331_v12 }
 0x13f   : > { %8572 = vmatprep.mubr.msk.bf16.mxu1 %vm452_vm3, %v10264_v39 }
 0x144   : > { %8483 = vmatmul.mubr.msk.bf16.vlgmr.msra.gmra.mrb[16].mxu0 %vm452_vm3, %v10167_v7 }
 0x145   : > { %8491 = vmatpush3.bf16.msra.mxu0 %v9644_v6  ;;  %8486 = vmatprep.mubr.msk.bf16.mxu0 %vm452_vm3, %v10173_v15  ;;  %v10411_v15 = vld [vmem:[%s9653_s12 + $0xe8] sm:$0xff]  }
 0x146   : > { %8573 = vmatmul.mubr.msk.bf16.vlgmr.msra.gmra.mrb[16].mxu1 %vm452_vm3, %v10276_v40  ;;  %8500 = vmatprep.subr.bf16.mxu0 %v9694_v35  ;;  %v4133_v17 = vshll.u32 %v10411_v15, 16  ;;  %v4137_v36 = vshrl.u32 %v10411_v15, 16 }
 0x147   : > { %8581 = vmatpush3.bf16.msra.mxu1 %v9644_v6  ;;  %8576 = vmatprep.mubr.msk.bf16.mxu1 %vm452_vm3, %v10282_v55 }
 0x148   : > { %8590 = vmatprep.subr.bf16.mxu1 %v9694_v35  ;;  %v4135_v28 = vrot.slane %v4133_v17, 1 }
 0x14c   : > { %8487 = vmatmul.mubr.msk.bf16.gmra.mrb[20].mxu0 %vm452_vm3, %v10188_v21 }
 0x14d   : > { %8492 = vmatprep.mubr.msk.bf16.mxu0 %vm452_vm3, %v10116_v27  ;;  %v10394_v27 = vld [vmem:[%s9653_s12 + $0xd8] sm:$0xff]  }
 0x14e   : > { %8577 = vmatmul.mubr.msk.bf16.gmra.mrb[20].mxu1 %vm452_vm3, %v10297_v63 }
 0x14f   : > { %8582 = vmatprep.mubr.msk.bf16.mxu1 %vm452_vm3, %v10225_v13 }
 0x154   : > { %8493 = vmatmul.mubr.msk.bf16.vlgmr.msra.gmra.mrb[16].mxu0 %vm452_vm3, %v10128_v32  ;;  %v4122_v32 = vshll.u32 %v10394_v27, 16 }
 0x155   : > { %8501 = vmatpush3.bf16.msra.mxu0 %v9694_v35  ;;  %8496 = vmatprep.mubr.msk.bf16.mxu0 %vm452_vm3, %v10131_v37  ;;  %v10406_v37 = vld [vmem:[%s9653_s12 + $0xe0] sm:$0xff]  }
 0x156   : > { %8583 = vmatmul.mubr.msk.bf16.vlgmr.msra.gmra.mrb[16].mxu1 %vm452_vm3, %v10237_v34  ;;  %8510 = vmatprep.subr.bf16.mxu0 %v9751_v0  ;;  %v4124_v60 = vrot.slane %v4122_v32, 1  ;;  %v4126_v7 = vshll.u32 %v10406_v37, 16 }
 0x157   : > { %8591 = vmatpush3.bf16.msra.mxu1 %v9694_v35  ;;  %8586 = vmatprep.mubr.msk.bf16.mxu1 %vm452_vm3, %v10240_v14 }
 0x158   : > { %8600 = vmatprep.subr.bf16.mxu1 %v9751_v0  ;;  %v4128_v21 = vrot.slane %v4126_v7, 1 }
 0x15c   : > { %8497 = vmatmul.mubr.msk.bf16.gmra.mrb[20].mxu0 %vm452_vm3, %v10148_v57  ;;  %v4120_v57 = vshrl.u32 %v10394_v27, 16 }
 0x15d   : > { %8502 = vmatprep.mubr.msk.bf16.mxu0 %vm452_vm3, %v10193_v22  ;;  %v4130_v22 = vshrl.u32 %v10406_v37, 16 }
 0x15e   : > { %8587 = vmatmul.mubr.msk.bf16.gmra.mrb[20].mxu1 %vm452_vm3, %v10257_v43  ;;  %v4125_v18 = vor.u32 %v4124_v60, %v4120_v57  ;;  %v4148_v57 = vshll.u32 %v10448_v38, 16 }
 0x15f   : > { %8592 = vmatprep.mubr.msk.bf16.mxu1 %vm452_vm3, %v10302_v1 }
 0x164   : > { %8503 = vmatmul.mubr.msk.bf16.vlgmr.msra.gmra.mrb[16].mxu0 %vm452_vm3, %v10204_v25 }
 0x165   : > { %8511 = vmatpush3.bf16.msra.mxu0 %v9751_v0  ;;  %8506 = vmatprep.mubr.msk.bf16.mxu0 %vm452_vm3, %v10209_v26 }
 0x166   : > { %8593 = vmatmul.mubr.msk.bf16.vlgmr.msra.gmra.mrb[16].mxu1 %vm452_vm3, %v10313_v9  ;;  %8520 = vmatprep.subr.bf16.mxu0 %v9790_v20 }
 0x167   : > { %8601 = vmatpush3.bf16.msra.mxu1 %v9751_v0  ;;  %8596 = vmatprep.mubr.msk.bf16.mxu1 %vm452_vm3, %v10318_v10 }
 0x168   : > { %8610 = vmatprep.subr.bf16.mxu1 %v9790_v20 }
 0x16c   : > { %8507 = vmatmul.mubr.msk.bf16.gmra.mrb[20].mxu0 %vm452_vm3, %v10222_v29 }
 0x16d   : > { %8512 = vmatprep.mubr.msk.bf16.mxu0 %vm452_vm3, %v10225_v13 }
 0x16e   : > { %8597 = vmatmul.mubr.msk.bf16.gmra.mrb[20].mxu1 %vm452_vm3, %v10331_v12 }
 0x16f   : > { %8602 = vmatprep.mubr.msk.bf16.mxu1 %vm452_vm3, %v10394_v27 }
 0x174   : > { %8513 = vmatmul.mubr.msk.bf16.vlgmr.msra.gmra.mrb[16].mxu0 %vm452_vm3, %v10237_v34  ;;  %v10444_v34 = vsel %vm415_vm2, %v4125_v18, %v4128_v21  ;;  %v4139_v18 = vor.u32 %v4137_v36, %v4135_v28 }
 0x175   : > { %8521 = vmatpush3.bf16.msra.mxu0 %v9790_v20  ;;  %8516 = vmatprep.mubr.msk.bf16.mxu0 %vm452_vm3, %v10240_v14  ;;  %v4132_v14 = vor.u32 %v4130_v22, %v4128_v21 }
 0x176   : > { %8603 = vmatmul.mubr.msk.bf16.vlgmr.msra.gmra.mrb[16].mxu1 %vm452_vm3, %v10406_v37  ;;  %8530 = vmatprep.subr.bf16.mxu0 %v9832_v31 }
 0x177   : > { %8611 = vmatpush3.bf16.msra.mxu1 %v9790_v20  ;;  %v8204_v24 = vpop.f32.mrb[0].mxu0  ;;  %8606 = vmatprep.mubr.msk.bf16.mxu1 %vm452_vm3, %v10411_v15 }
 0x178   : > { %v6563_v25 = vadd.f32 %v8204_v24, %v10424_v3  ;;  %v1328_v26 = vpop.f32.mrb[1].mxu0  ;;  %8620 = vmatprep.subr.bf16.mxu1 %v9832_v31 }
 0x179   : > { %v8294_v29 = vpop.f32.mrb[0].mxu1  ;;  %v6561_v13 = vadd.f32 %v10424_v3, %v1328_v26  ;;  %v8205_v33 = vpop.f32.mrb[2].mxu0 }
 0x17a   : > { %v6571_v19 = vmax.f32 %v6563_v25, 0.0  ;;  %v6620_v41 = vadd.f32 %v8294_v29, %v10424_v3  ;;  %v2069_v42 = vpop.f32.mrb[1].mxu1  ;;  %v6564_v44 = vadd.f32 %v8205_v33, %v10424_v3  ;;  %v1331_v47 = vpop.f32.mrb[3].mxu0  ;;  %v4146_v33 = vor.u32 %v4144_v46, %v4142_v48 }
 0x17b   : > { %v6569_v49 = vmax.f32 %v6561_v13, 0.0  ;;  %v6618_v51 = vadd.f32 %v10424_v3, %v2069_v42  ;;  %v8295_v52 = vpop.f32.mrb[2].mxu1  ;;  %v6562_v54 = vadd.f32 %v10424_v3, %v1331_v47  ;;  %v10488_v13 = vsel %vm415_vm2, %v4132_v14, %v4135_v28 }
 0x17c   : > { %v7696_v30 = vpack.c.bf16 %v6571_v19, %v6571_v19  ;;  %v6628_v45 = vmax.f32 %v6620_v41, 0.0  ;;  %v6572_v53 = vmax.f32 %v6564_v44, 0.0  ;;  %v6621_v56 = vadd.f32 %v8295_v52, %v10424_v3  ;;  %v2072_v58 = vpop.f32.mrb[3].mxu1  ;;  %8517 = vmatmul.mubr.msk.bf16.gmra.mrb[20].mxu0 %vm452_vm3, %v10257_v43 }
 0x17d   : > { %v7694_v59 = vpack.c.bf16 %v6569_v49, %v6569_v49  ;;  %v6626_v61 = vmax.f32 %v6618_v51, 0.0  ;;  %v6570_v2 = vmax.f32 %v6562_v54, 0.0  ;;  %v6619_v4 = vadd.f32 %v10424_v3, %v2072_v58  ;;  %8522 = vmatprep.mubr.msk.bf16.mxu0 %vm452_vm3, %v10264_v39 }
 0x17e   : > { %6612 = vst.msk [vmem:[%s10463_s26 + $0x8] sm:$0xf] %vm6609_vm5, %v7696_v30  ;;  %v7704_v8 = vpack.c.bf16 %v6628_v45, %v6628_v45  ;;  %v7697_v32 = vpack.c.bf16 %v6572_v53, %v6572_v53  ;;  %v6629_v43 = vmax.f32 %v6621_v56, 0.0  ;;  %8607 = vmatmul.mubr.msk.bf16.gmra.mrb[20].mxu1 %vm452_vm3, %v10416_v16  ;;  %v4150_v47 = vrot.slane %v4148_v57, 1 }
 0x17f   : > { %6610 = vst.msk [vmem:[%s10463_s26] sm:$0xf] %vm6609_vm5, %v7694_v59  ;;  %v7702_v39 = vpack.c.bf16 %v6626_v61, %v6626_v61  ;;  %v7695_v60 = vpack.c.bf16 %v6570_v2, %v6570_v2  ;;  %v6627_v7 = vmax.f32 %v6619_v4, 0.0  ;;  %v8208_v17 = vpop.f32.mrb[4].mxu0  ;;  %8612 = vmatprep.mubr.msk.bf16.mxu1 %vm452_vm3, %v10444_v34  ;;  %v10504_v52 = vsel %vm415_vm2, %v4139_v18, %v4142_v48 }
 0x180   : > { %7584 = vst.msk [vmem:[%s10463_s26 + $0x28] sm:$0xf] %vm6609_vm5, %v7704_v8  ;;  %6613 = vst.msk [vmem:[%s10463_s26 + $0xc] sm:$0xf] %vm6609_vm5, %v7697_v32  ;;  %v7705_v21 = vpack.c.bf16 %v6629_v43, %v6629_v43  ;;  %v6567_v22 = vadd.f32 %v8208_v17, %v10424_v3  ;;  %v1344_v23 = vpop.f32.mrb[5].mxu0  ;;  %v4238_v43 = vrot.slane %v10406_v37, 1 }
 0x181   : > { %7582 = vst.msk [vmem:[%s10463_s26 + $0x20] sm:$0xf] %vm6609_vm5, %v7702_v39  ;;  %6611 = vst.msk [vmem:[%s10463_s26 + $0x4] sm:$0xf] %vm6609_vm5, %v7695_v60  ;;  %v7703_v24 = vpack.c.bf16 %v6627_v7, %v6627_v7  ;;  %v8298_v25 = vpop.f32.mrb[4].mxu1  ;;  %v6565_v26 = vadd.f32 %v10424_v3, %v1344_v23  ;;  %v8209_v29 = vpop.f32.mrb[6].mxu0  ;;  %v10539_v60 = vsel %vm415_vm2, %v4146_v33, %v4150_v47 }
 0x182   : > { %7585 = vst.msk [vmem:[%s10463_s26 + $0x2c] sm:$0xf] %vm6609_vm5, %v7705_v21  ;;  %v6575_v36 = vmax.f32 %v6567_v22, 0.0  ;;  %v6624_v19 = vadd.f32 %v8298_v25, %v10424_v3  ;;  %v2085_v41 = vpop.f32.mrb[5].mxu1  ;;  %v6568_v42 = vadd.f32 %v8209_v29, %v10424_v3  ;;  %v1347_v44 = vpop.f32.mrb[7].mxu0  ;;  %v4240_v17 = vrot.slane %v10411_v15, 1 }
 0x183   : > { %7583 = vst.msk [vmem:[%s10463_s26 + $0x24] sm:$0xf] %vm6609_vm5, %v7703_v24  ;;  %v6573_v28 = vmax.f32 %v6565_v26, 0.0  ;;  %v6622_v14 = vadd.f32 %v10424_v3, %v2085_v41  ;;  %v8299_v49 = vpop.f32.mrb[6].mxu1  ;;  %v6566_v51 = vadd.f32 %v10424_v3, %v1347_v44  ;;  %v4242_v18 = vrot.slane %v10416_v16, 1  ;;  %v10577_v22 = vld [vmem:[%s9653_s12 + $0xfc] sm:$0xff]  }
 0x184   : > { %v7700_v54 = vpack.c.bf16 %v6575_v36, %v6575_v36  ;;  %v6632_v46 = vmax.f32 %v6624_v19, 0.0  ;;  %v6576_v30 = vmax.f32 %v6568_v42, 0.0  ;;  %v6625_v45 = vadd.f32 %v8299_v49, %v10424_v3  ;;  %v2088_v53 = vpop.f32.mrb[7].mxu1  ;;  %8523 = vmatmul.mubr.msk.bf16.vlgmr.msra.gmra.mrb[16].mxu0 %vm452_vm3, %v10276_v40  ;;  %v10592_v23 = vld [vmem:[%s9653_s12 + $0x10c] sm:$0xff]   ;;  %v10609_v33 = vld [vmem:[%s9653_s12 + $0x114] sm:$0xff]  }
 0x185   : > { %v7698_v56 = vpack.c.bf16 %v6573_v28, %v6573_v28  ;;  %v6630_v58 = vmax.f32 %v6622_v14, 0.0  ;;  %v6574_v59 = vmax.f32 %v6566_v51, 0.0  ;;  %v6623_v61 = vadd.f32 %v10424_v3, %v2088_v53  ;;  %8531 = vmatpush3.bf16.msra.mxu0 %v9832_v31  ;;  %8526 = vmatprep.mubr.msk.bf16.mxu0 %vm452_vm3, %v10282_v55  ;;  %v9451_v14 = vld [vmem:[%s9653_s12 + $0x11c] ss:$0 sps:$4 sm:$0x11]  }
 0x186   : > { %6616 = vst.msk [vmem:[%s10463_s26 + $0x18] sm:$0xf] %vm6609_vm5, %v7700_v54  ;;  %v7708_v48 = vpack.c.bf16 %v6632_v46, %v6632_v46  ;;  %v7701_v2 = vpack.c.bf16 %v6576_v30, %v6576_v30  ;;  %v6633_v4 = vmax.f32 %v6625_v45, 0.0  ;;  %8613 = vmatmul.mubr.msk.bf16.vlgmr.msra.gmra.mrb[16].mxu1 %vm452_vm3, %v10488_v13  ;;  %8540 = vmatprep.subr.bf16.mxu0 %v9874_v50  ;;  %v4237_v40 = vrot.slane %v10394_v27, 1 }
 0x187   : > { %6614 = vst.msk [vmem:[%s10463_s26 + $0x10] sm:$0xf] %vm6609_vm5, %v7698_v56  ;;  %v7706_v55 = vpack.c.bf16 %v6630_v58, %v6630_v58  ;;  %v7699_v8 = vpack.c.bf16 %v6574_v59, %v6574_v59  ;;  %v6631_v32 = vmax.f32 %v6623_v61, 0.0  ;;  %8621 = vmatpush3.bf16.msra.mxu1 %v9832_v31  ;;  %8616 = vmatprep.mubr.msk.bf16.mxu1 %vm452_vm3, %v10504_v52  ;;  %v4874_v36 = vshll.u32 %v10592_v23, 16 }
 0x188   : > { %7588 = vst.msk [vmem:[%s10463_s26 + $0x38] sm:$0xf] %vm6609_vm5, %v7708_v48  ;;  %6617 = vst.msk [vmem:[%s10463_s26 + $0x1c] sm:$0xf] %vm6609_vm5, %v7701_v2  ;;  %v7709_v57 = vpack.c.bf16 %v6633_v4, %v6633_v4  ;;  %8630 = vmatprep.subr.bf16.mxu1 %v9874_v50  ;;  %v10544_v7 = vsel %vm613_vm4, %v4237_v40, %v4238_v43  ;;  %v10555_v21 = vsel %vm613_vm4, %v4238_v43, %v4240_v17 }
 0x189   : > { %7586 = vst.msk [vmem:[%s10463_s26 + $0x30] sm:$0xf] %vm6609_vm5, %v7706_v55  ;;  %6615 = vst.msk [vmem:[%s10463_s26 + $0x14] sm:$0xf] %vm6609_vm5, %v7699_v8  ;;  %v7707_v39 = vpack.c.bf16 %v6631_v32, %v6631_v32  ;;  %v4878_v42 = vshrl.u32 %v10592_v23, 16  ;;  %v4881_v44 = vshll.u32 %v10609_v33, 16 }
 0x18a   : > { %7589 = vst.msk [vmem:[%s10463_s26 + $0x3c] sm:$0xf] %vm6609_vm5, %v7709_v57  ;;  %v4876_v47 = vrot.slane %v4874_v36, 1  ;;  %v4885_v46 = vshrl.u32 %v10609_v33, 16  ;;  %v4889_v30 = vshll.u32 %v9451_v14, 16  ;;  %v4978_v58 = vrot.slane %v10577_v22, 1 }
 0x18b   : > { %7587 = vst.msk [vmem:[%s10463_s26 + $0x34] sm:$0xf] %vm6609_vm5, %v7707_v39  ;;  %v4883_v51 = vrot.slane %v4881_v44, 1  ;;  %v4981_v2 = vrot.slane %v10592_v23, 1  ;;  %v4983_v4 = vrot.slane %v10609_v33, 1  ;;  %v4985_v8 = vrot.slane %v9451_v14, 1 }
 0x18c   : > { %8527 = vmatmul.mubr.msk.bf16.gmra.mrb[20].mxu0 %vm452_vm3, %v10297_v63  ;;  %v10560_v63 = vsel %vm613_vm4, %v4240_v17, %v4242_v18  ;;  %v4880_v49 = vor.u32 %v4878_v42, %v4876_v47  ;;  %v4891_v56 = vrot.slane %v4889_v30, 1 }
 0x18d   : > { %8532 = vmatprep.mubr.msk.bf16.mxu0 %vm452_vm3, %v10302_v1  ;;  %v4244_v1 = vrot.slane %v10448_v38, 1  ;;  %v10589_v38 = vld [vmem:[%s9653_s12 + $0x104] sm:$0xff]   ;;  %v4887_v53 = vor.u32 %v4885_v46, %v4883_v51  ;;  %v10670_v55 = vsel %vm613_vm4, %v4981_v2, %v4983_v4  ;;  %v10683_v32 = vsel %vm613_vm4, %v4983_v4, %v4985_v8 }
 0x18e   : > { %8617 = vmatmul.mubr.msk.bf16.gmra.mrb[20].mxu1 %vm452_vm3, %v10539_v60  ;;  %v4867_v25 = vshll.u32 %v10589_v38, 16  ;;  %v4871_v19 = vshrl.u32 %v10589_v38, 16  ;;  %v10634_v45 = vsel %vm415_vm2, %v4880_v49, %v4883_v51  ;;  %v4979_v59 = vrot.slane %v10589_v38, 1 }
 0x18f   : > { %8622 = vmatprep.mubr.msk.bf16.mxu1 %vm452_vm3, %v10544_v7  ;;  %v10649_v61 = vsel %vm415_vm2, %v4887_v53, %v4891_v56  ;;  %v10804_v56 = vld [vmem:[%s10497_s6 + $0x20] ss:$0 sps:$4 sm:$0x11]  }
 0x190   : > { %v4869_v29 = vrot.slane %v4867_v25, 1  ;;  %v10654_v48 = vsel %vm613_vm4, %v4978_v58, %v4979_v59  ;;  %v10665_v40 = vsel %vm613_vm4, %v4979_v59, %v4981_v2 }
 0x192   : > { %v4873_v28 = vor.u32 %v4871_v19, %v4869_v29 }
 0x194   : > { %8533 = vmatmul.mubr.msk.bf16.vlgmr.msra.gmra.mrb[16].mxu0 %vm452_vm3, %v10313_v9  ;;  %v10574_v9 = vsel %vm613_vm4, %v4242_v18, %v4244_v1  ;;  %v10628_v54 = vsel %vm415_vm2, %v4873_v28, %v4876_v47 }
 0x195   : > { %8541 = vmatpush3.bf16.msra.mxu0 %v9874_v50  ;;  %8536 = vmatprep.mubr.msk.bf16.mxu0 %vm452_vm3, %v10318_v10  ;;  %v4863_v10 = vshll.u32 %v10577_v22, 16 }
 0x196   : > { %8623 = vmatmul.mubr.msk.bf16.vlgmr.msra.gmra.mrb[16].mxu1 %vm452_vm3, %v10555_v21  ;;  %8550 = vmatprep.subr.bf16.mxu0 %v9917_v62 }
 0x197   : > { %8631 = vmatpush3.bf16.msra.mxu1 %v9874_v50  ;;  %8626 = vmatprep.mubr.msk.bf16.mxu1 %vm452_vm3, %v10560_v63  ;;  %v4865_v24 = vrot.slane %v4863_v10, 1 }
 0x198   : > { %8640 = vmatprep.subr.bf16.mxu1 %v9917_v62 }
 0x19c   : > { %8537 = vmatmul.mubr.msk.bf16.gmra.mrb[20].mxu0 %vm452_vm3, %v10331_v12  ;;  %v4861_v12 = vshrl.u32 %v10577_v22, 16 }
 0x19d   : > { %8542 = vmatprep.mubr.msk.bf16.mxu0 %vm452_vm3, %v10394_v27 }
 0x19e   : > { %8627 = vmatmul.mubr.msk.bf16.gmra.mrb[20].mxu1 %vm452_vm3, %v10574_v9  ;;  %v4866_v26 = vor.u32 %v4865_v24, %v4861_v12 }
 0x19f   : > { %8632 = vmatprep.mubr.msk.bf16.mxu1 %vm452_vm3, %v10577_v22 }
 0x1a0   : > { %v10616_v41 = vsel %vm415_vm2, %v4866_v26, %v4869_v29 }
 0x1a4   : > { %8543 = vmatmul.mubr.msk.bf16.vlgmr.msra.gmra.mrb[16].mxu0 %vm452_vm3, %v10406_v37 }
 0x1a5   : > { %8551 = vmatpush3.bf16.msra.mxu0 %v9917_v62  ;;  %8546 = vmatprep.mubr.msk.bf16.mxu0 %vm452_vm3, %v10411_v15 }
 0x1a6   : > { %8633 = vmatmul.mubr.msk.bf16.vlgmr.msra.gmra.mrb[16].mxu1 %vm452_vm3, %v10589_v38  ;;  %8560 = vmatprep.subr.bf16.mxu0 %v9959_v11 }
 0x1a7   : > { %8641 = vmatpush3.bf16.msra.mxu1 %v9917_v62  ;;  %8636 = vmatprep.mubr.msk.bf16.mxu1 %vm452_vm3, %v10592_v23 }
 0x1a8   : > { %8650 = vmatprep.subr.bf16.mxu1 %v9959_v11 }
 0x1ac   : > { %8547 = vmatmul.mubr.msk.bf16.gmra.mrb[20].mxu0 %vm452_vm3, %v10416_v16 }
 0x1ad   : > { %8552 = vmatprep.mubr.msk.bf16.mxu0 %vm452_vm3, %v10444_v34 }
 0x1ae   : > { %8637 = vmatmul.mubr.msk.bf16.gmra.mrb[20].mxu1 %vm452_vm3, %v10609_v33 }
 0x1af   : > { %8642 = vmatprep.mubr.msk.bf16.mxu1 %vm452_vm3, %v10616_v41 }
 0x1b4   : > { %8553 = vmatmul.mubr.msk.bf16.vlgmr.msra.gmra.mrb[16].mxu0 %vm452_vm3, %v10488_v13 }
 0x1b5   : > { %8561 = vmatpush3.bf16.msra.mxu0 %v9959_v11  ;;  %8556 = vmatprep.mubr.msk.bf16.mxu0 %vm452_vm3, %v10504_v52 }
 0x1b6   : > { %8643 = vmatmul.mubr.msk.bf16.vlgmr.msra.gmra.mrb[16].mxu1 %vm452_vm3, %v10628_v54  ;;  %8660 = vmatprep.subr.bf16.mxu0 %v9640_v5 }
 0x1b7   : > { %8651 = vmatpush3.bf16.msra.mxu1 %v9959_v11  ;;  %8646 = vmatprep.mubr.msk.bf16.mxu1 %vm452_vm3, %v10634_v45 }
 0x1b8   : > { %8750 = vmatprep.subr.bf16.mxu1 %v9640_v5 }
 0x1bc   : > { %8557 = vmatmul.mubr.msk.bf16.gmra.mrb[20].mxu0 %vm452_vm3, %v10539_v60 }
 0x1bd   : > { %8562 = vmatprep.mubr.msk.bf16.mxu0 %vm452_vm3, %v10544_v7 }
 0x1be   : > { %8647 = vmatmul.mubr.msk.bf16.gmra.mrb[20].mxu1 %vm452_vm3, %v10649_v61 }
 0x1bf   : > { %8652 = vmatprep.mubr.msk.bf16.mxu1 %vm452_vm3, %v10654_v48 }
 0x1c4   : > { %8563 = vmatmul.mubr.msk.bf16.vlgmr.msra.gmra.mrb[16].mxu0 %vm452_vm3, %v10555_v21 }
 0x1c5   : > { %8661 = vmatpush3.bf16.msra.mxu0 %v9640_v5  ;;  %8566 = vmatprep.mubr.msk.bf16.mxu0 %vm452_vm3, %v10560_v63 }
 0x1c6   : > { %8653 = vmatmul.mubr.msk.bf16.vlgmr.msra.gmra.mrb[16].mxu1 %vm452_vm3, %v10665_v40  ;;  %8670 = vmatprep.subr.bf16.mxu0 %v9644_v6 }
 0x1c7   : > { %8751 = vmatpush3.bf16.msra.mxu1 %v9640_v5  ;;  %8656 = vmatprep.mubr.msk.bf16.mxu1 %vm452_vm3, %v10670_v55  ;;  %v10746_v5 = vld [vmem:[%s10497_s6] sm:$0xff]  }
 0x1c8   : > { %8760 = vmatprep.subr.bf16.mxu1 %v9644_v6 }
 0x1cc   : > { %8567 = vmatmul.mubr.msk.bf16.gmra.mrb[20].mxu0 %vm452_vm3, %v10574_v9 }
 0x1cd   : > { %8662 = vmatprep.mubr.msk.bf16.mxu0 %vm452_vm3, %v10444_v34 }
 0x1ce   : > { %8657 = vmatmul.mubr.msk.bf16.gmra.mrb[20].mxu1 %vm452_vm3, %v10683_v32 }
 0x1cf   : > { %8752 = vmatprep.mubr.msk.bf16.mxu1 %vm452_vm3, %v10616_v41 }
 0x1d4   : > { %8663 = vmatmul.mubr.msk.bf16.vlgmr.msra.gmra.mrb[24].mxu0 %vm452_vm3, %v10488_v13 }
 0x1d5   : > { %8671 = vmatpush3.bf16.msra.mxu0 %v9644_v6  ;;  %8666 = vmatprep.mubr.msk.bf16.mxu0 %vm452_vm3, %v10504_v52 }
 0x1d6   : > { %8753 = vmatmul.mubr.msk.bf16.vlgmr.msra.gmra.mrb[24].mxu1 %vm452_vm3, %v10628_v54  ;;  %8680 = vmatprep.subr.bf16.mxu0 %v9694_v35 }
 0x1d7   : > { %8761 = vmatpush3.bf16.msra.mxu1 %v9644_v6  ;;  %8756 = vmatprep.mubr.msk.bf16.mxu1 %vm452_vm3, %v10634_v45  ;;  %v5604_v6 = vshll.u32 %v10746_v5, 16 }
 0x1d8   : > { %8770 = vmatprep.subr.bf16.mxu1 %v9694_v35 }
 0x1dc   : > { %8667 = vmatmul.mubr.msk.bf16.gmra.mrb[28].mxu0 %vm452_vm3, %v10539_v60  ;;  %v10780_v60 = vld [vmem:[%s10497_s6 + $0x18] sm:$0xff]  }
 0x1dd   : > { %8672 = vmatprep.mubr.msk.bf16.mxu0 %vm452_vm3, %v10394_v27  ;;  %v5606_v27 = vrot.slane %v5604_v6, 1 }
 0x1de   : > { %8757 = vmatmul.mubr.msk.bf16.gmra.mrb[28].mxu1 %vm452_vm3, %v10649_v61 }
 0x1df   : > { %8762 = vmatprep.mubr.msk.bf16.mxu1 %vm452_vm3, %v10577_v22 }
 0x1e4   : > { %8673 = vmatmul.mubr.msk.bf16.vlgmr.msra.gmra.mrb[24].mxu0 %vm452_vm3, %v10406_v37 }
 0x1e5   : > { %8681 = vmatpush3.bf16.msra.mxu0 %v9694_v35  ;;  %8676 = vmatprep.mubr.msk.bf16.mxu0 %vm452_vm3, %v10411_v15  ;;  %v10763_v15 = vld [vmem:[%s10497_s6 + $0x10] sm:$0xff]  }
 0x1e6   : > { %8763 = vmatmul.mubr.msk.bf16.vlgmr.msra.gmra.mrb[24].mxu1 %vm452_vm3, %v10589_v38  ;;  %8690 = vmatprep.subr.bf16.mxu0 %v9751_v0  ;;  %v5615_v52 = vshll.u32 %v10763_v15, 16  ;;  %v5619_v29 = vshrl.u32 %v10763_v15, 16 }
 0x1e7   : > { %8771 = vmatpush3.bf16.msra.mxu1 %v9694_v35  ;;  %8766 = vmatprep.mubr.msk.bf16.mxu1 %vm452_vm3, %v10592_v23  ;;  %v10758_v35 = vld [vmem:[%s10497_s6 + $0x8] sm:$0xff]  }
 0x1e8   : > { %8780 = vmatprep.subr.bf16.mxu1 %v9751_v0  ;;  %v5608_v37 = vshll.u32 %v10758_v35, 16  ;;  %v5612_v13 = vshrl.u32 %v10758_v35, 16 }
 0x1ea   : > { %v5610_v34 = vrot.slane %v5608_v37, 1 }
 0x1ec   : > { %8677 = vmatmul.mubr.msk.bf16.gmra.mrb[28].mxu0 %vm452_vm3, %v10416_v16 }
 0x1ed   : > { %8682 = vmatprep.mubr.msk.bf16.mxu0 %vm452_vm3, %v10544_v7 }
 0x1ee   : > { %8767 = vmatmul.mubr.msk.bf16.gmra.mrb[28].mxu1 %vm452_vm3, %v10609_v33 }
 0x1ef   : > { %8772 = vmatprep.mubr.msk.bf16.mxu1 %vm452_vm3, %v10654_v48 }
 0x1f4   : > { %8683 = vmatmul.mubr.msk.bf16.vlgmr.msra.gmra.mrb[24].mxu0 %vm452_vm3, %v10555_v21 }
 0x1f5   : > { %8691 = vmatpush3.bf16.msra.mxu0 %v9751_v0  ;;  %8686 = vmatprep.mubr.msk.bf16.mxu0 %vm452_vm3, %v10560_v63  ;;  %v5614_v63 = vor.u32 %v5612_v13, %v5610_v34 }
 0x1f6   : > { %8773 = vmatmul.mubr.msk.bf16.vlgmr.msra.gmra.mrb[24].mxu1 %vm452_vm3, %v10665_v40  ;;  %8700 = vmatprep.subr.bf16.mxu0 %v9790_v20 }
 0x1f7   : > { %8781 = vmatpush3.bf16.msra.mxu1 %v9751_v0  ;;  %8776 = vmatprep.mubr.msk.bf16.mxu1 %vm452_vm3, %v10670_v55  ;;  %v5602_v0 = vshrl.u32 %v10746_v5, 16 }
 0x1f8   : > { %8790 = vmatprep.subr.bf16.mxu1 %v9790_v20 }
 0x1f9   : > { %v5607_v16 = vor.u32 %v5606_v27, %v5602_v0 }
 0x1fb   : > { %v10785_v21 = vsel %vm415_vm2, %v5607_v16, %v5610_v34 }
 0x1fc   : > { %8687 = vmatmul.mubr.msk.bf16.gmra.mrb[28].mxu0 %vm452_vm3, %v10574_v9 }
 0x1fd   : > { %8692 = vmatprep.mubr.msk.bf16.mxu0 %vm452_vm3, %v10577_v22 }
 0x1fe   : > { %8777 = vmatmul.mubr.msk.bf16.gmra.mrb[28].mxu1 %vm452_vm3, %v10683_v32 }
 0x1ff   : > { %8782 = vmatprep.mubr.msk.bf16.mxu1 %vm452_vm3, %v10746_v5 }
 0x204   : > { %8693 = vmatmul.mubr.msk.bf16.vlgmr.msra.gmra.mrb[24].mxu0 %vm452_vm3, %v10589_v38 }
 0x205   : > { %8701 = vmatpush3.bf16.msra.mxu0 %v9790_v20  ;;  %8696 = vmatprep.mubr.msk.bf16.mxu0 %vm452_vm3, %v10592_v23  ;;  %v5622_v23 = vshll.u32 %v10780_v60, 16 }
 0x206   : > { %8783 = vmatmul.mubr.msk.bf16.vlgmr.msra.gmra.mrb[24].mxu1 %vm452_vm3, %v10758_v35  ;;  %8710 = vmatprep.subr.bf16.mxu0 %v9832_v31 }
 0x207   : > { %8791 = vmatpush3.bf16.msra.mxu1 %v9790_v20  ;;  %v8384_v43 = vpop.f32.mrb[8].mxu0  ;;  %8786 = vmatprep.mubr.msk.bf16.mxu1 %vm452_vm3, %v10763_v15  ;;  %v5617_v20 = vrot.slane %v5615_v52, 1  ;;  %v5626_v52 = vshrl.u32 %v10780_v60, 16 }
 0x208   : > { %v6677_v57 = vadd.f32 %v8384_v43, %v10424_v3  ;;  %v2810_v39 = vpop.f32.mrb[9].mxu0  ;;  %8800 = vmatprep.subr.bf16.mxu1 %v9832_v31 }
 0x209   : > { %v8474_v7 = vpop.f32.mrb[8].mxu1  ;;  %v6675_v17 = vadd.f32 %v10424_v3, %v2810_v39  ;;  %v8385_v18 = vpop.f32.mrb[10].mxu0  ;;  %v5621_v4 = vor.u32 %v5619_v29, %v5617_v20  ;;  %v10821_v13 = vsel %vm415_vm2, %v5614_v63, %v5617_v20 }
 0x20a   : > { %v6685_v1 = vmax.f32 %v6677_v57, 0.0  ;;  %v6734_v9 = vadd.f32 %v8474_v7, %v10424_v3  ;;  %v3551_v22 = vpop.f32.mrb[9].mxu1  ;;  %v6678_v10 = vadd.f32 %v8385_v18, %v10424_v3  ;;  %v2813_v38 = vpop.f32.mrb[11].mxu0  ;;  %v5630_v18 = vshll.u32 %v10804_v56, 16 }
 0x20b   : > { %v6683_v12 = vmax.f32 %v6675_v17, 0.0  ;;  %v6732_v24 = vadd.f32 %v10424_v3, %v3551_v22  ;;  %v8475_v25 = vpop.f32.mrb[10].mxu1  ;;  %v6676_v26 = vadd.f32 %v10424_v3, %v2813_v38 }
 0x20c   : > { %v7712_v36 = vpack.c.bf16 %v6685_v1, %v6685_v1  ;;  %v6742_v19 = vmax.f32 %v6734_v9, 0.0  ;;  %v6686_v42 = vmax.f32 %v6678_v10, 0.0  ;;  %v6735_v44 = vadd.f32 %v8475_v25, %v10424_v3  ;;  %v3554_v47 = vpop.f32.mrb[11].mxu1  ;;  %8697 = vmatmul.mubr.msk.bf16.gmra.mrb[28].mxu0 %vm452_vm3, %v10609_v33 }
 0x20d   : > { %v7710_v28 = vpack.c.bf16 %v6683_v12, %v6683_v12  ;;  %v6740_v14 = vmax.f32 %v6732_v24, 0.0  ;;  %v6684_v49 = vmax.f32 %v6676_v26, 0.0  ;;  %v6733_v51 = vadd.f32 %v10424_v3, %v3554_v47  ;;  %8702 = vmatprep.mubr.msk.bf16.mxu0 %vm452_vm3, %v10616_v41 }
 0x20e   : > { %7600 = vst.msk [vmem:[%s10463_s26 + $0x48] sm:$0xf] %vm6609_vm5, %v7712_v36  ;;  %v7720_v46 = vpack.c.bf16 %v6742_v19, %v6742_v19  ;;  %v7713_v30 = vpack.c.bf16 %v6686_v42, %v6686_v42  ;;  %v6743_v53 = vmax.f32 %v6735_v44, 0.0  ;;  %8787 = vmatmul.mubr.msk.bf16.gmra.mrb[28].mxu1 %vm452_vm3, %v10780_v60  ;;  %v5624_v33 = vrot.slane %v5622_v23, 1 }
 0x20f   : > { %7598 = vst.msk [vmem:[%s10463_s26 + $0x40] sm:$0xf] %vm6609_vm5, %v7710_v28  ;;  %v7718_v58 = vpack.c.bf16 %v6740_v14, %v6740_v14  ;;  %v7711_v59 = vpack.c.bf16 %v6684_v49, %v6684_v49  ;;  %v6741_v2 = vmax.f32 %v6733_v51, 0.0  ;;  %v8388_v41 = vpop.f32.mrb[12].mxu0  ;;  %8792 = vmatprep.mubr.msk.bf16.mxu1 %vm452_vm3, %v10785_v21  ;;  %v5632_v14 = vrot.slane %v5630_v18, 1 }
 0x210   : > { %7616 = vst.msk [vmem:[%s10463_s26 + $0x68] sm:$0xf] %vm6609_vm5, %v7720_v46  ;;  %7601 = vst.msk [vmem:[%s10463_s26 + $0x4c] sm:$0xf] %vm6609_vm5, %v7713_v30  ;;  %v7721_v8 = vpack.c.bf16 %v6743_v53, %v6743_v53  ;;  %v6681_v6 = vadd.f32 %v8388_v41, %v10424_v3  ;;  %v2826_v0 = vpop.f32.mrb[13].mxu0  ;;  %v10834_v22 = vsel %vm415_vm2, %v5621_v4, %v5624_v33  ;;  %v5719_v51 = vrot.slane %v10746_v5, 1 }
 0x211   : > { %7614 = vst.msk [vmem:[%s10463_s26 + $0x60] sm:$0xf] %vm6609_vm5, %v7718_v58  ;;  %7599 = vst.msk [vmem:[%s10463_s26 + $0x44] sm:$0xf] %vm6609_vm5, %v7711_v59  ;;  %v7719_v27 = vpack.c.bf16 %v6741_v2, %v6741_v2  ;;  %v8478_v37 = vpop.f32.mrb[12].mxu1  ;;  %v6679_v16 = vadd.f32 %v10424_v3, %v2826_v0  ;;  %v8389_v34 = vpop.f32.mrb[14].mxu0 }
 0x212   : > { %7617 = vst.msk [vmem:[%s10463_s26 + $0x6c] sm:$0xf] %vm6609_vm5, %v7721_v8  ;;  %v6689_v43 = vmax.f32 %v6681_v6, 0.0  ;;  %v6738_v57 = vadd.f32 %v8478_v37, %v10424_v3  ;;  %v3567_v39 = vpop.f32.mrb[13].mxu1  ;;  %v6682_v7 = vadd.f32 %v8389_v34, %v10424_v3  ;;  %v2829_v17 = vpop.f32.mrb[15].mxu0  ;;  %v5720_v46 = vrot.slane %v10758_v35, 1 }
 0x213   : > { %7615 = vst.msk [vmem:[%s10463_s26 + $0x64] sm:$0xf] %vm6609_vm5, %v7719_v27  ;;  %v6687_v1 = vmax.f32 %v6679_v16, 0.0  ;;  %v6736_v9 = vadd.f32 %v10424_v3, %v3567_v39  ;;  %v8479_v63 = vpop.f32.mrb[14].mxu1  ;;  %v6680_v20 = vadd.f32 %v10424_v3, %v2829_v17  ;;  %v5724_v58 = vrot.slane %v10780_v60, 1  ;;  %v9457_v2 = vld [vmem:[%s10497_s6 + $0x24] sm:$0xff]  }
 0x214   : > { %v7716_v10 = vpack.c.bf16 %v6689_v43, %v6689_v43  ;;  %v6746_v38 = vmax.f32 %v6738_v57, 0.0  ;;  %v6690_v23 = vmax.f32 %v6682_v7, 0.0  ;;  %v6739_v12 = vadd.f32 %v8479_v63, %v10424_v3  ;;  %v3570_v24 = vpop.f32.mrb[15].mxu1  ;;  %8703 = vmatmul.mubr.msk.bf16.vlgmr.msra.gmra.mrb[24].mxu0 %vm452_vm3, %v10628_v54  ;;  %v9461_v34 = vld [vmem:[%s10497_s6 + $0x44] ss:$0 sps:$4 sm:$0x11]  }
 0x215   : > { %v7714_v25 = vpack.c.bf16 %v6687_v1, %v6687_v1  ;;  %v6744_v26 = vmax.f32 %v6736_v9, 0.0  ;;  %v6688_v29 = vmax.f32 %v6680_v20, 0.0  ;;  %v6737_v36 = vadd.f32 %v10424_v3, %v3570_v24  ;;  %8711 = vmatpush3.bf16.msra.mxu0 %v9832_v31  ;;  %8706 = vmatprep.mubr.msk.bf16.mxu0 %vm452_vm3, %v10634_v45 }
 0x216   : > { %7604 = vst.msk [vmem:[%s10463_s26 + $0x58] sm:$0xf] %vm6609_vm5, %v7716_v10  ;;  %v7724_v19 = vpack.c.bf16 %v6746_v38, %v6746_v38  ;;  %v7717_v42 = vpack.c.bf16 %v6690_v23, %v6690_v23  ;;  %v6747_v44 = vmax.f32 %v6739_v12, 0.0  ;;  %8793 = vmatmul.mubr.msk.bf16.vlgmr.msra.gmra.mrb[24].mxu1 %vm452_vm3, %v10821_v13  ;;  %v5628_v54 = vor.u32 %v5626_v52, %v5624_v33 }
 0x217   : > { %8720 = vmatprep.subr.bf16.mxu0 %v9874_v50  ;;  %7602 = vst.msk [vmem:[%s10463_s26 + $0x50] sm:$0xf] %vm6609_vm5, %v7714_v25  ;;  %v7722_v47 = vpack.c.bf16 %v6744_v26, %v6744_v26  ;;  %v7715_v45 = vpack.c.bf16 %v6688_v29, %v6688_v29  ;;  %v6745_v28 = vmax.f32 %v6737_v36, 0.0  ;;  %8801 = vmatpush3.bf16.msra.mxu1 %v9832_v31  ;;  %v5722_v33 = vrot.slane %v10763_v15, 1 }
 0x218   : > { %8796 = vmatprep.mubr.msk.bf16.mxu1 %vm452_vm3, %v10834_v22  ;;  %7620 = vst.msk [vmem:[%s10463_s26 + $0x78] sm:$0xf] %vm6609_vm5, %v7724_v19  ;;  %7605 = vst.msk [vmem:[%s10463_s26 + $0x5c] sm:$0xf] %vm6609_vm5, %v7717_v42  ;;  %v7725_v49 = vpack.c.bf16 %v6747_v44, %v6747_v44  ;;  %8810 = vmatprep.subr.bf16.mxu1 %v9874_v50  ;;  %v10869_v30 = vsel %vm415_vm2, %v5628_v54, %v5632_v14  ;;  %v6343_v41 = vshrl.u32 %v9457_v2, 16 }
 0x219   : > { %7618 = vst.msk [vmem:[%s10463_s26 + $0x70] sm:$0xf] %vm6609_vm5, %v7722_v47  ;;  %7603 = vst.msk [vmem:[%s10463_s26 + $0x54] sm:$0xf] %vm6609_vm5, %v7715_v45  ;;  %v7723_v31 = vpack.c.bf16 %v6745_v28, %v6745_v28  ;;  %v10874_v53 = vsel %vm613_vm4, %v5719_v51, %v5720_v46  ;;  %v10885_v59 = vsel %vm613_vm4, %v5720_v46, %v5722_v33  ;;  %v6460_v18 = vrot.slane %v9457_v2, 1 }
 0x21a   : > { %7621 = vst.msk [vmem:[%s10463_s26 + $0x7c] sm:$0xf] %vm6609_vm5, %v7725_v49  ;;  %v6467_v10 = vrot.slane %v9461_v34, 1 }
 0x21b   : > { %7619 = vst.msk [vmem:[%s10463_s26 + $0x74] sm:$0xf] %vm6609_vm5, %v7723_v31 }
 0x21c   : > { %8707 = vmatmul.mubr.msk.bf16.gmra.mrb[28].mxu0 %vm452_vm3, %v10649_v61  ;;  %v10890_v61 = vsel %vm613_vm4, %v5722_v33, %v5724_v58 }
 0x21d   : > { %8712 = vmatprep.mubr.msk.bf16.mxu0 %vm452_vm3, %v10654_v48  ;;  %v5726_v48 = vrot.slane %v10804_v56, 1  ;;  %v9459_v56 = vld [vmem:[%s10497_s6 + $0x34] sm:$0xff]  }
 0x21e   : > { %8797 = vmatmul.mubr.msk.bf16.gmra.mrb[28].mxu1 %vm452_vm3, %v10869_v30  ;;  %v6356_v6 = vshll.u32 %v9459_v56, 16  ;;  %v6360_v27 = vshrl.u32 %v9459_v56, 16 }
 0x21f   : > { %8802 = vmatprep.mubr.msk.bf16.mxu1 %vm452_vm3, %v10874_v53 }
 0x224   : > { %8713 = vmatmul.mubr.msk.bf16.vlgmr.msra.gmra.mrb[24].mxu0 %vm452_vm3, %v10665_v40  ;;  %v10904_v40 = vsel %vm613_vm4, %v5724_v58, %v5726_v48 }
 0x225   : > { %8721 = vmatpush3.bf16.msra.mxu0 %v9874_v50  ;;  %8716 = vmatprep.mubr.msk.bf16.mxu0 %vm452_vm3, %v10670_v55  ;;  %v9458_v55 = vld [vmem:[%s10497_s6 + $0x2c] sm:$0xff]  }
 0x226   : > { %8803 = vmatmul.mubr.msk.bf16.vlgmr.msra.gmra.mrb[24].mxu1 %vm452_vm3, %v10885_v59  ;;  %8730 = vmatprep.subr.bf16.mxu0 %v9917_v62  ;;  %v6349_v8 = vshll.u32 %v9458_v55, 16  ;;  %v6353_v0 = vshrl.u32 %v9458_v55, 16  ;;  %v6461_v1 = vrot.slane %v9458_v55, 1 }
 0x227   : > { %8811 = vmatpush3.bf16.msra.mxu1 %v9874_v50  ;;  %8806 = vmatprep.mubr.msk.bf16.mxu1 %vm452_vm3, %v10890_v61  ;;  %v6345_v50 = vshll.u32 %v9457_v2, 16 }
 0x228   : > { %8820 = vmatprep.subr.bf16.mxu1 %v9917_v62 }
 0x229   : > { %v6347_v4 = vrot.slane %v6345_v50, 1 }
 0x22c   : > { %8717 = vmatmul.mubr.msk.bf16.gmra.mrb[28].mxu0 %vm452_vm3, %v10683_v32  ;;  %v6348_v32 = vor.u32 %v6347_v4, %v6343_v41 }
 0x22d   : > { %8722 = vmatprep.mubr.msk.bf16.mxu0 %vm452_vm3, %v10746_v5  ;;  %v6351_v5 = vrot.slane %v6349_v8, 1 }
 0x22e   : > { %8807 = vmatmul.mubr.msk.bf16.gmra.mrb[28].mxu1 %vm452_vm3, %v10904_v40 }
 0x22f   : > { %8812 = vmatprep.mubr.msk.bf16.mxu1 %vm452_vm3, %v9457_v2  ;;  %v6355_v16 = vor.u32 %v6353_v0, %v6351_v5 }
 0x234   : > { %8723 = vmatmul.mubr.msk.bf16.vlgmr.msra.gmra.mrb[24].mxu0 %vm452_vm3, %v10758_v35  ;;  %v9460_v35 = vld [vmem:[%s10497_s6 + $0x3c] sm:$0xff]  }
 0x235   : > { %8731 = vmatpush3.bf16.msra.mxu0 %v9917_v62  ;;  %8726 = vmatprep.mubr.msk.bf16.mxu0 %vm452_vm3, %v10763_v15  ;;  %v6352_v15 = vsel %vm415_vm2, %v6348_v32, %v6351_v5  ;;  %v6363_v37 = vshll.u32 %v9460_v35, 16  ;;  %v6367_v39 = vshrl.u32 %v9460_v35, 16  ;;  %v6465_v63 = vrot.slane %v9460_v35, 1 }
 0x236   : > { %8813 = vmatmul.mubr.msk.bf16.vlgmr.msra.gmra.mrb[24].mxu1 %vm452_vm3, %v9458_v55  ;;  %8740 = vmatprep.subr.bf16.mxu0 %v9959_v11 }
 0x237   : > { %8821 = vmatpush3.bf16.msra.mxu1 %v9917_v62  ;;  %8816 = vmatprep.mubr.msk.bf16.mxu1 %vm452_vm3, %v9459_v56  ;;  %v6358_v62 = vrot.slane %v6356_v6, 1  ;;  %v6365_v43 = vrot.slane %v6363_v37, 1  ;;  %v6468_v38 = vsel %vm613_vm4, %v6465_v63, %v6467_v10 }
 0x238   : > { %8830 = vmatprep.subr.bf16.mxu1 %v9959_v11 }
 0x239   : > { %v6362_v52 = vor.u32 %v6360_v27, %v6358_v62  ;;  %v6359_v57 = vsel %vm415_vm2, %v6355_v16, %v6358_v62 }
 0x23b   : > { %v6366_v7 = vsel %vm415_vm2, %v6362_v52, %v6365_v43 }
 0x23c   : > { %8727 = vmatmul.mubr.msk.bf16.gmra.mrb[28].mxu0 %vm452_vm3, %v10780_v60  ;;  %v6371_v60 = vshll.u32 %v9461_v34, 16 }
 0x23d   : > { %8732 = vmatprep.mubr.msk.bf16.mxu0 %vm452_vm3, %v10785_v21  ;;  %v6369_v21 = vor.u32 %v6367_v39, %v6365_v43 }
 0x23e   : > { %8817 = vmatmul.mubr.msk.bf16.gmra.mrb[28].mxu1 %vm452_vm3, %v9460_v35  ;;  %v6373_v17 = vrot.slane %v6371_v60, 1 }
 0x23f   : > { %8822 = vmatprep.mubr.msk.bf16.mxu1 %vm452_vm3, %v6352_v15 }
 0x240   : > { %v6374_v9 = vsel %vm415_vm2, %v6369_v21, %v6373_v17 }
 0x244   : > { %8733 = vmatmul.mubr.msk.bf16.vlgmr.msra.gmra.mrb[24].mxu0 %vm452_vm3, %v10821_v13  ;;  %v6462_v13 = vsel %vm613_vm4, %v6460_v18, %v6461_v1 }
 0x245   : > { %8741 = vmatpush3.bf16.msra.mxu0 %v9959_v11  ;;  %8736 = vmatprep.mubr.msk.bf16.mxu0 %vm452_vm3, %v10834_v22 }
 0x246   : > { %8823 = vmatmul.mubr.msk.bf16.vlgmr.msra.gmra.mrb[24].mxu1 %vm452_vm3, %v6359_v57 }
 0x247   : > { %8831 = vmatpush3.bf16.msra.mxu1 %v9959_v11  ;;  %8826 = vmatprep.mubr.msk.bf16.mxu1 %vm452_vm3, %v6366_v7  ;;  %v6463_v11 = vrot.slane %v9459_v56, 1 }
 0x249   : > { %v6464_v20 = vsel %vm613_vm4, %v6461_v1, %v6463_v11  ;;  %v6466_v22 = vsel %vm613_vm4, %v6463_v11, %v6465_v63 }
 0x24c   : > { %8737 = vmatmul.mubr.msk.bf16.gmra.mrb[28].mxu0 %vm452_vm3, %v10869_v30 }
 0x24d   : > { %8742 = vmatprep.mubr.msk.bf16.mxu0 %vm452_vm3, %v10874_v53 }
 0x24e   : > { %8827 = vmatmul.mubr.msk.bf16.gmra.mrb[28].mxu1 %vm452_vm3, %v6374_v9 }
 0x24f   : > { %8832 = vmatprep.mubr.msk.bf16.mxu1 %vm452_vm3, %v6462_v13 }
 0x254   : > { %8743 = vmatmul.mubr.msk.bf16.vlgmr.msra.gmra.mrb[24].mxu0 %vm452_vm3, %v10885_v59  ;;  %v10975_v59 = vld [vmem:[%s11126_s3] ss:$0 sm:$0xff] }
 0x255   : > { %8746 = vmatprep.mubr.msk.bf16.mxu0 %vm452_vm3, %v10890_v61 }
 0x256   : > { %8833 = vmatmul.mubr.msk.bf16.vlgmr.msra.gmra.mrb[24].mxu1 %vm452_vm3, %v6464_v20 }
 0x257   : > { %8836 = vmatprep.mubr.msk.bf16.mxu1 %vm452_vm3, %v6466_v22 }
 0x25c   : > { %8747 = vmatmul.mubr.msk.bf16.gmra.mrb[28].mxu0 %vm452_vm3, %v10904_v40 }
 0x25e   : > { %8837 = vmatmul.mubr.msk.bf16.gmra.mrb[28].mxu1 %vm452_vm3, %v6468_v38 }
 0x297   : > { %v8564_v23 = vpop.f32.mrb[16].mxu0 }
 0x298   : > { %v6791_v12 = vadd.f32 %v8564_v23, %v10424_v3  ;;  %v4292_v24 = vpop.f32.mrb[17].mxu0 }
 0x299   : > { %v8654_v25 = vpop.f32.mrb[16].mxu1  ;;  %v6789_v26 = vadd.f32 %v10424_v3, %v4292_v24  ;;  %v8565_v29 = vpop.f32.mrb[18].mxu0 }
 0x29a   : > { %v6799_v36 = vmax.f32 %v6791_v12, 0.0  ;;  %v6848_v19 = vadd.f32 %v8654_v25, %v10424_v3  ;;  %v5033_v42 = vpop.f32.mrb[17].mxu1  ;;  %v6792_v44 = vadd.f32 %v8565_v29, %v10424_v3  ;;  %v4295_v54 = vpop.f32.mrb[19].mxu0 }
 0x29b   : > { %v6797_v47 = vmax.f32 %v6789_v26, 0.0  ;;  %v6846_v45 = vadd.f32 %v10424_v3, %v5033_v42  ;;  %v8655_v28 = vpop.f32.mrb[18].mxu1  ;;  %v6790_v14 = vadd.f32 %v10424_v3, %v4295_v54 }
 0x29c   : > { %v7728_v49 = vpack.c.bf16 %v6799_v36, %v6799_v36  ;;  %v6856_v51 = vmax.f32 %v6848_v19, 0.0  ;;  %v6800_v46 = vmax.f32 %v6792_v44, 0.0  ;;  %v6849_v31 = vadd.f32 %v8655_v28, %v10424_v3  ;;  %v5036_v30 = vpop.f32.mrb[19].mxu1 }
 0x29d   : > { %v7726_v53 = vpack.c.bf16 %v6797_v47, %v6797_v47  ;;  %v6854_v33 = vmax.f32 %v6846_v45, 0.0  ;;  %v6798_v58 = vmax.f32 %v6790_v14, 0.0  ;;  %v6847_v61 = vadd.f32 %v10975_v59, %v5036_v30 }
 0x29e   : > { %7632 = vst.msk [vmem:[%s10463_s26 + $0x88] sm:$0xf] %vm6609_vm5, %v7728_v49  ;;  %v7736_v48 = vpack.c.bf16 %v6856_v51, %v6856_v51  ;;  %v7729_v40 = vpack.c.bf16 %v6800_v46, %v6800_v46  ;;  %v6857_v3 = vmax.f32 %v6849_v31, 0.0 }
 0x29f   : > { %7630 = vst.msk [vmem:[%s10463_s26 + $0x80] sm:$0xf] %vm6609_vm5, %v7726_v53  ;;  %v7734_v2 = vpack.c.bf16 %v6854_v33, %v6854_v33  ;;  %v7727_v50 = vpack.c.bf16 %v6798_v58, %v6798_v58  ;;  %v6855_v55 = vmax.f32 %v6847_v61, 0.0  ;;  %v8568_v56 = vpop.f32.mrb[20].mxu0 }
 0x2a0   : > { %7648 = vst.msk [vmem:[%s10463_s26 + $0xa8] sm:$0xf] %vm6609_vm5, %v7736_v48  ;;  %7633 = vst.msk [vmem:[%s10463_s26 + $0x8c] sm:$0xf] %vm6609_vm5, %v7729_v40  ;;  %v7737_v41 = vpack.c.bf16 %v6857_v3, %v6857_v3  ;;  %v6795_v4 = vadd.f32 %v10975_v59, %v8568_v56  ;;  %v4308_v8 = vpop.f32.mrb[21].mxu0 }
 0x2a1   : > { %7646 = vst.msk [vmem:[%s10463_s26 + $0xa0] sm:$0xf] %vm6609_vm5, %v7734_v2  ;;  %7631 = vst.msk [vmem:[%s10463_s26 + $0x84] sm:$0xf] %vm6609_vm5, %v7727_v50  ;;  %v7735_v32 = vpack.c.bf16 %v6855_v55, %v6855_v55  ;;  %v8658_v5 = vpop.f32.mrb[20].mxu1  ;;  %v6793_v35 = vadd.f32 %v10975_v59, %v4308_v8  ;;  %v8569_v6 = vpop.f32.mrb[22].mxu0 }
 0x2a2   : > { %7649 = vst.msk [vmem:[%s10463_s26 + $0xac] sm:$0xf] %vm6609_vm5, %v7737_v41  ;;  %v6803_v0 = vmax.f32 %v6795_v4, 0.0  ;;  %v6852_v15 = vadd.f32 %v10975_v59, %v8658_v5  ;;  %v5049_v27 = vpop.f32.mrb[21].mxu1  ;;  %v6796_v37 = vadd.f32 %v10975_v59, %v8569_v6  ;;  %v4311_v62 = vpop.f32.mrb[23].mxu0 }
 0x2a3   : > { %7647 = vst.msk [vmem:[%s10463_s26 + $0xa4] sm:$0xf] %vm6609_vm5, %v7735_v32  ;;  %v6801_v16 = vmax.f32 %v6793_v35, 0.0  ;;  %v6850_v34 = vadd.f32 %v10975_v59, %v5049_v27  ;;  %v8659_v52 = vpop.f32.mrb[22].mxu1  ;;  %v6794_v43 = vadd.f32 %v10975_v59, %v4311_v62 }
 0x2a4   : > { %v7732_v57 = vpack.c.bf16 %v6803_v0, %v6803_v0  ;;  %v6860_v39 = vmax.f32 %v6852_v15, 0.0  ;;  %v6804_v60 = vmax.f32 %v6796_v37, 0.0  ;;  %v6853_v7 = vadd.f32 %v10975_v59, %v8659_v52  ;;  %v5052_v21 = vpop.f32.mrb[23].mxu1 }
 0x2a5   : > { %v7730_v17 = vpack.c.bf16 %v6801_v16, %v6801_v16  ;;  %v6858_v18 = vmax.f32 %v6850_v34, 0.0  ;;  %v6802_v1 = vmax.f32 %v6794_v43, 0.0  ;;  %v6851_v9 = vadd.f32 %v10975_v59, %v5052_v21 }
 0x2a6   : > { %7636 = vst.msk [vmem:[%s10463_s26 + $0x98] sm:$0xf] %vm6609_vm5, %v7732_v57  ;;  %v7740_v13 = vpack.c.bf16 %v6860_v39, %v6860_v39  ;;  %v7733_v11 = vpack.c.bf16 %v6804_v60, %v6804_v60  ;;  %v6861_v63 = vmax.f32 %v6853_v7, 0.0 }
 0x2a7   : > { %7634 = vst.msk [vmem:[%s10463_s26 + $0x90] sm:$0xf] %vm6609_vm5, %v7730_v17  ;;  %v7738_v20 = vpack.c.bf16 %v6858_v18, %v6858_v18  ;;  %v7731_v22 = vpack.c.bf16 %v6802_v1, %v6802_v1  ;;  %v6859_v10 = vmax.f32 %v6851_v9, 0.0 }
 0x2a8   : > { %7652 = vst.msk [vmem:[%s10463_s26 + $0xb8] sm:$0xf] %vm6609_vm5, %v7740_v13  ;;  %7637 = vst.msk [vmem:[%s10463_s26 + $0x9c] sm:$0xf] %vm6609_vm5, %v7733_v11  ;;  %v7741_v38 = vpack.c.bf16 %v6861_v63, %v6861_v63 }
 0x2a9   : > { %7650 = vst.msk [vmem:[%s10463_s26 + $0xb0] sm:$0xf] %vm6609_vm5, %v7738_v20  ;;  %7635 = vst.msk [vmem:[%s10463_s26 + $0x94] sm:$0xf] %vm6609_vm5, %v7731_v22  ;;  %v7739_v23 = vpack.c.bf16 %v6859_v10, %v6859_v10 }
 0x2aa   : > { %7653 = vst.msk [vmem:[%s10463_s26 + $0xbc] sm:$0xf] %vm6609_vm5, %v7741_v38 }
 0x2ab   : > { %7651 = vst.msk [vmem:[%s10463_s26 + $0xb4] sm:$0xf] %vm6609_vm5, %v7739_v23 }
 0x327   : > { %v8744_v12 = vpop.f32.mrb[24].mxu0 }
 0x328   : > { %v6905_v24 = vadd.f32 %v10975_v59, %v8744_v12  ;;  %v5774_v25 = vpop.f32.mrb[25].mxu0 }
 0x329   : > { %v8834_v26 = vpop.f32.mrb[24].mxu1  ;;  %v6903_v29 = vadd.f32 %v10975_v59, %v5774_v25  ;;  %v8745_v36 = vpop.f32.mrb[26].mxu0 }
 0x32a   : > { %v6913_v19 = vmax.f32 %v6905_v24, 0.0  ;;  %v6962_v42 = vadd.f32 %v10975_v59, %v8834_v26  ;;  %v6515_v44 = vpop.f32.mrb[25].mxu1  ;;  %v6906_v54 = vadd.f32 %v10975_v59, %v8745_v36  ;;  %v5777_v47 = vpop.f32.mrb[27].mxu0 }
 0x32b   : > { %v6911_v45 = vmax.f32 %v6903_v29, 0.0  ;;  %v6960_v28 = vadd.f32 %v10975_v59, %v6515_v44  ;;  %v8835_v14 = vpop.f32.mrb[26].mxu1  ;;  %v6904_v49 = vadd.f32 %v10975_v59, %v5777_v47 }
 0x32c   : > { %v7744_v51 = vpack.c.bf16 %v6913_v19, %v6913_v19  ;;  %v6970_v46 = vmax.f32 %v6962_v42, 0.0  ;;  %v6914_v31 = vmax.f32 %v6906_v54, 0.0  ;;  %v6963_v30 = vadd.f32 %v10975_v59, %v8835_v14  ;;  %v6518_v53 = vpop.f32.mrb[27].mxu1 }
 0x32d   : > { %v7742_v33 = vpack.c.bf16 %v6911_v45, %v6911_v45  ;;  %v6968_v58 = vmax.f32 %v6960_v28, 0.0  ;;  %v6912_v61 = vmax.f32 %v6904_v49, 0.0  ;;  %v6961_v48 = vadd.f32 %v10975_v59, %v6518_v53 }
 0x32e   : > { %7664 = vst.msk [vmem:[%s10463_s26 + $0xc8] sm:$0xf] %vm6609_vm5, %v7744_v51  ;;  %v7752_v40 = vpack.c.bf16 %v6970_v46, %v6970_v46  ;;  %v7745_v3 = vpack.c.bf16 %v6914_v31, %v6914_v31  ;;  %v6971_v2 = vmax.f32 %v6963_v30, 0.0 }
 0x32f   : > { %7662 = vst.msk [vmem:[%s10463_s26 + $0xc0] sm:$0xf] %vm6609_vm5, %v7742_v33  ;;  %v7750_v50 = vpack.c.bf16 %v6968_v58, %v6968_v58  ;;  %v7743_v55 = vpack.c.bf16 %v6912_v61, %v6912_v61  ;;  %v6969_v56 = vmax.f32 %v6961_v48, 0.0  ;;  %v8748_v41 = vpop.f32.mrb[28].mxu0 }
 0x330   : > { %7680 = vst.msk [vmem:[%s10463_s26 + $0xe8] sm:$0xf] %vm6609_vm5, %v7752_v40  ;;  %7665 = vst.msk [vmem:[%s10463_s26 + $0xcc] sm:$0xf] %vm6609_vm5, %v7745_v3  ;;  %v7753_v4 = vpack.c.bf16 %v6971_v2, %v6971_v2  ;;  %v6909_v8 = vadd.f32 %v10975_v59, %v8748_v41  ;;  %v5790_v32 = vpop.f32.mrb[29].mxu0 }
 0x331   : > { %7678 = vst.msk [vmem:[%s10463_s26 + $0xe0] sm:$0xf] %vm6609_vm5, %v7750_v50  ;;  %7663 = vst.msk [vmem:[%s10463_s26 + $0xc4] sm:$0xf] %vm6609_vm5, %v7743_v55  ;;  %v7751_v5 = vpack.c.bf16 %v6969_v56, %v6969_v56  ;;  %v8838_v35 = vpop.f32.mrb[28].mxu1  ;;  %v6907_v6 = vadd.f32 %v10975_v59, %v5790_v32  ;;  %v8749_v0 = vpop.f32.mrb[30].mxu0 }
 0x332   : > { %7681 = vst.msk [vmem:[%s10463_s26 + $0xec] sm:$0xf] %vm6609_vm5, %v7753_v4  ;;  %v6917_v15 = vmax.f32 %v6909_v8, 0.0  ;;  %v6966_v27 = vadd.f32 %v10975_v59, %v8838_v35  ;;  %v6531_v37 = vpop.f32.mrb[29].mxu1  ;;  %v6910_v62 = vadd.f32 %v10975_v59, %v8749_v0  ;;  %v5793_v16 = vpop.f32.mrb[31].mxu0 }
 0x333   : > { %7679 = vst.msk [vmem:[%s10463_s26 + $0xe4] sm:$0xf] %vm6609_vm5, %v7751_v5  ;;  %v6915_v34 = vmax.f32 %v6907_v6, 0.0  ;;  %v6964_v52 = vadd.f32 %v10975_v59, %v6531_v37  ;;  %v8839_v43 = vpop.f32.mrb[30].mxu1  ;;  %v6908_v57 = vadd.f32 %v10975_v59, %v5793_v16 }
 0x334   : > { %v7748_v39 = vpack.c.bf16 %v6917_v15, %v6917_v15  ;;  %v6974_v60 = vmax.f32 %v6966_v27, 0.0  ;;  %v6918_v7 = vmax.f32 %v6910_v62, 0.0  ;;  %v6967_v21 = vadd.f32 %v10975_v59, %v8839_v43  ;;  %v6534_v17 = vpop.f32.mrb[31].mxu1 }
 0x335   : > { %v7746_v18 = vpack.c.bf16 %v6915_v34, %v6915_v34  ;;  %v6972_v1 = vmax.f32 %v6964_v52, 0.0  ;;  %v6916_v9 = vmax.f32 %v6908_v57, 0.0  ;;  %v6965_v13 = vadd.f32 %v10975_v59, %v6534_v17 }
 0x336   : > { %7668 = vst.msk [vmem:[%s10463_s26 + $0xd8] sm:$0xf] %vm6609_vm5, %v7748_v39  ;;  %v7756_v11 = vpack.c.bf16 %v6974_v60, %v6974_v60  ;;  %v7749_v63 = vpack.c.bf16 %v6918_v7, %v6918_v7  ;;  %v6975_v20 = vmax.f32 %v6967_v21, 0.0 }
 0x337   : > { %7666 = vst.msk [vmem:[%s10463_s26 + $0xd0] sm:$0xf] %vm6609_vm5, %v7746_v18  ;;  %v7754_v22 = vpack.c.bf16 %v6972_v1, %v6972_v1  ;;  %v7747_v10 = vpack.c.bf16 %v6916_v9, %v6916_v9  ;;  %v6973_v38 = vmax.f32 %v6965_v13, 0.0 }
 0x338   : > { %7684 = vst.msk [vmem:[%s10463_s26 + $0xf8] sm:$0xf] %vm6609_vm5, %v7756_v11  ;;  %7669 = vst.msk [vmem:[%s10463_s26 + $0xdc] sm:$0xf] %vm6609_vm5, %v7749_v63  ;;  %v7757_v59 = vpack.c.bf16 %v6975_v20, %v6975_v20 }
 0x339   : > { %7682 = vst.msk [vmem:[%s10463_s26 + $0xf0] sm:$0xf] %vm6609_vm5, %v7754_v22  ;;  %7667 = vst.msk [vmem:[%s10463_s26 + $0xd4] sm:$0xf] %vm6609_vm5, %v7747_v10  ;;  %v7755_v23 = vpack.c.bf16 %v6973_v38, %v6973_v38 }
 0x33a   : > { %7685 = vst.msk [vmem:[%s10463_s26 + $0xfc] sm:$0xf] %vm6609_vm5, %v7757_v59 }
 0x33b   : > { %7683 = vst.msk [vmem:[%s10463_s26 + $0xf4] sm:$0xf] %vm6609_vm5, %v7755_v23 }
 0x33c   : > { %9476 = shalt.err (!%p9473_p6)
}
 0x33d   : > { %s9477_s13 = scalar_lea.hbm %s11063_s11, 4096  ;;  %s9481_s30 = scalar_lea.hbm %s11127_s4, 32768 }
 0x33e   : > { %p9478_p7 = scmp.ne.s32.totalorder %s11063_s11, %s9477_s13  ;;  %p9482_p11 = scmp.lt.u32.totalorder %s11063_s11, %s11127_s4 }
 0x33f   : > { %p9483_p12 = scmp.lt.u32.totalorder %s9481_s30, %s9477_s13  ;;  %p9485_p0 = scmp.lt.u32.totalorder %s9477_s13, %s11063_s11 }
 0x340   : > { %p9479_p9 = pnand %p9478_p7, %p9612_p4 }
 0x341   : > { %p9484_p13 = por %p9483_p12, %p9482_p11 }
 0x342   : > { %p9480_p10 = pneg %p9479_p9 }
 0x343   : > { %p9486_p1 = por %p9485_p0, %p9484_p13 }
 0x345   : > { %p9487_p2 = pnand %p9486_p1, %p9480_p10 }
 0x347   : > { %9490 = shalt.err (!%p9487_p2)
}
 0x348   : > { %s9545_s7 = smov 64   ;;  %s9546_s8 = smov 4  }
 0x349   : > { %9354 = dma.vmem_to_hbm [thread:$0]  (%p9612_p4), %s11065_s9, 4096, %s11063_s11, %s11077_s14, %s9545_s7, %s9545_s7, %s9546_s8  }
 0x34a PF: > { %p9360_p3 = scmp.ge.s32.totalorder %s9541_s20, 2  ;;  %s7049_s18 = sand.u32 1, %s9521_s15  }
 0x34b   : > { %s7050_s10 = scalar_lea.sflag [#allocation3], %s7049_s18 }
 0x34c   : > { %p9357_p5 = pnand %p9360_p3, %p9619_p8 }
 0x34e   : > { %9516 = dma.done.wait (!%p9357_p5), %s7050_s10, 4096  }
 0x34f   : > { %9518 = vsyncadd (!%p9357_p5), %s7050_s10, 4294963200  ;;  %s17_s20 = sadd.s32 1, %s9541_s20   ;;  %s11130_s15 = smov %s9525_s16 }
 0x350   : > { %p14_p6 = scmp.ge.s32.totalorder %s17_s20, 10   ;;  %s11131_s16 = smov %s9529_s17 }
 0x351   : > { %s11132_s17 = smov %s9625_s28  ;;  %s11133_s18 = smov %s9537_s19 }
 0x352   : > { %s11134_s19 = smov %s11136_s23  ;;  %16 = sbr.rel (!%p14_p6) target bundleno = 4 (0x4), region = 97 }
 0x359   :  { %7055 = vsyncpa [#allocation3], 1 }
 0x35a   :  { %7057 = vsyncpa [#allocation3 + $0x1], 1 }

</bundles_post_ra>
